<compile_context>
chip_gen: v5e
topology: v5e:2x2
jax: 0.10.0
libtpu: 0.0.40
codegen_flags: <defaults>
</compile_context>

<pallas_src>
import functools

import jax
import jax.numpy as jnp
from jax import lax
from jax.experimental import pallas as pl
from jax.experimental.pallas import tpu as pltpu


# ---------------------------------------------------------------------------
# In-kernel helpers
# ---------------------------------------------------------------------------
def _layernorm_lastdim(x, gamma, beta, eps):
    """LayerNorm over the last dim; two-pass centered-variance formulation."""
    mu = jnp.mean(x, axis=-1, keepdims=True)
    xc = x - mu
    var = jnp.mean(xc * xc, axis=-1, keepdims=True)
    return xc * lax.rsqrt(var + eps) * gamma + beta


# ---------------------------------------------------------------------------
# Fused kernel: grid = (row_tiles, depth).  One (Bblk, T, D) activation block
# per row tile stays resident in a VMEM f32 scratch across all depth layers;
# the final LayerNorm is applied in the last-layer epilogue.
# Dropout layers are inference-mode identities.
# ---------------------------------------------------------------------------
def _fused_kernel(x_ref, tok_ref,
                  ln1g_ref, ln1b_ref, wqkv_ref,
                  reattn_w_ref, lnh_g_ref, lnh_b_ref,
                  wo_ref, bo_ref, ln2g_ref, ln2b_ref,
                  w1_ref, b1_ref, w2_ref, b2_ref,
                  normg_ref, normb_ref,
                  o_ref,
                  acc_ref, attn_out_ref,
                  *, bblk, num_frames, heads, dim_head, eps):
    l = pl.program_id(1)                      # layer index (depth grid axis)
    T = num_frames
    rows = bblk * T
    inner = heads * dim_head
    scale = dim_head ** -0.5
    bf16 = jnp.bfloat16

    # ---- layer 0: load activations + temporal token into the f32 carrier ----
    @pl.when(l == 0)
    def _():
        tok = tok_ref[...].astype(jnp.float32)            # (T, D)
        for b in range(bblk):
            acc_ref[b * T:(b + 1) * T, :] = x_ref[b].astype(jnp.float32) + tok

    x = acc_ref[...]                                      # (rows, D) f32

    # ---- PreNorm + ReAttention ---------------------------------------------
    y = _layernorm_lastdim(x, ln1g_ref[...], ln1b_ref[...], eps)
    qkv = jnp.dot(y.astype(bf16), wqkv_ref[...],
                  preferred_element_type=jnp.float32)     # (rows, 3*inner) f32

    # Per-(batch, head) attention, unrolled over static counts (2-D ops only).
    for b in range(bblk):
        r0 = b * T
        attn_h = []
        v_h = []
        for h in range(heads):
            q = qkv[r0:r0 + T, h * dim_head:(h + 1) * dim_head]
            k = qkv[r0:r0 + T, inner + h * dim_head: inner + (h + 1) * dim_head]
            v = qkv[r0:r0 + T, 2 * inner + h * dim_head: 2 * inner + (h + 1) * dim_head]
            d = lax.dot_general(q.astype(bf16), k.astype(bf16),
                                (((1,), (1,)), ((), ())),
                                preferred_element_type=jnp.float32) * scale
            d = d - jnp.max(d, axis=-1, keepdims=True)
            p = jnp.exp(d)
            denom = jnp.sum(p, axis=-1, keepdims=True)
            attn_h.append(p * pl.reciprocal(denom, approx=True))
            v_h.append(v.astype(bf16))

        # Re-attention head mixing: mixed[g] = sum_h attn[h] * W[l, h, g]
        mixed = [sum(attn_h[h] * reattn_w_ref[l, h, g] for h in range(heads))
                 for g in range(heads)]

        # LayerNorm across the head axis (per (i, j) position), two-pass.
        inv_hd = 1.0 / heads
        mu = sum(mixed) * inv_hd
        var = sum((m - mu) * (m - mu) for m in mixed) * inv_hd
        inv = lax.rsqrt(var + eps)
        for g in range(heads):
            normed = (mixed[g] - mu) * inv * lnh_g_ref[l, g] + lnh_b_ref[l, g]
            o_hg = jnp.dot(normed.astype(bf16), v_h[g],
                           preferred_element_type=jnp.float32)   # (T, dim_head)
            attn_out_ref[r0:r0 + T, g * dim_head:(g + 1) * dim_head] = o_hg

    out = jnp.dot(attn_out_ref[...].astype(bf16), wo_ref[...],
                  preferred_element_type=jnp.float32) + bo_ref[...]
    x = x + out

    # ---- PreNorm + FeedForward ---------------------------------------------
    # TODO(synk): PyTorch nn.GELU default is erf-exact; the tanh approximation
    # is used here (and in the reference) for a Mosaic-friendly EUP path.
    y2 = _layernorm_lastdim(x, ln2g_ref[...], ln2b_ref[...], eps)
    hdn = jnp.dot(y2.astype(bf16), w1_ref[...],
                  preferred_element_type=jnp.float32) + b1_ref[...]
    hdn = jax.nn.gelu(hdn, approximate=True)
    x = x + jnp.dot(hdn.astype(bf16), w2_ref[...],
                    preferred_element_type=jnp.float32) + b2_ref[...]

    acc_ref[...] = x                                      # carry to next layer

    # ---- last layer: final LayerNorm epilogue + single HBM writeback --------
    @pl.when(l == pl.num_programs(1) - 1)
    def _():
        xo = _layernorm_lastdim(x, normg_ref[...], normb_ref[...], eps)
        for b in range(bblk):
            o_ref[b] = xo[b * T:(b + 1) * T, :].astype(o_ref.dtype)


def _pick_bblk(batch, frames, target_rows=256, max_rows=1024):
    """Largest divisor of batch whose row count stays <= max_rows, stopping
    once the fold reaches target_rows (>=128/256 rows keeps the MXU busy)."""
    best = 1
    for cand in range(1, batch + 1):
        if batch % cand:
            continue
        if cand * frames > max_rows:
            break
        best = cand
        if cand * frames >= target_rows:
            break
    return best


# ---------------------------------------------------------------------------
# Full module forward (one pallas_call for all layers + final LayerNorm)
# ---------------------------------------------------------------------------
def temporal_transformer_block(x, params, *, num_frames, heads, dim_head,
                               eps=1e-5):
    """x: (B*num_frames, dim) -> (B, num_frames, dim)."""
    BT, D = x.shape
    T = num_frames
    B = BT // T
    layers = params["layers"]
    depth = len(layers)
    inner = heads * dim_head
    hidden = layers[0]["w1"].shape[1]

    bblk = _pick_bblk(B, T)
    rows = bblk * T
    n_tiles = B // bblk

    xb = x.reshape(B, T, D)                       # rearrange '(b t) d -> b t d'
    tok = params["temporal_token"].reshape(T, D)

    def stack(name):
        return jnp.stack([lp[name] for lp in layers])

    def resident(shape):
        zeros = (0,) * len(shape)
        return pl.BlockSpec(shape, lambda i, l: zeros)

    def per_layer(shape):
        zeros = (0,) * len(shape)
        return pl.BlockSpec((None,) + shape, lambda i, l: (l,) + zeros)

    smem_spec = pl.BlockSpec(memory_space=pltpu.MemorySpace.SMEM)

    in_specs = [
        pl.BlockSpec((bblk, T, D), lambda i, l: (i, 0, 0)),   # x (read at l==0)
        resident((T, D)),                                      # temporal token
        per_layer((1, D)), per_layer((1, D)),                  # ln1 gamma/beta
        per_layer((D, 3 * inner)),                             # w_qkv (bf16)
        smem_spec, smem_spec, smem_spec,                       # reattn_w, lnh g/b
        per_layer((inner, D)), per_layer((1, D)),              # w_out, b_out
        per_layer((1, D)), per_layer((1, D)),                  # ln2 gamma/beta
        per_layer((D, hidden)), per_layer((1, hidden)),        # w1, b1
        per_layer((hidden, D)), per_layer((1, D)),             # w2, b2
        resident((1, D)), resident((1, D)),                    # final norm g/b
    ]
    operands = [
        xb, tok,
        stack("ln1_g"), stack("ln1_b"), stack("w_qkv"),
        stack("reattn_w"), stack("lnh_g"), stack("lnh_b"),
        stack("w_out"), stack("b_out"),
        stack("ln2_g"), stack("ln2_b"),
        stack("w1"), stack("b1"), stack("w2"), stack("b2"),
        params["norm_g"], params["norm_b"],
    ]

    flops = depth * (2 * B * T * D * 3 * inner          # qkv projection
                     + 4 * B * heads * T * T * dim_head  # q@k^T and attn@v
                     + 2 * B * heads * heads * T * T     # head mixing
                     + 2 * B * T * inner * D             # output projection
                     + 4 * B * T * D * hidden)           # feed-forward
    transcendentals = depth * (B * heads * T * T + B * T * hidden)
    bytes_accessed = (
        4 * 2 * B * T * D + 4 * T * D
        + 2 * n_tiles * depth * (D * 3 * inner + inner * D + 2 * D * hidden)
        + 4 * depth * (6 * D + 2 * hidden + heads * heads + 2 * heads)
        + 4 * 2 * D)

    kernel = functools.partial(_fused_kernel, bblk=bblk, num_frames=T,
                               heads=heads, dim_head=dim_head, eps=eps)
    # TODO(synk): at production dims, single-buffer the weight specs
    # (pipeline_mode=pl.Buffered(1)) and raise vmem_limit_bytes for v7x.
    return pl.pallas_call(
        kernel,
        grid=(n_tiles, depth),
        out_shape=jax.ShapeDtypeStruct((B, T, D), x.dtype),
        in_specs=in_specs,
        out_specs=pl.BlockSpec((bblk, T, D), lambda i, l: (i, 0, 0)),
        scratch_shapes=[pltpu.VMEM((rows, D), jnp.float32),      # layer carrier
                        pltpu.VMEM((rows, inner), jnp.float32)], # attn out assembly
        compiler_params=pltpu.CompilerParams(
            dimension_semantics=("parallel", "arbitrary")),
        cost_estimate=pl.CostEstimate(flops=flops,
                                      transcendentals=transcendentals,
                                      bytes_accessed=bytes_accessed),
    )(*operands)


# ---------------------------------------------------------------------------
# Pure-JAX reference (mirrors the PyTorch forward, eval-mode dropout; uses the
# same bf16 matmul inputs + f32 accumulation as the kernel so the comparison
# isolates kernel correctness rather than precision choices).
# ---------------------------------------------------------------------------
def _ln_ref(x, g, b, eps):
    mu = jnp.mean(x, axis=-1, keepdims=True)
    var = jnp.mean((x - mu) ** 2, axis=-1, keepdims=True)
    return (x - mu) * lax.rsqrt(var + eps) * g + b


def temporal_transformer_block_ref(x, params, *, num_frames, heads, dim_head,
                                   eps=1e-5):
    f32, bf16 = jnp.float32, jnp.bfloat16
    hp = jax.lax.Precision.HIGHEST
    BT, D = x.shape
    T = num_frames
    B = BT // T
    H, Dh = heads, dim_head
    inner = H * Dh
    xb = x.reshape(B, T, D).astype(f32) + params["temporal_token"].astype(f32)
    for lp in params["layers"]:
        y = _ln_ref(xb, lp["ln1_g"], lp["ln1_b"], eps)
        qkv = jnp.matmul(y.astype(bf16), lp["w_qkv"], preferred_element_type=f32)
        q, k, v = jnp.split(qkv, 3, axis=-1)
        split = lambda t: t.reshape(B, T, H, Dh).transpose(0, 2, 1, 3)
        q, k, v = split(q), split(k), split(v)
        dots = jnp.einsum('bhid,bhjd->bhij', q.astype(bf16), k.astype(bf16),
                          preferred_element_type=f32) * (Dh ** -0.5)
        attn = jax.nn.softmax(dots, axis=-1)
        attn = jnp.einsum('bhij,hg->bgij', attn, lp["reattn_w"], precision=hp)
        a = attn.transpose(0, 2, 3, 1)
        a = _ln_ref(a, lp["lnh_g"], lp["lnh_b"], eps)
        attn = a.transpose(0, 3, 1, 2)
        out = jnp.einsum('bhij,bhjd->bhid', attn.astype(bf16), v.astype(bf16),
                         preferred_element_type=f32)
        out = out.transpose(0, 2, 1, 3).reshape(B, T, inner)
        xb = xb + jnp.matmul(out.astype(bf16), lp["w_out"],
                             preferred_element_type=f32) + lp["b_out"]
        y2 = _ln_ref(xb, lp["ln2_g"], lp["ln2_b"], eps)
        hdn = jax.nn.gelu(jnp.matmul(y2.astype(bf16), lp["w1"],
                                     preferred_element_type=f32) + lp["b1"],
                          approximate=True)
        xb = xb + jnp.matmul(hdn.astype(bf16), lp["w2"],
                             preferred_element_type=f32) + lp["b2"]
    return _ln_ref(xb, params["norm_g"], params["norm_b"], eps)


if __name__ == "__main__":
    # Small shapes consistent with the module; dim kept a multiple of 128 so
    # every matmul operand / store is lane-dense.
    B, num_frames = 2, 8
    dim, heads, dim_head = 128, 4, 32
    depth, scale_dim = 2, 4
    inner = heads * dim_head
    hidden = dim * scale_dim
    eps = 1e-5

    key = jax.random.PRNGKey(0)
    keys = iter(jax.random.split(key, 8 + 16 * depth))

    def rand(shape, scale=1.0, dtype=jnp.float32):
        v = scale * jax.random.normal(next(keys), shape, dtype=jnp.float32)
        return v.astype(dtype)

    bf16 = jnp.bfloat16
    params = {
        "temporal_token": rand((1, num_frames, dim), 0.5),
        "norm_g": 1.0 + rand((1, dim), 0.02),
        "norm_b": rand((1, dim), 0.02),
        "layers": [],
    }
    for _ in range(depth):
        params["layers"].append({
            "ln1_g": 1.0 + rand((1, dim), 0.02),
            "ln1_b": rand((1, dim), 0.02),
            "w_qkv": rand((dim, 3 * inner), dim ** -0.5, bf16),
            "reattn_w": rand((heads, heads), 1.0),
            "lnh_g": 1.0 + rand((heads,), 0.02),
            "lnh_b": rand((heads,), 0.02),
            "w_out": rand((inner, dim), inner ** -0.5, bf16),
            "b_out": rand((1, dim), 0.02),
            "ln2_g": 1.0 + rand((1, dim), 0.02),
            "ln2_b": rand((1, dim), 0.02),
            "w1": rand((dim, hidden), dim ** -0.5, bf16),
            "b1": rand((1, hidden), 0.02),
            "w2": rand((hidden, dim), hidden ** -0.5, bf16),
            "b2": rand((1, dim), 0.02),
        })

    x = rand((B * num_frames, dim), 1.0)

    fwd = jax.jit(functools.partial(temporal_transformer_block,
                                    num_frames=num_frames, heads=heads,
                                    dim_head=dim_head, eps=eps))
    out = jax.block_until_ready(fwd(x, params))

    ref = temporal_transformer_block_ref(x, params, num_frames=num_frames,
                                         heads=heads, dim_head=dim_head,
                                         eps=eps)
    assert out.shape == (B, num_frames, dim), out.shape
    max_err = float(jnp.max(jnp.abs(out - ref)))
    # Tolerance covers bf16 matmul inputs + approx softmax reciprocal.
    assert jnp.allclose(out, ref, atol=2e-2, rtol=2e-2), max_err

    print("KERNEL_OK")
</pallas_src>

<mosaic_0001>
module attributes {stable_mosaic.version = 11 : i64} {
  func.func @_fused_kernel(%arg0: i32, %arg1: i32, %arg2: memref<2x8x128xf32, #tpu.memory_space<vmem>>, %arg3: memref<8x128xf32, #tpu.memory_space<vmem>>, %arg4: memref<1x1x128xf32, #tpu.memory_space<vmem>>, %arg5: memref<1x1x128xf32, #tpu.memory_space<vmem>>, %arg6: memref<1x128x384xbf16, #tpu.memory_space<vmem>>, %arg7: memref<2x4x4xf32, #tpu.memory_space<smem>>, %arg8: memref<2x4xf32, #tpu.memory_space<smem>>, %arg9: memref<2x4xf32, #tpu.memory_space<smem>>, %arg10: memref<1x128x128xbf16, #tpu.memory_space<vmem>>, %arg11: memref<1x1x128xf32, #tpu.memory_space<vmem>>, %arg12: memref<1x1x128xf32, #tpu.memory_space<vmem>>, %arg13: memref<1x1x128xf32, #tpu.memory_space<vmem>>, %arg14: memref<1x128x512xbf16, #tpu.memory_space<vmem>>, %arg15: memref<1x1x512xf32, #tpu.memory_space<vmem>>, %arg16: memref<1x512x128xbf16, #tpu.memory_space<vmem>>, %arg17: memref<1x1x128xf32, #tpu.memory_space<vmem>>, %arg18: memref<1x128xf32, #tpu.memory_space<vmem>>, %arg19: memref<1x128xf32, #tpu.memory_space<vmem>>, %arg20: memref<2x8x128xf32, #tpu.memory_space<vmem>>, %arg21: memref<16x128xf32, #tpu.memory_space<vmem>>, %arg22: memref<16x128xf32, #tpu.memory_space<vmem>>) attributes {dimension_semantics = [#tpu.dimension_semantics<parallel>, #tpu.dimension_semantics<arbitrary>], iteration_bounds = array<i64: 1, 2>, scalar_prefetch = 0 : i64, scratch_operands = 2 : i64, tpu.core_type = #tpu.core_type<tc>, window_params = [{transform_indices = @transform_0, window_bounds = array<i64: 2, 8, 128>}, {pipeline_mode = #tpu.pipeline_mode<synchronous>, transform_indices = @transform_1, window_bounds = array<i64: 8, 128>}, {transform_indices = @transform_2, window_bounds = array<i64: 1, 1, 128>}, {transform_indices = @transform_3, window_bounds = array<i64: 1, 1, 128>}, {transform_indices = @transform_4, window_bounds = array<i64: 1, 128, 384>}, {transform_indices = @transform_5, window_bounds = array<i64: 2, 4, 4>}, {transform_indices = @transform_6, window_bounds = array<i64: 2, 4>}, {transform_indices = @transform_7, window_bounds = array<i64: 2, 4>}, {transform_indices = @transform_8, window_bounds = array<i64: 1, 128, 128>}, {transform_indices = @transform_9, window_bounds = array<i64: 1, 1, 128>}, {transform_indices = @transform_10, window_bounds = array<i64: 1, 1, 128>}, {transform_indices = @transform_11, window_bounds = array<i64: 1, 1, 128>}, {transform_indices = @transform_12, window_bounds = array<i64: 1, 128, 512>}, {transform_indices = @transform_13, window_bounds = array<i64: 1, 1, 512>}, {transform_indices = @transform_14, window_bounds = array<i64: 1, 512, 128>}, {transform_indices = @transform_15, window_bounds = array<i64: 1, 1, 128>}, {pipeline_mode = #tpu.pipeline_mode<synchronous>, transform_indices = @transform_16, window_bounds = array<i64: 1, 128>}, {pipeline_mode = #tpu.pipeline_mode<synchronous>, transform_indices = @transform_17, window_bounds = array<i64: 1, 128>}, {transform_indices = @transform_18, window_bounds = array<i64: 2, 8, 128>}]} {
    %c0_i32 = arith.constant 0 : i32
    %0 = arith.cmpi eq, %arg1, %c0_i32 : i32
    %1 = arith.extui %0 : i1 to i32
    %c0_i32_0 = arith.constant 0 : i32
    %2 = arith.cmpi ne, %1, %c0_i32_0 : i32
    scf.if %2 {
      %c0_204 = arith.constant 0 : index
      %c0_205 = arith.constant 0 : index
      %582 = vector.load %arg3[%c0_204, %c0_205] : memref<8x128xf32, #tpu.memory_space<vmem>>, vector<8x128xf32>
      %c0_206 = arith.constant 0 : index
      %c0_207 = arith.constant 0 : index
      %c0_208 = arith.constant 0 : index
      %583 = vector.load %arg2[%c0_206, %c0_207, %c0_208] : memref<2x8x128xf32, #tpu.memory_space<vmem>>, vector<1x8x128xf32>
      %584 = vector.shape_cast %583 : vector<1x8x128xf32> to vector<8x128xf32>
      %585 = arith.addf %584, %582 : vector<8x128xf32>
      %c0_209 = arith.constant 0 : index
      %c0_210 = arith.constant 0 : index
      %586 = vector.load %arg21[%c0_209, %c0_210] : memref<16x128xf32, #tpu.memory_space<vmem>>, vector<8x128xf32>
      tpu.vector_store %arg21[%c0_209, %c0_210], %585 {strides = array<i32>} : memref<16x128xf32, #tpu.memory_space<vmem>>, vector<8x128xf32>,
      %c1_211 = arith.constant 1 : index
      %c0_212 = arith.constant 0 : index
      %c0_213 = arith.constant 0 : index
      %587 = vector.load %arg2[%c1_211, %c0_212, %c0_213] : memref<2x8x128xf32, #tpu.memory_space<vmem>>, vector<1x8x128xf32>
      %588 = vector.shape_cast %587 : vector<1x8x128xf32> to vector<8x128xf32>
      %589 = arith.addf %588, %582 : vector<8x128xf32>
      %c8_214 = arith.constant 8 : index
      %c0_215 = arith.constant 0 : index
      %590 = vector.load %arg21[%c8_214, %c0_215] : memref<16x128xf32, #tpu.memory_space<vmem>>, vector<8x128xf32>
      tpu.vector_store %arg21[%c8_214, %c0_215], %589 {strides = array<i32>} : memref<16x128xf32, #tpu.memory_space<vmem>>, vector<8x128xf32>,
    } else {
    }
    %c0 = arith.constant 0 : index
    %c0_1 = arith.constant 0 : index
    %3 = vector.load %arg21[%c0, %c0_1] : memref<16x128xf32, #tpu.memory_space<vmem>>, vector<16x128xf32>
    %c0_2 = arith.constant 0 : index
    %c0_3 = arith.constant 0 : index
    %c0_4 = arith.constant 0 : index
    %4 = vector.load %arg4[%c0_2, %c0_3, %c0_4] : memref<1x1x128xf32, #tpu.memory_space<vmem>>, vector<1x1x128xf32>
    %5 = vector.shape_cast %4 : vector<1x1x128xf32> to vector<1x128xf32>
    %c0_5 = arith.constant 0 : index
    %c0_6 = arith.constant 0 : index
    %c0_7 = arith.constant 0 : index
    %6 = vector.load %arg5[%c0_5, %c0_6, %c0_7] : memref<1x1x128xf32, #tpu.memory_space<vmem>>, vector<1x1x128xf32>
    %7 = vector.shape_cast %6 : vector<1x1x128xf32> to vector<1x128xf32>
    %cst = arith.constant dense<0.000000e+00> : vector<16xf32>
    %8 = vector.multi_reduction <add>, %3, %cst [1] : vector<16x128xf32> to vector<16xf32>
    %9 = vector.shape_cast %8 : vector<16xf32> to vector<16x1xf32>
    %cst_8 = arith.constant 1.280000e+02 : f32
    %10 = vector.broadcast %cst_8 : f32 to vector<16x1xf32>
    %11 = arith.divf %9, %10 : vector<16x1xf32>
    %12 = vector.broadcast %11 : vector<16x1xf32> to vector<16x128xf32>
    %13 = arith.subf %3, %12 : vector<16x128xf32>
    %14 = arith.mulf %13, %13 : vector<16x128xf32>
    %cst_9 = arith.constant dense<0.000000e+00> : vector<16xf32>
    %15 = vector.multi_reduction <add>, %14, %cst_9 [1] : vector<16x128xf32> to vector<16xf32>
    %16 = vector.shape_cast %15 : vector<16xf32> to vector<16x1xf32>
    %cst_10 = arith.constant 1.280000e+02 : f32
    %17 = vector.broadcast %cst_10 : f32 to vector<16x1xf32>
    %18 = arith.divf %16, %17 : vector<16x1xf32>
    %cst_11 = arith.constant 9.99999974E-6 : f32
    %19 = vector.broadcast %cst_11 : f32 to vector<16x1xf32>
    %20 = arith.addf %18, %19 : vector<16x1xf32>
    %21 = math.rsqrt %20 : vector<16x1xf32>
    %22 = vector.broadcast %21 : vector<16x1xf32> to vector<16x128xf32>
    %23 = arith.mulf %13, %22 : vector<16x128xf32>
    %24 = vector.broadcast %5 : vector<1x128xf32> to vector<16x128xf32>
    %25 = arith.mulf %23, %24 : vector<16x128xf32>
    %26 = vector.broadcast %7 : vector<1x128xf32> to vector<16x128xf32>
    %27 = arith.addf %25, %26 : vector<16x128xf32>
    %28 = arith.truncf %27 : vector<16x128xf32> to vector<16x128xbf16>
    %c0_12 = arith.constant 0 : index
    %c0_13 = arith.constant 0 : index
    %c0_14 = arith.constant 0 : index
    %29 = vector.load %arg6[%c0_12, %c0_13, %c0_14] : memref<1x128x384xbf16, #tpu.memory_space<vmem>>, vector<1x128x384xbf16>
    %30 = vector.shape_cast %29 : vector<1x128x384xbf16> to vector<128x384xbf16>
    %cst_15 = arith.constant dense<0.000000e+00> : vector<16x384xf32>
    %31 = tpu.matmul %28, %30, %cst_15 {dimension_numbers = #tpu.dot_dimension_numbers<[1], [0], [0], [1], [0, 0, 1, 1], [], []>} : vector<16x128xbf16>, vector<128x384xbf16>, vector<16x384xf32> -> vector<16x384xf32>
    %32 = vector.extract_strided_slice %31 {offsets = [0, 0], sizes = [8, 32], strides = [1, 1]} : vector<16x384xf32> to vector<8x32xf32>
    %33 = vector.extract_strided_slice %31 {offsets = [0, 128], sizes = [8, 32], strides = [1, 1]} : vector<16x384xf32> to vector<8x32xf32>
    %34 = vector.extract_strided_slice %31 {offsets = [0, 256], sizes = [8, 32], strides = [1, 1]} : vector<16x384xf32> to vector<8x32xf32>
    %35 = arith.truncf %32 : vector<8x32xf32> to vector<8x32xbf16>
    %36 = arith.truncf %33 : vector<8x32xf32> to vector<8x32xbf16>
    %cst_16 = arith.constant dense<0.000000e+00> : vector<8x8xf32>
    %37 = tpu.matmul %35, %36, %cst_16 {dimension_numbers = #tpu.dot_dimension_numbers<[1], [1], [0], [0], [0, 0, 1, 0], [], []>} : vector<8x32xbf16>, vector<8x32xbf16>, vector<8x8xf32> -> vector<8x8xf32>
    %cst_17 = arith.constant 0.176776692 : f32
    %38 = vector.broadcast %cst_17 : f32 to vector<8x8xf32>
    %39 = arith.mulf %37, %38 : vector<8x8xf32>
    %cst_18 = arith.constant dense<0xFF800000> : vector<8xf32>
    %40 = vector.multi_reduction <maximumf>, %39, %cst_18 [1] : vector<8x8xf32> to vector<8xf32>
    %41 = vector.shape_cast %40 : vector<8xf32> to vector<8x1xf32>
    %42 = vector.broadcast %41 : vector<8x1xf32> to vector<8x8xf32>
    %43 = arith.subf %39, %42 : vector<8x8xf32>
    %44 = math.exp %43 : vector<8x8xf32>
    %cst_19 = arith.constant dense<0.000000e+00> : vector<8xf32>
    %45 = vector.multi_reduction <add>, %44, %cst_19 [1] : vector<8x8xf32> to vector<8xf32>
    %46 = vector.shape_cast %45 : vector<8xf32> to vector<8x1xf32>
    %47 = tpu.reciprocal %46 {approx = true} : vector<8x1xf32> -> vector<8x1xf32>
    %48 = vector.broadcast %47 : vector<8x1xf32> to vector<8x8xf32>
    %49 = arith.mulf %44, %48 : vector<8x8xf32>
    %50 = arith.truncf %34 : vector<8x32xf32> to vector<8x32xbf16>
    %51 = vector.extract_strided_slice %31 {offsets = [0, 32], sizes = [8, 32], strides = [1, 1]} : vector<16x384xf32> to vector<8x32xf32>
    %52 = vector.extract_strided_slice %31 {offsets = [0, 160], sizes = [8, 32], strides = [1, 1]} : vector<16x384xf32> to vector<8x32xf32>
    %53 = vector.extract_strided_slice %31 {offsets = [0, 288], sizes = [8, 32], strides = [1, 1]} : vector<16x384xf32> to vector<8x32xf32>
    %54 = arith.truncf %51 : vector<8x32xf32> to vector<8x32xbf16>
    %55 = arith.truncf %52 : vector<8x32xf32> to vector<8x32xbf16>
    %cst_20 = arith.constant dense<0.000000e+00> : vector<8x8xf32>
    %56 = tpu.matmul %54, %55, %cst_20 {dimension_numbers = #tpu.dot_dimension_numbers<[1], [1], [0], [0], [0, 0, 1, 0], [], []>} : vector<8x32xbf16>, vector<8x32xbf16>, vector<8x8xf32> -> vector<8x8xf32>
    %cst_21 = arith.constant 0.176776692 : f32
    %57 = vector.broadcast %cst_21 : f32 to vector<8x8xf32>
    %58 = arith.mulf %56, %57 : vector<8x8xf32>
    %cst_22 = arith.constant dense<0xFF800000> : vector<8xf32>
    %59 = vector.multi_reduction <maximumf>, %58, %cst_22 [1] : vector<8x8xf32> to vector<8xf32>
    %60 = vector.shape_cast %59 : vector<8xf32> to vector<8x1xf32>
    %61 = vector.broadcast %60 : vector<8x1xf32> to vector<8x8xf32>
    %62 = arith.subf %58, %61 : vector<8x8xf32>
    %63 = math.exp %62 : vector<8x8xf32>
    %cst_23 = arith.constant dense<0.000000e+00> : vector<8xf32>
    %64 = vector.multi_reduction <add>, %63, %cst_23 [1] : vector<8x8xf32> to vector<8xf32>
    %65 = vector.shape_cast %64 : vector<8xf32> to vector<8x1xf32>
    %66 = tpu.reciprocal %65 {approx = true} : vector<8x1xf32> -> vector<8x1xf32>
    %67 = vector.broadcast %66 : vector<8x1xf32> to vector<8x8xf32>
    %68 = arith.mulf %63, %67 : vector<8x8xf32>
    %69 = arith.truncf %53 : vector<8x32xf32> to vector<8x32xbf16>
    %70 = vector.extract_strided_slice %31 {offsets = [0, 64], sizes = [8, 32], strides = [1, 1]} : vector<16x384xf32> to vector<8x32xf32>
    %71 = vector.extract_strided_slice %31 {offsets = [0, 192], sizes = [8, 32], strides = [1, 1]} : vector<16x384xf32> to vector<8x32xf32>
    %72 = vector.extract_strided_slice %31 {offsets = [0, 320], sizes = [8, 32], strides = [1, 1]} : vector<16x384xf32> to vector<8x32xf32>
    %73 = arith.truncf %70 : vector<8x32xf32> to vector<8x32xbf16>
    %74 = arith.truncf %71 : vector<8x32xf32> to vector<8x32xbf16>
    %cst_24 = arith.constant dense<0.000000e+00> : vector<8x8xf32>
    %75 = tpu.matmul %73, %74, %cst_24 {dimension_numbers = #tpu.dot_dimension_numbers<[1], [1], [0], [0], [0, 0, 1, 0], [], []>} : vector<8x32xbf16>, vector<8x32xbf16>, vector<8x8xf32> -> vector<8x8xf32>
    %cst_25 = arith.constant 0.176776692 : f32
    %76 = vector.broadcast %cst_25 : f32 to vector<8x8xf32>
    %77 = arith.mulf %75, %76 : vector<8x8xf32>
    %cst_26 = arith.constant dense<0xFF800000> : vector<8xf32>
    %78 = vector.multi_reduction <maximumf>, %77, %cst_26 [1] : vector<8x8xf32> to vector<8xf32>
    %79 = vector.shape_cast %78 : vector<8xf32> to vector<8x1xf32>
    %80 = vector.broadcast %79 : vector<8x1xf32> to vector<8x8xf32>
    %81 = arith.subf %77, %80 : vector<8x8xf32>
    %82 = math.exp %81 : vector<8x8xf32>
    %cst_27 = arith.constant dense<0.000000e+00> : vector<8xf32>
    %83 = vector.multi_reduction <add>, %82, %cst_27 [1] : vector<8x8xf32> to vector<8xf32>
    %84 = vector.shape_cast %83 : vector<8xf32> to vector<8x1xf32>
    %85 = tpu.reciprocal %84 {approx = true} : vector<8x1xf32> -> vector<8x1xf32>
    %86 = vector.broadcast %85 : vector<8x1xf32> to vector<8x8xf32>
    %87 = arith.mulf %82, %86 : vector<8x8xf32>
    %88 = arith.truncf %72 : vector<8x32xf32> to vector<8x32xbf16>
    %89 = vector.extract_strided_slice %31 {offsets = [0, 96], sizes = [8, 32], strides = [1, 1]} : vector<16x384xf32> to vector<8x32xf32>
    %90 = vector.extract_strided_slice %31 {offsets = [0, 224], sizes = [8, 32], strides = [1, 1]} : vector<16x384xf32> to vector<8x32xf32>
    %91 = vector.extract_strided_slice %31 {offsets = [0, 352], sizes = [8, 32], strides = [1, 1]} : vector<16x384xf32> to vector<8x32xf32>
    %92 = arith.truncf %89 : vector<8x32xf32> to vector<8x32xbf16>
    %93 = arith.truncf %90 : vector<8x32xf32> to vector<8x32xbf16>
    %cst_28 = arith.constant dense<0.000000e+00> : vector<8x8xf32>
    %94 = tpu.matmul %92, %93, %cst_28 {dimension_numbers = #tpu.dot_dimension_numbers<[1], [1], [0], [0], [0, 0, 1, 0], [], []>} : vector<8x32xbf16>, vector<8x32xbf16>, vector<8x8xf32> -> vector<8x8xf32>
    %cst_29 = arith.constant 0.176776692 : f32
    %95 = vector.broadcast %cst_29 : f32 to vector<8x8xf32>
    %96 = arith.mulf %94, %95 : vector<8x8xf32>
    %cst_30 = arith.constant dense<0xFF800000> : vector<8xf32>
    %97 = vector.multi_reduction <maximumf>, %96, %cst_30 [1] : vector<8x8xf32> to vector<8xf32>
    %98 = vector.shape_cast %97 : vector<8xf32> to vector<8x1xf32>
    %99 = vector.broadcast %98 : vector<8x1xf32> to vector<8x8xf32>
    %100 = arith.subf %96, %99 : vector<8x8xf32>
    %101 = math.exp %100 : vector<8x8xf32>
    %cst_31 = arith.constant dense<0.000000e+00> : vector<8xf32>
    %102 = vector.multi_reduction <add>, %101, %cst_31 [1] : vector<8x8xf32> to vector<8xf32>
    %103 = vector.shape_cast %102 : vector<8xf32> to vector<8x1xf32>
    %104 = tpu.reciprocal %103 {approx = true} : vector<8x1xf32> -> vector<8x1xf32>
    %105 = vector.broadcast %104 : vector<8x1xf32> to vector<8x8xf32>
    %106 = arith.mulf %101, %105 : vector<8x8xf32>
    %107 = arith.truncf %91 : vector<8x32xf32> to vector<8x32xbf16>
    %108 = arith.index_cast %arg1 : i32 to index
    %c0_32 = arith.constant 0 : index
    %c0_33 = arith.constant 0 : index
    %109 = memref.load %arg7[%108, %c0_32, %c0_33] : memref<2x4x4xf32, #tpu.memory_space<smem>>
    %110 = vector.broadcast %109 : f32 to vector<8x8xf32>
    %111 = arith.mulf %49, %110 : vector<8x8xf32>
    %cst_34 = arith.constant 0.000000e+00 : f32
    %112 = vector.broadcast %cst_34 : f32 to vector<8x8xf32>
    %113 = arith.addf %112, %111 : vector<8x8xf32>
    %114 = arith.index_cast %arg1 : i32 to index
    %c1 = arith.constant 1 : index
    %c0_35 = arith.constant 0 : index
    %115 = memref.load %arg7[%114, %c1, %c0_35] : memref<2x4x4xf32, #tpu.memory_space<smem>>
    %116 = vector.broadcast %115 : f32 to vector<8x8xf32>
    %117 = arith.mulf %68, %116 : vector<8x8xf32>
    %118 = arith.addf %113, %117 : vector<8x8xf32>
    %119 = arith.index_cast %arg1 : i32 to index
    %c2 = arith.constant 2 : index
    %c0_36 = arith.constant 0 : index
    %120 = memref.load %arg7[%119, %c2, %c0_36] : memref<2x4x4xf32, #tpu.memory_space<smem>>
    %121 = vector.broadcast %120 : f32 to vector<8x8xf32>
    %122 = arith.mulf %87, %121 : vector<8x8xf32>
    %123 = arith.addf %118, %122 : vector<8x8xf32>
    %124 = arith.index_cast %arg1 : i32 to index
    %c3 = arith.constant 3 : index
    %c0_37 = arith.constant 0 : index
    %125 = memref.load %arg7[%124, %c3, %c0_37] : memref<2x4x4xf32, #tpu.memory_space<smem>>
    %126 = vector.broadcast %125 : f32 to vector<8x8xf32>
    %127 = arith.mulf %106, %126 : vector<8x8xf32>
    %128 = arith.addf %123, %127 : vector<8x8xf32>
    %129 = arith.index_cast %arg1 : i32 to index
    %c0_38 = arith.constant 0 : index
    %c1_39 = arith.constant 1 : index
    %130 = memref.load %arg7[%129, %c0_38, %c1_39] : memref<2x4x4xf32, #tpu.memory_space<smem>>
    %131 = vector.broadcast %130 : f32 to vector<8x8xf32>
    %132 = arith.mulf %49, %131 : vector<8x8xf32>
    %cst_40 = arith.constant 0.000000e+00 : f32
    %133 = vector.broadcast %cst_40 : f32 to vector<8x8xf32>
    %134 = arith.addf %133, %132 : vector<8x8xf32>
    %135 = arith.index_cast %arg1 : i32 to index
    %c1_41 = arith.constant 1 : index
    %c1_42 = arith.constant 1 : index
    %136 = memref.load %arg7[%135, %c1_41, %c1_42] : memref<2x4x4xf32, #tpu.memory_space<smem>>
    %137 = vector.broadcast %136 : f32 to vector<8x8xf32>
    %138 = arith.mulf %68, %137 : vector<8x8xf32>
    %139 = arith.addf %134, %138 : vector<8x8xf32>
    %140 = arith.index_cast %arg1 : i32 to index
    %c2_43 = arith.constant 2 : index
    %c1_44 = arith.constant 1 : index
    %141 = memref.load %arg7[%140, %c2_43, %c1_44] : memref<2x4x4xf32, #tpu.memory_space<smem>>
    %142 = vector.broadcast %141 : f32 to vector<8x8xf32>
    %143 = arith.mulf %87, %142 : vector<8x8xf32>
    %144 = arith.addf %139, %143 : vector<8x8xf32>
    %145 = arith.index_cast %arg1 : i32 to index
    %c3_45 = arith.constant 3 : index
    %c1_46 = arith.constant 1 : index
    %146 = memref.load %arg7[%145, %c3_45, %c1_46] : memref<2x4x4xf32, #tpu.memory_space<smem>>
    %147 = vector.broadcast %146 : f32 to vector<8x8xf32>
    %148 = arith.mulf %106, %147 : vector<8x8xf32>
    %149 = arith.addf %144, %148 : vector<8x8xf32>
    %150 = arith.index_cast %arg1 : i32 to index
    %c0_47 = arith.constant 0 : index
    %c2_48 = arith.constant 2 : index
    %151 = memref.load %arg7[%150, %c0_47, %c2_48] : memref<2x4x4xf32, #tpu.memory_space<smem>>
    %152 = vector.broadcast %151 : f32 to vector<8x8xf32>
    %153 = arith.mulf %49, %152 : vector<8x8xf32>
    %cst_49 = arith.constant 0.000000e+00 : f32
    %154 = vector.broadcast %cst_49 : f32 to vector<8x8xf32>
    %155 = arith.addf %154, %153 : vector<8x8xf32>
    %156 = arith.index_cast %arg1 : i32 to index
    %c1_50 = arith.constant 1 : index
    %c2_51 = arith.constant 2 : index
    %157 = memref.load %arg7[%156, %c1_50, %c2_51] : memref<2x4x4xf32, #tpu.memory_space<smem>>
    %158 = vector.broadcast %157 : f32 to vector<8x8xf32>
    %159 = arith.mulf %68, %158 : vector<8x8xf32>
    %160 = arith.addf %155, %159 : vector<8x8xf32>
    %161 = arith.index_cast %arg1 : i32 to index
    %c2_52 = arith.constant 2 : index
    %c2_53 = arith.constant 2 : index
    %162 = memref.load %arg7[%161, %c2_52, %c2_53] : memref<2x4x4xf32, #tpu.memory_space<smem>>
    %163 = vector.broadcast %162 : f32 to vector<8x8xf32>
    %164 = arith.mulf %87, %163 : vector<8x8xf32>
    %165 = arith.addf %160, %164 : vector<8x8xf32>
    %166 = arith.index_cast %arg1 : i32 to index
    %c3_54 = arith.constant 3 : index
    %c2_55 = arith.constant 2 : index
    %167 = memref.load %arg7[%166, %c3_54, %c2_55] : memref<2x4x4xf32, #tpu.memory_space<smem>>
    %168 = vector.broadcast %167 : f32 to vector<8x8xf32>
    %169 = arith.mulf %106, %168 : vector<8x8xf32>
    %170 = arith.addf %165, %169 : vector<8x8xf32>
    %171 = arith.index_cast %arg1 : i32 to index
    %c0_56 = arith.constant 0 : index
    %c3_57 = arith.constant 3 : index
    %172 = memref.load %arg7[%171, %c0_56, %c3_57] : memref<2x4x4xf32, #tpu.memory_space<smem>>
    %173 = vector.broadcast %172 : f32 to vector<8x8xf32>
    %174 = arith.mulf %49, %173 : vector<8x8xf32>
    %cst_58 = arith.constant 0.000000e+00 : f32
    %175 = vector.broadcast %cst_58 : f32 to vector<8x8xf32>
    %176 = arith.addf %175, %174 : vector<8x8xf32>
    %177 = arith.index_cast %arg1 : i32 to index
    %c1_59 = arith.constant 1 : index
    %c3_60 = arith.constant 3 : index
    %178 = memref.load %arg7[%177, %c1_59, %c3_60] : memref<2x4x4xf32, #tpu.memory_space<smem>>
    %179 = vector.broadcast %178 : f32 to vector<8x8xf32>
    %180 = arith.mulf %68, %179 : vector<8x8xf32>
    %181 = arith.addf %176, %180 : vector<8x8xf32>
    %182 = arith.index_cast %arg1 : i32 to index
    %c2_61 = arith.constant 2 : index
    %c3_62 = arith.constant 3 : index
    %183 = memref.load %arg7[%182, %c2_61, %c3_62] : memref<2x4x4xf32, #tpu.memory_space<smem>>
    %184 = vector.broadcast %183 : f32 to vector<8x8xf32>
    %185 = arith.mulf %87, %184 : vector<8x8xf32>
    %186 = arith.addf %181, %185 : vector<8x8xf32>
    %187 = arith.index_cast %arg1 : i32 to index
    %c3_63 = arith.constant 3 : index
    %c3_64 = arith.constant 3 : index
    %188 = memref.load %arg7[%187, %c3_63, %c3_64] : memref<2x4x4xf32, #tpu.memory_space<smem>>
    %189 = vector.broadcast %188 : f32 to vector<8x8xf32>
    %190 = arith.mulf %106, %189 : vector<8x8xf32>
    %191 = arith.addf %186, %190 : vector<8x8xf32>
    %cst_65 = arith.constant 0.000000e+00 : f32
    %192 = vector.broadcast %cst_65 : f32 to vector<8x8xf32>
    %193 = arith.addf %192, %128 : vector<8x8xf32>
    %194 = arith.addf %193, %149 : vector<8x8xf32>
    %195 = arith.addf %194, %170 : vector<8x8xf32>
    %196 = arith.addf %195, %191 : vector<8x8xf32>
    %cst_66 = arith.constant 2.500000e-01 : f32
    %197 = vector.broadcast %cst_66 : f32 to vector<8x8xf32>
    %198 = arith.mulf %196, %197 : vector<8x8xf32>
    %199 = arith.subf %128, %198 : vector<8x8xf32>
    %200 = arith.subf %128, %198 : vector<8x8xf32>
    %201 = arith.mulf %199, %200 : vector<8x8xf32>
    %cst_67 = arith.constant 0.000000e+00 : f32
    %202 = vector.broadcast %cst_67 : f32 to vector<8x8xf32>
    %203 = arith.addf %202, %201 : vector<8x8xf32>
    %204 = arith.subf %149, %198 : vector<8x8xf32>
    %205 = arith.subf %149, %198 : vector<8x8xf32>
    %206 = arith.mulf %204, %205 : vector<8x8xf32>
    %207 = arith.addf %203, %206 : vector<8x8xf32>
    %208 = arith.subf %170, %198 : vector<8x8xf32>
    %209 = arith.subf %170, %198 : vector<8x8xf32>
    %210 = arith.mulf %208, %209 : vector<8x8xf32>
    %211 = arith.addf %207, %210 : vector<8x8xf32>
    %212 = arith.subf %191, %198 : vector<8x8xf32>
    %213 = arith.subf %191, %198 : vector<8x8xf32>
    %214 = arith.mulf %212, %213 : vector<8x8xf32>
    %215 = arith.addf %211, %214 : vector<8x8xf32>
    %cst_68 = arith.constant 2.500000e-01 : f32
    %216 = vector.broadcast %cst_68 : f32 to vector<8x8xf32>
    %217 = arith.mulf %215, %216 : vector<8x8xf32>
    %cst_69 = arith.constant 9.99999974E-6 : f32
    %218 = vector.broadcast %cst_69 : f32 to vector<8x8xf32>
    %219 = arith.addf %217, %218 : vector<8x8xf32>
    %220 = math.rsqrt %219 : vector<8x8xf32>
    %221 = arith.subf %128, %198 : vector<8x8xf32>
    %222 = arith.mulf %221, %220 : vector<8x8xf32>
    %223 = arith.index_cast %arg1 : i32 to index
    %c0_70 = arith.constant 0 : index
    %224 = memref.load %arg8[%223, %c0_70] : memref<2x4xf32, #tpu.memory_space<smem>>
    %225 = vector.broadcast %224 : f32 to vector<8x8xf32>
    %226 = arith.mulf %222, %225 : vector<8x8xf32>
    %227 = arith.index_cast %arg1 : i32 to index
    %c0_71 = arith.constant 0 : index
    %228 = memref.load %arg9[%227, %c0_71] : memref<2x4xf32, #tpu.memory_space<smem>>
    %229 = vector.broadcast %228 : f32 to vector<8x8xf32>
    %230 = arith.addf %226, %229 : vector<8x8xf32>
    %231 = arith.truncf %230 : vector<8x8xf32> to vector<8x8xbf16>
    %cst_72 = arith.constant dense<0.000000e+00> : vector<8x32xf32>
    %232 = tpu.matmul %231, %50, %cst_72 {dimension_numbers = #tpu.dot_dimension_numbers<[1], [0], [0], [1], [0, 0, 1, 1], [], []>} : vector<8x8xbf16>, vector<8x32xbf16>, vector<8x32xf32> -> vector<8x32xf32>
    %c0_73 = arith.constant 0 : index
    %c0_74 = arith.constant 0 : index
    %233 = vector.load %arg22[%c0_73, %c0_74] : memref<16x128xf32, #tpu.memory_space<vmem>>, vector<8x32xf32>
    tpu.vector_store %arg22[%c0_73, %c0_74], %232 {strides = array<i32>} : memref<16x128xf32, #tpu.memory_space<vmem>>, vector<8x32xf32>,
    %234 = arith.subf %149, %198 : vector<8x8xf32>
    %235 = arith.mulf %234, %220 : vector<8x8xf32>
    %236 = arith.index_cast %arg1 : i32 to index
    %c1_75 = arith.constant 1 : index
    %237 = memref.load %arg8[%236, %c1_75] : memref<2x4xf32, #tpu.memory_space<smem>>
    %238 = vector.broadcast %237 : f32 to vector<8x8xf32>
    %239 = arith.mulf %235, %238 : vector<8x8xf32>
    %240 = arith.index_cast %arg1 : i32 to index
    %c1_76 = arith.constant 1 : index
    %241 = memref.load %arg9[%240, %c1_76] : memref<2x4xf32, #tpu.memory_space<smem>>
    %242 = vector.broadcast %241 : f32 to vector<8x8xf32>
    %243 = arith.addf %239, %242 : vector<8x8xf32>
    %244 = arith.truncf %243 : vector<8x8xf32> to vector<8x8xbf16>
    %cst_77 = arith.constant dense<0.000000e+00> : vector<8x32xf32>
    %245 = tpu.matmul %244, %69, %cst_77 {dimension_numbers = #tpu.dot_dimension_numbers<[1], [0], [0], [1], [0, 0, 1, 1], [], []>} : vector<8x8xbf16>, vector<8x32xbf16>, vector<8x32xf32> -> vector<8x32xf32>
    %c0_78 = arith.constant 0 : index
    %c32 = arith.constant 32 : index
    %246 = vector.load %arg22[%c0_78, %c32] : memref<16x128xf32, #tpu.memory_space<vmem>>, vector<8x32xf32>
    tpu.vector_store %arg22[%c0_78, %c32], %245 {strides = array<i32>} : memref<16x128xf32, #tpu.memory_space<vmem>>, vector<8x32xf32>,
    %247 = arith.subf %170, %198 : vector<8x8xf32>
    %248 = arith.mulf %247, %220 : vector<8x8xf32>
    %249 = arith.index_cast %arg1 : i32 to index
    %c2_79 = arith.constant 2 : index
    %250 = memref.load %arg8[%249, %c2_79] : memref<2x4xf32, #tpu.memory_space<smem>>
    %251 = vector.broadcast %250 : f32 to vector<8x8xf32>
    %252 = arith.mulf %248, %251 : vector<8x8xf32>
    %253 = arith.index_cast %arg1 : i32 to index
    %c2_80 = arith.constant 2 : index
    %254 = memref.load %arg9[%253, %c2_80] : memref<2x4xf32, #tpu.memory_space<smem>>
    %255 = vector.broadcast %254 : f32 to vector<8x8xf32>
    %256 = arith.addf %252, %255 : vector<8x8xf32>
    %257 = arith.truncf %256 : vector<8x8xf32> to vector<8x8xbf16>
    %cst_81 = arith.constant dense<0.000000e+00> : vector<8x32xf32>
    %258 = tpu.matmul %257, %88, %cst_81 {dimension_numbers = #tpu.dot_dimension_numbers<[1], [0], [0], [1], [0, 0, 1, 1], [], []>} : vector<8x8xbf16>, vector<8x32xbf16>, vector<8x32xf32> -> vector<8x32xf32>
    %c0_82 = arith.constant 0 : index
    %c64 = arith.constant 64 : index
    %259 = vector.load %arg22[%c0_82, %c64] : memref<16x128xf32, #tpu.memory_space<vmem>>, vector<8x32xf32>
    tpu.vector_store %arg22[%c0_82, %c64], %258 {strides = array<i32>} : memref<16x128xf32, #tpu.memory_space<vmem>>, vector<8x32xf32>,
    %260 = arith.subf %191, %198 : vector<8x8xf32>
    %261 = arith.mulf %260, %220 : vector<8x8xf32>
    %262 = arith.index_cast %arg1 : i32 to index
    %c3_83 = arith.constant 3 : index
    %263 = memref.load %arg8[%262, %c3_83] : memref<2x4xf32, #tpu.memory_space<smem>>
    %264 = vector.broadcast %263 : f32 to vector<8x8xf32>
    %265 = arith.mulf %261, %264 : vector<8x8xf32>
    %266 = arith.index_cast %arg1 : i32 to index
    %c3_84 = arith.constant 3 : index
    %267 = memref.load %arg9[%266, %c3_84] : memref<2x4xf32, #tpu.memory_space<smem>>
    %268 = vector.broadcast %267 : f32 to vector<8x8xf32>
    %269 = arith.addf %265, %268 : vector<8x8xf32>
    %270 = arith.truncf %269 : vector<8x8xf32> to vector<8x8xbf16>
    %cst_85 = arith.constant dense<0.000000e+00> : vector<8x32xf32>
    %271 = tpu.matmul %270, %107, %cst_85 {dimension_numbers = #tpu.dot_dimension_numbers<[1], [0], [0], [1], [0, 0, 1, 1], [], []>} : vector<8x8xbf16>, vector<8x32xbf16>, vector<8x32xf32> -> vector<8x32xf32>
    %c0_86 = arith.constant 0 : index
    %c96 = arith.constant 96 : index
    %272 = vector.load %arg22[%c0_86, %c96] : memref<16x128xf32, #tpu.memory_space<vmem>>, vector<8x32xf32>
    tpu.vector_store %arg22[%c0_86, %c96], %271 {strides = array<i32>} : memref<16x128xf32, #tpu.memory_space<vmem>>, vector<8x32xf32>,
    %273 = vector.extract_strided_slice %31 {offsets = [8, 0], sizes = [8, 32], strides = [1, 1]} : vector<16x384xf32> to vector<8x32xf32>
    %274 = vector.extract_strided_slice %31 {offsets = [8, 128], sizes = [8, 32], strides = [1, 1]} : vector<16x384xf32> to vector<8x32xf32>
    %275 = vector.extract_strided_slice %31 {offsets = [8, 256], sizes = [8, 32], strides = [1, 1]} : vector<16x384xf32> to vector<8x32xf32>
    %276 = arith.truncf %273 : vector<8x32xf32> to vector<8x32xbf16>
    %277 = arith.truncf %274 : vector<8x32xf32> to vector<8x32xbf16>
    %cst_87 = arith.constant dense<0.000000e+00> : vector<8x8xf32>
    %278 = tpu.matmul %276, %277, %cst_87 {dimension_numbers = #tpu.dot_dimension_numbers<[1], [1], [0], [0], [0, 0, 1, 0], [], []>} : vector<8x32xbf16>, vector<8x32xbf16>, vector<8x8xf32> -> vector<8x8xf32>
    %cst_88 = arith.constant 0.176776692 : f32
    %279 = vector.broadcast %cst_88 : f32 to vector<8x8xf32>
    %280 = arith.mulf %278, %279 : vector<8x8xf32>
    %cst_89 = arith.constant dense<0xFF800000> : vector<8xf32>
    %281 = vector.multi_reduction <maximumf>, %280, %cst_89 [1] : vector<8x8xf32> to vector<8xf32>
    %282 = vector.shape_cast %281 : vector<8xf32> to vector<8x1xf32>
    %283 = vector.broadcast %282 : vector<8x1xf32> to vector<8x8xf32>
    %284 = arith.subf %280, %283 : vector<8x8xf32>
    %285 = math.exp %284 : vector<8x8xf32>
    %cst_90 = arith.constant dense<0.000000e+00> : vector<8xf32>
    %286 = vector.multi_reduction <add>, %285, %cst_90 [1] : vector<8x8xf32> to vector<8xf32>
    %287 = vector.shape_cast %286 : vector<8xf32> to vector<8x1xf32>
    %288 = tpu.reciprocal %287 {approx = true} : vector<8x1xf32> -> vector<8x1xf32>
    %289 = vector.broadcast %288 : vector<8x1xf32> to vector<8x8xf32>
    %290 = arith.mulf %285, %289 : vector<8x8xf32>
    %291 = arith.truncf %275 : vector<8x32xf32> to vector<8x32xbf16>
    %292 = vector.extract_strided_slice %31 {offsets = [8, 32], sizes = [8, 32], strides = [1, 1]} : vector<16x384xf32> to vector<8x32xf32>
    %293 = vector.extract_strided_slice %31 {offsets = [8, 160], sizes = [8, 32], strides = [1, 1]} : vector<16x384xf32> to vector<8x32xf32>
    %294 = vector.extract_strided_slice %31 {offsets = [8, 288], sizes = [8, 32], strides = [1, 1]} : vector<16x384xf32> to vector<8x32xf32>
    %295 = arith.truncf %292 : vector<8x32xf32> to vector<8x32xbf16>
    %296 = arith.truncf %293 : vector<8x32xf32> to vector<8x32xbf16>
    %cst_91 = arith.constant dense<0.000000e+00> : vector<8x8xf32>
    %297 = tpu.matmul %295, %296, %cst_91 {dimension_numbers = #tpu.dot_dimension_numbers<[1], [1], [0], [0], [0, 0, 1, 0], [], []>} : vector<8x32xbf16>, vector<8x32xbf16>, vector<8x8xf32> -> vector<8x8xf32>
    %cst_92 = arith.constant 0.176776692 : f32
    %298 = vector.broadcast %cst_92 : f32 to vector<8x8xf32>
    %299 = arith.mulf %297, %298 : vector<8x8xf32>
    %cst_93 = arith.constant dense<0xFF800000> : vector<8xf32>
    %300 = vector.multi_reduction <maximumf>, %299, %cst_93 [1] : vector<8x8xf32> to vector<8xf32>
    %301 = vector.shape_cast %300 : vector<8xf32> to vector<8x1xf32>
    %302 = vector.broadcast %301 : vector<8x1xf32> to vector<8x8xf32>
    %303 = arith.subf %299, %302 : vector<8x8xf32>
    %304 = math.exp %303 : vector<8x8xf32>
    %cst_94 = arith.constant dense<0.000000e+00> : vector<8xf32>
    %305 = vector.multi_reduction <add>, %304, %cst_94 [1] : vector<8x8xf32> to vector<8xf32>
    %306 = vector.shape_cast %305 : vector<8xf32> to vector<8x1xf32>
    %307 = tpu.reciprocal %306 {approx = true} : vector<8x1xf32> -> vector<8x1xf32>
    %308 = vector.broadcast %307 : vector<8x1xf32> to vector<8x8xf32>
    %309 = arith.mulf %304, %308 : vector<8x8xf32>
    %310 = arith.truncf %294 : vector<8x32xf32> to vector<8x32xbf16>
    %311 = vector.extract_strided_slice %31 {offsets = [8, 64], sizes = [8, 32], strides = [1, 1]} : vector<16x384xf32> to vector<8x32xf32>
    %312 = vector.extract_strided_slice %31 {offsets = [8, 192], sizes = [8, 32], strides = [1, 1]} : vector<16x384xf32> to vector<8x32xf32>
    %313 = vector.extract_strided_slice %31 {offsets = [8, 320], sizes = [8, 32], strides = [1, 1]} : vector<16x384xf32> to vector<8x32xf32>
    %314 = arith.truncf %311 : vector<8x32xf32> to vector<8x32xbf16>
    %315 = arith.truncf %312 : vector<8x32xf32> to vector<8x32xbf16>
    %cst_95 = arith.constant dense<0.000000e+00> : vector<8x8xf32>
    %316 = tpu.matmul %314, %315, %cst_95 {dimension_numbers = #tpu.dot_dimension_numbers<[1], [1], [0], [0], [0, 0, 1, 0], [], []>} : vector<8x32xbf16>, vector<8x32xbf16>, vector<8x8xf32> -> vector<8x8xf32>
    %cst_96 = arith.constant 0.176776692 : f32
    %317 = vector.broadcast %cst_96 : f32 to vector<8x8xf32>
    %318 = arith.mulf %316, %317 : vector<8x8xf32>
    %cst_97 = arith.constant dense<0xFF800000> : vector<8xf32>
    %319 = vector.multi_reduction <maximumf>, %318, %cst_97 [1] : vector<8x8xf32> to vector<8xf32>
    %320 = vector.shape_cast %319 : vector<8xf32> to vector<8x1xf32>
    %321 = vector.broadcast %320 : vector<8x1xf32> to vector<8x8xf32>
    %322 = arith.subf %318, %321 : vector<8x8xf32>
    %323 = math.exp %322 : vector<8x8xf32>
    %cst_98 = arith.constant dense<0.000000e+00> : vector<8xf32>
    %324 = vector.multi_reduction <add>, %323, %cst_98 [1] : vector<8x8xf32> to vector<8xf32>
    %325 = vector.shape_cast %324 : vector<8xf32> to vector<8x1xf32>
    %326 = tpu.reciprocal %325 {approx = true} : vector<8x1xf32> -> vector<8x1xf32>
    %327 = vector.broadcast %326 : vector<8x1xf32> to vector<8x8xf32>
    %328 = arith.mulf %323, %327 : vector<8x8xf32>
    %329 = arith.truncf %313 : vector<8x32xf32> to vector<8x32xbf16>
    %330 = vector.extract_strided_slice %31 {offsets = [8, 96], sizes = [8, 32], strides = [1, 1]} : vector<16x384xf32> to vector<8x32xf32>
    %331 = vector.extract_strided_slice %31 {offsets = [8, 224], sizes = [8, 32], strides = [1, 1]} : vector<16x384xf32> to vector<8x32xf32>
    %332 = vector.extract_strided_slice %31 {offsets = [8, 352], sizes = [8, 32], strides = [1, 1]} : vector<16x384xf32> to vector<8x32xf32>
    %333 = arith.truncf %330 : vector<8x32xf32> to vector<8x32xbf16>
    %334 = arith.truncf %331 : vector<8x32xf32> to vector<8x32xbf16>
    %cst_99 = arith.constant dense<0.000000e+00> : vector<8x8xf32>
    %335 = tpu.matmul %333, %334, %cst_99 {dimension_numbers = #tpu.dot_dimension_numbers<[1], [1], [0], [0], [0, 0, 1, 0], [], []>} : vector<8x32xbf16>, vector<8x32xbf16>, vector<8x8xf32> -> vector<8x8xf32>
    %cst_100 = arith.constant 0.176776692 : f32
    %336 = vector.broadcast %cst_100 : f32 to vector<8x8xf32>
    %337 = arith.mulf %335, %336 : vector<8x8xf32>
    %cst_101 = arith.constant dense<0xFF800000> : vector<8xf32>
    %338 = vector.multi_reduction <maximumf>, %337, %cst_101 [1] : vector<8x8xf32> to vector<8xf32>
    %339 = vector.shape_cast %338 : vector<8xf32> to vector<8x1xf32>
    %340 = vector.broadcast %339 : vector<8x1xf32> to vector<8x8xf32>
    %341 = arith.subf %337, %340 : vector<8x8xf32>
    %342 = math.exp %341 : vector<8x8xf32>
    %cst_102 = arith.constant dense<0.000000e+00> : vector<8xf32>
    %343 = vector.multi_reduction <add>, %342, %cst_102 [1] : vector<8x8xf32> to vector<8xf32>
    %344 = vector.shape_cast %343 : vector<8xf32> to vector<8x1xf32>
    %345 = tpu.reciprocal %344 {approx = true} : vector<8x1xf32> -> vector<8x1xf32>
    %346 = vector.broadcast %345 : vector<8x1xf32> to vector<8x8xf32>
    %347 = arith.mulf %342, %346 : vector<8x8xf32>
    %348 = arith.truncf %332 : vector<8x32xf32> to vector<8x32xbf16>
    %349 = arith.index_cast %arg1 : i32 to index
    %c0_103 = arith.constant 0 : index
    %c0_104 = arith.constant 0 : index
    %350 = memref.load %arg7[%349, %c0_103, %c0_104] : memref<2x4x4xf32, #tpu.memory_space<smem>>
    %351 = vector.broadcast %350 : f32 to vector<8x8xf32>
    %352 = arith.mulf %290, %351 : vector<8x8xf32>
    %cst_105 = arith.constant 0.000000e+00 : f32
    %353 = vector.broadcast %cst_105 : f32 to vector<8x8xf32>
    %354 = arith.addf %353, %352 : vector<8x8xf32>
    %355 = arith.index_cast %arg1 : i32 to index
    %c1_106 = arith.constant 1 : index
    %c0_107 = arith.constant 0 : index
    %356 = memref.load %arg7[%355, %c1_106, %c0_107] : memref<2x4x4xf32, #tpu.memory_space<smem>>
    %357 = vector.broadcast %356 : f32 to vector<8x8xf32>
    %358 = arith.mulf %309, %357 : vector<8x8xf32>
    %359 = arith.addf %354, %358 : vector<8x8xf32>
    %360 = arith.index_cast %arg1 : i32 to index
    %c2_108 = arith.constant 2 : index
    %c0_109 = arith.constant 0 : index
    %361 = memref.load %arg7[%360, %c2_108, %c0_109] : memref<2x4x4xf32, #tpu.memory_space<smem>>
    %362 = vector.broadcast %361 : f32 to vector<8x8xf32>
    %363 = arith.mulf %328, %362 : vector<8x8xf32>
    %364 = arith.addf %359, %363 : vector<8x8xf32>
    %365 = arith.index_cast %arg1 : i32 to index
    %c3_110 = arith.constant 3 : index
    %c0_111 = arith.constant 0 : index
    %366 = memref.load %arg7[%365, %c3_110, %c0_111] : memref<2x4x4xf32, #tpu.memory_space<smem>>
    %367 = vector.broadcast %366 : f32 to vector<8x8xf32>
    %368 = arith.mulf %347, %367 : vector<8x8xf32>
    %369 = arith.addf %364, %368 : vector<8x8xf32>
    %370 = arith.index_cast %arg1 : i32 to index
    %c0_112 = arith.constant 0 : index
    %c1_113 = arith.constant 1 : index
    %371 = memref.load %arg7[%370, %c0_112, %c1_113] : memref<2x4x4xf32, #tpu.memory_space<smem>>
    %372 = vector.broadcast %371 : f32 to vector<8x8xf32>
    %373 = arith.mulf %290, %372 : vector<8x8xf32>
    %cst_114 = arith.constant 0.000000e+00 : f32
    %374 = vector.broadcast %cst_114 : f32 to vector<8x8xf32>
    %375 = arith.addf %374, %373 : vector<8x8xf32>
    %376 = arith.index_cast %arg1 : i32 to index
    %c1_115 = arith.constant 1 : index
    %c1_116 = arith.constant 1 : index
    %377 = memref.load %arg7[%376, %c1_115, %c1_116] : memref<2x4x4xf32, #tpu.memory_space<smem>>
    %378 = vector.broadcast %377 : f32 to vector<8x8xf32>
    %379 = arith.mulf %309, %378 : vector<8x8xf32>
    %380 = arith.addf %375, %379 : vector<8x8xf32>
    %381 = arith.index_cast %arg1 : i32 to index
    %c2_117 = arith.constant 2 : index
    %c1_118 = arith.constant 1 : index
    %382 = memref.load %arg7[%381, %c2_117, %c1_118] : memref<2x4x4xf32, #tpu.memory_space<smem>>
    %383 = vector.broadcast %382 : f32 to vector<8x8xf32>
    %384 = arith.mulf %328, %383 : vector<8x8xf32>
    %385 = arith.addf %380, %384 : vector<8x8xf32>
    %386 = arith.index_cast %arg1 : i32 to index
    %c3_119 = arith.constant 3 : index
    %c1_120 = arith.constant 1 : index
    %387 = memref.load %arg7[%386, %c3_119, %c1_120] : memref<2x4x4xf32, #tpu.memory_space<smem>>
    %388 = vector.broadcast %387 : f32 to vector<8x8xf32>
    %389 = arith.mulf %347, %388 : vector<8x8xf32>
    %390 = arith.addf %385, %389 : vector<8x8xf32>
    %391 = arith.index_cast %arg1 : i32 to index
    %c0_121 = arith.constant 0 : index
    %c2_122 = arith.constant 2 : index
    %392 = memref.load %arg7[%391, %c0_121, %c2_122] : memref<2x4x4xf32, #tpu.memory_space<smem>>
    %393 = vector.broadcast %392 : f32 to vector<8x8xf32>
    %394 = arith.mulf %290, %393 : vector<8x8xf32>
    %cst_123 = arith.constant 0.000000e+00 : f32
    %395 = vector.broadcast %cst_123 : f32 to vector<8x8xf32>
    %396 = arith.addf %395, %394 : vector<8x8xf32>
    %397 = arith.index_cast %arg1 : i32 to index
    %c1_124 = arith.constant 1 : index
    %c2_125 = arith.constant 2 : index
    %398 = memref.load %arg7[%397, %c1_124, %c2_125] : memref<2x4x4xf32, #tpu.memory_space<smem>>
    %399 = vector.broadcast %398 : f32 to vector<8x8xf32>
    %400 = arith.mulf %309, %399 : vector<8x8xf32>
    %401 = arith.addf %396, %400 : vector<8x8xf32>
    %402 = arith.index_cast %arg1 : i32 to index
    %c2_126 = arith.constant 2 : index
    %c2_127 = arith.constant 2 : index
    %403 = memref.load %arg7[%402, %c2_126, %c2_127] : memref<2x4x4xf32, #tpu.memory_space<smem>>
    %404 = vector.broadcast %403 : f32 to vector<8x8xf32>
    %405 = arith.mulf %328, %404 : vector<8x8xf32>
    %406 = arith.addf %401, %405 : vector<8x8xf32>
    %407 = arith.index_cast %arg1 : i32 to index
    %c3_128 = arith.constant 3 : index
    %c2_129 = arith.constant 2 : index
    %408 = memref.load %arg7[%407, %c3_128, %c2_129] : memref<2x4x4xf32, #tpu.memory_space<smem>>
    %409 = vector.broadcast %408 : f32 to vector<8x8xf32>
    %410 = arith.mulf %347, %409 : vector<8x8xf32>
    %411 = arith.addf %406, %410 : vector<8x8xf32>
    %412 = arith.index_cast %arg1 : i32 to index
    %c0_130 = arith.constant 0 : index
    %c3_131 = arith.constant 3 : index
    %413 = memref.load %arg7[%412, %c0_130, %c3_131] : memref<2x4x4xf32, #tpu.memory_space<smem>>
    %414 = vector.broadcast %413 : f32 to vector<8x8xf32>
    %415 = arith.mulf %290, %414 : vector<8x8xf32>
    %cst_132 = arith.constant 0.000000e+00 : f32
    %416 = vector.broadcast %cst_132 : f32 to vector<8x8xf32>
    %417 = arith.addf %416, %415 : vector<8x8xf32>
    %418 = arith.index_cast %arg1 : i32 to index
    %c1_133 = arith.constant 1 : index
    %c3_134 = arith.constant 3 : index
    %419 = memref.load %arg7[%418, %c1_133, %c3_134] : memref<2x4x4xf32, #tpu.memory_space<smem>>
    %420 = vector.broadcast %419 : f32 to vector<8x8xf32>
    %421 = arith.mulf %309, %420 : vector<8x8xf32>
    %422 = arith.addf %417, %421 : vector<8x8xf32>
    %423 = arith.index_cast %arg1 : i32 to index
    %c2_135 = arith.constant 2 : index
    %c3_136 = arith.constant 3 : index
    %424 = memref.load %arg7[%423, %c2_135, %c3_136] : memref<2x4x4xf32, #tpu.memory_space<smem>>
    %425 = vector.broadcast %424 : f32 to vector<8x8xf32>
    %426 = arith.mulf %328, %425 : vector<8x8xf32>
    %427 = arith.addf %422, %426 : vector<8x8xf32>
    %428 = arith.index_cast %arg1 : i32 to index
    %c3_137 = arith.constant 3 : index
    %c3_138 = arith.constant 3 : index
    %429 = memref.load %arg7[%428, %c3_137, %c3_138] : memref<2x4x4xf32, #tpu.memory_space<smem>>
    %430 = vector.broadcast %429 : f32 to vector<8x8xf32>
    %431 = arith.mulf %347, %430 : vector<8x8xf32>
    %432 = arith.addf %427, %431 : vector<8x8xf32>
    %cst_139 = arith.constant 0.000000e+00 : f32
    %433 = vector.broadcast %cst_139 : f32 to vector<8x8xf32>
    %434 = arith.addf %433, %369 : vector<8x8xf32>
    %435 = arith.addf %434, %390 : vector<8x8xf32>
    %436 = arith.addf %435, %411 : vector<8x8xf32>
    %437 = arith.addf %436, %432 : vector<8x8xf32>
    %cst_140 = arith.constant 2.500000e-01 : f32
    %438 = vector.broadcast %cst_140 : f32 to vector<8x8xf32>
    %439 = arith.mulf %437, %438 : vector<8x8xf32>
    %440 = arith.subf %369, %439 : vector<8x8xf32>
    %441 = arith.subf %369, %439 : vector<8x8xf32>
    %442 = arith.mulf %440, %441 : vector<8x8xf32>
    %cst_141 = arith.constant 0.000000e+00 : f32
    %443 = vector.broadcast %cst_141 : f32 to vector<8x8xf32>
    %444 = arith.addf %443, %442 : vector<8x8xf32>
    %445 = arith.subf %390, %439 : vector<8x8xf32>
    %446 = arith.subf %390, %439 : vector<8x8xf32>
    %447 = arith.mulf %445, %446 : vector<8x8xf32>
    %448 = arith.addf %444, %447 : vector<8x8xf32>
    %449 = arith.subf %411, %439 : vector<8x8xf32>
    %450 = arith.subf %411, %439 : vector<8x8xf32>
    %451 = arith.mulf %449, %450 : vector<8x8xf32>
    %452 = arith.addf %448, %451 : vector<8x8xf32>
    %453 = arith.subf %432, %439 : vector<8x8xf32>
    %454 = arith.subf %432, %439 : vector<8x8xf32>
    %455 = arith.mulf %453, %454 : vector<8x8xf32>
    %456 = arith.addf %452, %455 : vector<8x8xf32>
    %cst_142 = arith.constant 2.500000e-01 : f32
    %457 = vector.broadcast %cst_142 : f32 to vector<8x8xf32>
    %458 = arith.mulf %456, %457 : vector<8x8xf32>
    %cst_143 = arith.constant 9.99999974E-6 : f32
    %459 = vector.broadcast %cst_143 : f32 to vector<8x8xf32>
    %460 = arith.addf %458, %459 : vector<8x8xf32>
    %461 = math.rsqrt %460 : vector<8x8xf32>
    %462 = arith.subf %369, %439 : vector<8x8xf32>
    %463 = arith.mulf %462, %461 : vector<8x8xf32>
    %464 = arith.index_cast %arg1 : i32 to index
    %c0_144 = arith.constant 0 : index
    %465 = memref.load %arg8[%464, %c0_144] : memref<2x4xf32, #tpu.memory_space<smem>>
    %466 = vector.broadcast %465 : f32 to vector<8x8xf32>
    %467 = arith.mulf %463, %466 : vector<8x8xf32>
    %468 = arith.index_cast %arg1 : i32 to index
    %c0_145 = arith.constant 0 : index
    %469 = memref.load %arg9[%468, %c0_145] : memref<2x4xf32, #tpu.memory_space<smem>>
    %470 = vector.broadcast %469 : f32 to vector<8x8xf32>
    %471 = arith.addf %467, %470 : vector<8x8xf32>
    %472 = arith.truncf %471 : vector<8x8xf32> to vector<8x8xbf16>
    %cst_146 = arith.constant dense<0.000000e+00> : vector<8x32xf32>
    %473 = tpu.matmul %472, %291, %cst_146 {dimension_numbers = #tpu.dot_dimension_numbers<[1], [0], [0], [1], [0, 0, 1, 1], [], []>} : vector<8x8xbf16>, vector<8x32xbf16>, vector<8x32xf32> -> vector<8x32xf32>
    %c8 = arith.constant 8 : index
    %c0_147 = arith.constant 0 : index
    %474 = vector.load %arg22[%c8, %c0_147] : memref<16x128xf32, #tpu.memory_space<vmem>>, vector<8x32xf32>
    tpu.vector_store %arg22[%c8, %c0_147], %473 {strides = array<i32>} : memref<16x128xf32, #tpu.memory_space<vmem>>, vector<8x32xf32>,
    %475 = arith.subf %390, %439 : vector<8x8xf32>
    %476 = arith.mulf %475, %461 : vector<8x8xf32>
    %477 = arith.index_cast %arg1 : i32 to index
    %c1_148 = arith.constant 1 : index
    %478 = memref.load %arg8[%477, %c1_148] : memref<2x4xf32, #tpu.memory_space<smem>>
    %479 = vector.broadcast %478 : f32 to vector<8x8xf32>
    %480 = arith.mulf %476, %479 : vector<8x8xf32>
    %481 = arith.index_cast %arg1 : i32 to index
    %c1_149 = arith.constant 1 : index
    %482 = memref.load %arg9[%481, %c1_149] : memref<2x4xf32, #tpu.memory_space<smem>>
    %483 = vector.broadcast %482 : f32 to vector<8x8xf32>
    %484 = arith.addf %480, %483 : vector<8x8xf32>
    %485 = arith.truncf %484 : vector<8x8xf32> to vector<8x8xbf16>
    %cst_150 = arith.constant dense<0.000000e+00> : vector<8x32xf32>
    %486 = tpu.matmul %485, %310, %cst_150 {dimension_numbers = #tpu.dot_dimension_numbers<[1], [0], [0], [1], [0, 0, 1, 1], [], []>} : vector<8x8xbf16>, vector<8x32xbf16>, vector<8x32xf32> -> vector<8x32xf32>
    %c8_151 = arith.constant 8 : index
    %c32_152 = arith.constant 32 : index
    %487 = vector.load %arg22[%c8_151, %c32_152] : memref<16x128xf32, #tpu.memory_space<vmem>>, vector<8x32xf32>
    tpu.vector_store %arg22[%c8_151, %c32_152], %486 {strides = array<i32>} : memref<16x128xf32, #tpu.memory_space<vmem>>, vector<8x32xf32>,
    %488 = arith.subf %411, %439 : vector<8x8xf32>
    %489 = arith.mulf %488, %461 : vector<8x8xf32>
    %490 = arith.index_cast %arg1 : i32 to index
    %c2_153 = arith.constant 2 : index
    %491 = memref.load %arg8[%490, %c2_153] : memref<2x4xf32, #tpu.memory_space<smem>>
    %492 = vector.broadcast %491 : f32 to vector<8x8xf32>
    %493 = arith.mulf %489, %492 : vector<8x8xf32>
    %494 = arith.index_cast %arg1 : i32 to index
    %c2_154 = arith.constant 2 : index
    %495 = memref.load %arg9[%494, %c2_154] : memref<2x4xf32, #tpu.memory_space<smem>>
    %496 = vector.broadcast %495 : f32 to vector<8x8xf32>
    %497 = arith.addf %493, %496 : vector<8x8xf32>
    %498 = arith.truncf %497 : vector<8x8xf32> to vector<8x8xbf16>
    %cst_155 = arith.constant dense<0.000000e+00> : vector<8x32xf32>
    %499 = tpu.matmul %498, %329, %cst_155 {dimension_numbers = #tpu.dot_dimension_numbers<[1], [0], [0], [1], [0, 0, 1, 1], [], []>} : vector<8x8xbf16>, vector<8x32xbf16>, vector<8x32xf32> -> vector<8x32xf32>
    %c8_156 = arith.constant 8 : index
    %c64_157 = arith.constant 64 : index
    %500 = vector.load %arg22[%c8_156, %c64_157] : memref<16x128xf32, #tpu.memory_space<vmem>>, vector<8x32xf32>
    tpu.vector_store %arg22[%c8_156, %c64_157], %499 {strides = array<i32>} : memref<16x128xf32, #tpu.memory_space<vmem>>, vector<8x32xf32>,
    %501 = arith.subf %432, %439 : vector<8x8xf32>
    %502 = arith.mulf %501, %461 : vector<8x8xf32>
    %503 = arith.index_cast %arg1 : i32 to index
    %c3_158 = arith.constant 3 : index
    %504 = memref.load %arg8[%503, %c3_158] : memref<2x4xf32, #tpu.memory_space<smem>>
    %505 = vector.broadcast %504 : f32 to vector<8x8xf32>
    %506 = arith.mulf %502, %505 : vector<8x8xf32>
    %507 = arith.index_cast %arg1 : i32 to index
    %c3_159 = arith.constant 3 : index
    %508 = memref.load %arg9[%507, %c3_159] : memref<2x4xf32, #tpu.memory_space<smem>>
    %509 = vector.broadcast %508 : f32 to vector<8x8xf32>
    %510 = arith.addf %506, %509 : vector<8x8xf32>
    %511 = arith.truncf %510 : vector<8x8xf32> to vector<8x8xbf16>
    %cst_160 = arith.constant dense<0.000000e+00> : vector<8x32xf32>
    %512 = tpu.matmul %511, %348, %cst_160 {dimension_numbers = #tpu.dot_dimension_numbers<[1], [0], [0], [1], [0, 0, 1, 1], [], []>} : vector<8x8xbf16>, vector<8x32xbf16>, vector<8x32xf32> -> vector<8x32xf32>
    %c8_161 = arith.constant 8 : index
    %c96_162 = arith.constant 96 : index
    %513 = vector.load %arg22[%c8_161, %c96_162] : memref<16x128xf32, #tpu.memory_space<vmem>>, vector<8x32xf32>
    tpu.vector_store %arg22[%c8_161, %c96_162], %512 {strides = array<i32>} : memref<16x128xf32, #tpu.memory_space<vmem>>, vector<8x32xf32>,
    %c0_163 = arith.constant 0 : index
    %c0_164 = arith.constant 0 : index
    %514 = vector.load %arg22[%c0_163, %c0_164] : memref<16x128xf32, #tpu.memory_space<vmem>>, vector<16x128xf32>
    %515 = arith.truncf %514 : vector<16x128xf32> to vector<16x128xbf16>
    %c0_165 = arith.constant 0 : index
    %c0_166 = arith.constant 0 : index
    %c0_167 = arith.constant 0 : index
    %516 = vector.load %arg10[%c0_165, %c0_166, %c0_167] : memref<1x128x128xbf16, #tpu.memory_space<vmem>>, vector<1x128x128xbf16>
    %517 = vector.shape_cast %516 : vector<1x128x128xbf16> to vector<128x128xbf16>
    %cst_168 = arith.constant dense<0.000000e+00> : vector<16x128xf32>
    %518 = tpu.matmul %515, %517, %cst_168 {dimension_numbers = #tpu.dot_dimension_numbers<[1], [0], [0], [1], [0, 0, 1, 1], [], []>} : vector<16x128xbf16>, vector<128x128xbf16>, vector<16x128xf32> -> vector<16x128xf32>
    %c0_169 = arith.constant 0 : index
    %c0_170 = arith.constant 0 : index
    %c0_171 = arith.constant 0 : index
    %519 = vector.load %arg11[%c0_169, %c0_170, %c0_171] : memref<1x1x128xf32, #tpu.memory_space<vmem>>, vector<1x1x128xf32>
    %520 = vector.shape_cast %519 : vector<1x1x128xf32> to vector<1x128xf32>
    %521 = vector.broadcast %520 : vector<1x128xf32> to vector<16x128xf32>
    %522 = arith.addf %518, %521 : vector<16x128xf32>
    %523 = arith.addf %3, %522 : vector<16x128xf32>
    %c0_172 = arith.constant 0 : index
    %c0_173 = arith.constant 0 : index
    %c0_174 = arith.constant 0 : index
    %524 = vector.load %arg12[%c0_172, %c0_173, %c0_174] : memref<1x1x128xf32, #tpu.memory_space<vmem>>, vector<1x1x128xf32>
    %525 = vector.shape_cast %524 : vector<1x1x128xf32> to vector<1x128xf32>
    %c0_175 = arith.constant 0 : index
    %c0_176 = arith.constant 0 : index
    %c0_177 = arith.constant 0 : index
    %526 = vector.load %arg13[%c0_175, %c0_176, %c0_177] : memref<1x1x128xf32, #tpu.memory_space<vmem>>, vector<1x1x128xf32>
    %527 = vector.shape_cast %526 : vector<1x1x128xf32> to vector<1x128xf32>
    %cst_178 = arith.constant dense<0.000000e+00> : vector<16xf32>
    %528 = vector.multi_reduction <add>, %523, %cst_178 [1] : vector<16x128xf32> to vector<16xf32>
    %529 = vector.shape_cast %528 : vector<16xf32> to vector<16x1xf32>
    %cst_179 = arith.constant 1.280000e+02 : f32
    %530 = vector.broadcast %cst_179 : f32 to vector<16x1xf32>
    %531 = arith.divf %529, %530 : vector<16x1xf32>
    %532 = vector.broadcast %531 : vector<16x1xf32> to vector<16x128xf32>
    %533 = arith.subf %523, %532 : vector<16x128xf32>
    %534 = arith.mulf %533, %533 : vector<16x128xf32>
    %cst_180 = arith.constant dense<0.000000e+00> : vector<16xf32>
    %535 = vector.multi_reduction <add>, %534, %cst_180 [1] : vector<16x128xf32> to vector<16xf32>
    %536 = vector.shape_cast %535 : vector<16xf32> to vector<16x1xf32>
    %cst_181 = arith.constant 1.280000e+02 : f32
    %537 = vector.broadcast %cst_181 : f32 to vector<16x1xf32>
    %538 = arith.divf %536, %537 : vector<16x1xf32>
    %cst_182 = arith.constant 9.99999974E-6 : f32
    %539 = vector.broadcast %cst_182 : f32 to vector<16x1xf32>
    %540 = arith.addf %538, %539 : vector<16x1xf32>
    %541 = math.rsqrt %540 : vector<16x1xf32>
    %542 = vector.broadcast %541 : vector<16x1xf32> to vector<16x128xf32>
    %543 = arith.mulf %533, %542 : vector<16x128xf32>
    %544 = vector.broadcast %525 : vector<1x128xf32> to vector<16x128xf32>
    %545 = arith.mulf %543, %544 : vector<16x128xf32>
    %546 = vector.broadcast %527 : vector<1x128xf32> to vector<16x128xf32>
    %547 = arith.addf %545, %546 : vector<16x128xf32>
    %548 = arith.truncf %547 : vector<16x128xf32> to vector<16x128xbf16>
    %c0_183 = arith.constant 0 : index
    %c0_184 = arith.constant 0 : index
    %c0_185 = arith.constant 0 : index
    %549 = vector.load %arg14[%c0_183, %c0_184, %c0_185] : memref<1x128x512xbf16, #tpu.memory_space<vmem>>, vector<1x128x512xbf16>
    %550 = vector.shape_cast %549 : vector<1x128x512xbf16> to vector<128x512xbf16>
    %cst_186 = arith.constant dense<0.000000e+00> : vector<16x512xf32>
    %551 = tpu.matmul %548, %550, %cst_186 {dimension_numbers = #tpu.dot_dimension_numbers<[1], [0], [0], [1], [0, 0, 1, 1], [], []>} : vector<16x128xbf16>, vector<128x512xbf16>, vector<16x512xf32> -> vector<16x512xf32>
    %c0_187 = arith.constant 0 : index
    %c0_188 = arith.constant 0 : index
    %c0_189 = arith.constant 0 : index
    %552 = vector.load %arg15[%c0_187, %c0_188, %c0_189] : memref<1x1x512xf32, #tpu.memory_space<vmem>>, vector<1x1x512xf32>
    %553 = vector.shape_cast %552 : vector<1x1x512xf32> to vector<1x512xf32>
    %554 = vector.broadcast %553 : vector<1x512xf32> to vector<16x512xf32>
    %555 = arith.addf %551, %554 : vector<16x512xf32>
    %556 = arith.mulf %555, %555 : vector<16x512xf32>
    %557 = arith.mulf %555, %556 : vector<16x512xf32>
    %cst_190 = arith.constant 4.471500e-02 : f32
    %558 = vector.broadcast %cst_190 : f32 to vector<16x512xf32>
    %559 = arith.mulf %558, %557 : vector<16x512xf32>
    %560 = arith.addf %555, %559 : vector<16x512xf32>
    %cst_191 = arith.constant 0.797884583 : f32
    %561 = vector.broadcast %cst_191 : f32 to vector<16x512xf32>
    %562 = arith.mulf %561, %560 : vector<16x512xf32>
    %563 = math.tanh %562 : vector<16x512xf32>
    %cst_192 = arith.constant 1.000000e+00 : f32
    %564 = vector.broadcast %cst_192 : f32 to vector<16x512xf32>
    %565 = arith.addf %564, %563 : vector<16x512xf32>
    %cst_193 = arith.constant 5.000000e-01 : f32
    %566 = vector.broadcast %cst_193 : f32 to vector<16x512xf32>
    %567 = arith.mulf %566, %565 : vector<16x512xf32>
    %568 = arith.mulf %555, %567 : vector<16x512xf32>
    %569 = arith.truncf %568 : vector<16x512xf32> to vector<16x512xbf16>
    %c0_194 = arith.constant 0 : index
    %c0_195 = arith.constant 0 : index
    %c0_196 = arith.constant 0 : index
    %570 = vector.load %arg16[%c0_194, %c0_195, %c0_196] : memref<1x512x128xbf16, #tpu.memory_space<vmem>>, vector<1x512x128xbf16>
    %571 = vector.shape_cast %570 : vector<1x512x128xbf16> to vector<512x128xbf16>
    %cst_197 = arith.constant dense<0.000000e+00> : vector<16x128xf32>
    %572 = tpu.matmul %569, %571, %cst_197 {dimension_numbers = #tpu.dot_dimension_numbers<[1], [0], [0], [1], [0, 0, 1, 1], [], []>} : vector<16x512xbf16>, vector<512x128xbf16>, vector<16x128xf32> -> vector<16x128xf32>
    %573 = arith.addf %523, %572 : vector<16x128xf32>
    %c0_198 = arith.constant 0 : index
    %c0_199 = arith.constant 0 : index
    %c0_200 = arith.constant 0 : index
    %574 = vector.load %arg17[%c0_198, %c0_199, %c0_200] : memref<1x1x128xf32, #tpu.memory_space<vmem>>, vector<1x1x128xf32>
    %575 = vector.shape_cast %574 : vector<1x1x128xf32> to vector<1x128xf32>
    %576 = vector.broadcast %575 : vector<1x128xf32> to vector<16x128xf32>
    %577 = arith.addf %573, %576 : vector<16x128xf32>
    %c0_201 = arith.constant 0 : index
    %c0_202 = arith.constant 0 : index
    %578 = vector.load %arg21[%c0_201, %c0_202] : memref<16x128xf32, #tpu.memory_space<vmem>>, vector<16x128xf32>
    tpu.vector_store %arg21[%c0_201, %c0_202], %577 {strides = array<i32>} : memref<16x128xf32, #tpu.memory_space<vmem>>, vector<16x128xf32>,
    %c1_i32 = arith.constant 1 : i32
    %579 = arith.cmpi eq, %arg1, %c1_i32 : i32
    %580 = arith.extui %579 : i1 to i32
    %c0_i32_203 = arith.constant 0 : i32
    %581 = arith.cmpi ne, %580, %c0_i32_203 : i32
    scf.if %581 {
      %c0_204 = arith.constant 0 : index
      %c0_205 = arith.constant 0 : index
      %582 = vector.load %arg18[%c0_204, %c0_205] : memref<1x128xf32, #tpu.memory_space<vmem>>, vector<1x128xf32>
      %c0_206 = arith.constant 0 : index
      %c0_207 = arith.constant 0 : index
      %583 = vector.load %arg19[%c0_206, %c0_207] : memref<1x128xf32, #tpu.memory_space<vmem>>, vector<1x128xf32>
      %cst_208 = arith.constant dense<0.000000e+00> : vector<16xf32>
      %584 = vector.multi_reduction <add>, %577, %cst_208 [1] : vector<16x128xf32> to vector<16xf32>
      %585 = vector.shape_cast %584 : vector<16xf32> to vector<16x1xf32>
      %cst_209 = arith.constant 1.280000e+02 : f32
      %586 = vector.broadcast %cst_209 : f32 to vector<16x1xf32>
      %587 = arith.divf %585, %586 : vector<16x1xf32>
      %588 = vector.broadcast %587 : vector<16x1xf32> to vector<16x128xf32>
      %589 = arith.subf %577, %588 : vector<16x128xf32>
      %590 = arith.mulf %589, %589 : vector<16x128xf32>
      %cst_210 = arith.constant dense<0.000000e+00> : vector<16xf32>
      %591 = vector.multi_reduction <add>, %590, %cst_210 [1] : vector<16x128xf32> to vector<16xf32>
      %592 = vector.shape_cast %591 : vector<16xf32> to vector<16x1xf32>
      %cst_211 = arith.constant 1.280000e+02 : f32
      %593 = vector.broadcast %cst_211 : f32 to vector<16x1xf32>
      %594 = arith.divf %592, %593 : vector<16x1xf32>
      %cst_212 = arith.constant 9.99999974E-6 : f32
      %595 = vector.broadcast %cst_212 : f32 to vector<16x1xf32>
      %596 = arith.addf %594, %595 : vector<16x1xf32>
      %597 = math.rsqrt %596 : vector<16x1xf32>
      %598 = vector.broadcast %597 : vector<16x1xf32> to vector<16x128xf32>
      %599 = arith.mulf %589, %598 : vector<16x128xf32>
      %600 = vector.broadcast %582 : vector<1x128xf32> to vector<16x128xf32>
      %601 = arith.mulf %599, %600 : vector<16x128xf32>
      %602 = vector.broadcast %583 : vector<1x128xf32> to vector<16x128xf32>
      %603 = arith.addf %601, %602 : vector<16x128xf32>
      %604 = vector.extract_strided_slice %603 {offsets = [0, 0], sizes = [8, 128], strides = [1, 1]} : vector<16x128xf32> to vector<8x128xf32>
      %c0_213 = arith.constant 0 : index
      %c0_214 = arith.constant 0 : index
      %c0_215 = arith.constant 0 : index
      %605 = vector.load %arg20[%c0_213, %c0_214, %c0_215] : memref<2x8x128xf32, #tpu.memory_space<vmem>>, vector<1x8x128xf32>
      %606 = vector.shape_cast %605 : vector<1x8x128xf32> to vector<8x128xf32>
      %607 = vector.shape_cast %604 : vector<8x128xf32> to vector<1x8x128xf32>
      tpu.vector_store %arg20[%c0_213, %c0_214, %c0_215], %607 {strides = array<i32>} : memref<2x8x128xf32, #tpu.memory_space<vmem>>, vector<1x8x128xf32>,
      %608 = vector.extract_strided_slice %603 {offsets = [8, 0], sizes = [8, 128], strides = [1, 1]} : vector<16x128xf32> to vector<8x128xf32>
      %c1_216 = arith.constant 1 : index
      %c0_217 = arith.constant 0 : index
      %c0_218 = arith.constant 0 : index
      %609 = vector.load %arg20[%c1_216, %c0_217, %c0_218] : memref<2x8x128xf32, #tpu.memory_space<vmem>>, vector<1x8x128xf32>
      %610 = vector.shape_cast %609 : vector<1x8x128xf32> to vector<8x128xf32>
      %611 = vector.shape_cast %608 : vector<8x128xf32> to vector<1x8x128xf32>
      tpu.vector_store %arg20[%c1_216, %c0_217, %c0_218], %611 {strides = array<i32>} : memref<2x8x128xf32, #tpu.memory_space<vmem>>, vector<1x8x128xf32>,
    } else {
    }
    return
  }
  func.func @transform_0(%arg0: i32, %arg1: i32) -> (i32, i32, i32) {
    %c0_i32 = arith.constant 0 : i32
    %c0_i32_0 = arith.constant 0 : i32
    %c0_i32_1 = arith.constant 0 : i32
    return %arg0, %c0_i32, %c0_i32_0 : i32, i32, i32
  }
  func.func @transform_1(%arg0: i32, %arg1: i32) -> (i32, i32) {
    %c0_i32 = arith.constant 0 : i32
    %c0_i32_0 = arith.constant 0 : i32
    %c0_i32_1 = arith.constant 0 : i32
    return %c0_i32, %c0_i32_0 : i32, i32
  }
  func.func @transform_2(%arg0: i32, %arg1: i32) -> (i32, i32, i32) {
    %c0_i32 = arith.constant 0 : i32
    %c0_i32_0 = arith.constant 0 : i32
    %c0_i32_1 = arith.constant 0 : i32
    return %arg1, %c0_i32, %c0_i32_0 : i32, i32, i32
  }
  func.func @transform_3(%arg0: i32, %arg1: i32) -> (i32, i32, i32) {
    %c0_i32 = arith.constant 0 : i32
    %c0_i32_0 = arith.constant 0 : i32
    %c0_i32_1 = arith.constant 0 : i32
    return %arg1, %c0_i32, %c0_i32_0 : i32, i32, i32
  }
  func.func @transform_4(%arg0: i32, %arg1: i32) -> (i32, i32, i32) {
    %c0_i32 = arith.constant 0 : i32
    %c0_i32_0 = arith.constant 0 : i32
    %c0_i32_1 = arith.constant 0 : i32
    return %arg1, %c0_i32, %c0_i32_0 : i32, i32, i32
  }
  func.func @transform_5(%arg0: i32, %arg1: i32) -> (i32, i32, i32) {
    %c0_i32 = arith.constant 0 : i32
    %c0_i32_0 = arith.constant 0 : i32
    %c0_i32_1 = arith.constant 0 : i32
    %c0_i32_2 = arith.constant 0 : i32
    return %c0_i32, %c0_i32_0, %c0_i32_1 : i32, i32, i32
  }
  func.func @transform_6(%arg0: i32, %arg1: i32) -> (i32, i32) {
    %c0_i32 = arith.constant 0 : i32
    %c0_i32_0 = arith.constant 0 : i32
    %c0_i32_1 = arith.constant 0 : i32
    return %c0_i32, %c0_i32_0 : i32, i32
  }
  func.func @transform_7(%arg0: i32, %arg1: i32) -> (i32, i32) {
    %c0_i32 = arith.constant 0 : i32
    %c0_i32_0 = arith.constant 0 : i32
    %c0_i32_1 = arith.constant 0 : i32
    return %c0_i32, %c0_i32_0 : i32, i32
  }
  func.func @transform_8(%arg0: i32, %arg1: i32) -> (i32, i32, i32) {
    %c0_i32 = arith.constant 0 : i32
    %c0_i32_0 = arith.constant 0 : i32
    %c0_i32_1 = arith.constant 0 : i32
    return %arg1, %c0_i32, %c0_i32_0 : i32, i32, i32
  }
  func.func @transform_9(%arg0: i32, %arg1: i32) -> (i32, i32, i32) {
    %c0_i32 = arith.constant 0 : i32
    %c0_i32_0 = arith.constant 0 : i32
    %c0_i32_1 = arith.constant 0 : i32
    return %arg1, %c0_i32, %c0_i32_0 : i32, i32, i32
  }
  func.func @transform_10(%arg0: i32, %arg1: i32) -> (i32, i32, i32) {
    %c0_i32 = arith.constant 0 : i32
    %c0_i32_0 = arith.constant 0 : i32
    %c0_i32_1 = arith.constant 0 : i32
    return %arg1, %c0_i32, %c0_i32_0 : i32, i32, i32
  }
  func.func @transform_11(%arg0: i32, %arg1: i32) -> (i32, i32, i32) {
    %c0_i32 = arith.constant 0 : i32
    %c0_i32_0 = arith.constant 0 : i32
    %c0_i32_1 = arith.constant 0 : i32
    return %arg1, %c0_i32, %c0_i32_0 : i32, i32, i32
  }
  func.func @transform_12(%arg0: i32, %arg1: i32) -> (i32, i32, i32) {
    %c0_i32 = arith.constant 0 : i32
    %c0_i32_0 = arith.constant 0 : i32
    %c0_i32_1 = arith.constant 0 : i32
    return %arg1, %c0_i32, %c0_i32_0 : i32, i32, i32
  }
  func.func @transform_13(%arg0: i32, %arg1: i32) -> (i32, i32, i32) {
    %c0_i32 = arith.constant 0 : i32
    %c0_i32_0 = arith.constant 0 : i32
    %c0_i32_1 = arith.constant 0 : i32
    return %arg1, %c0_i32, %c0_i32_0 : i32, i32, i32
  }
  func.func @transform_14(%arg0: i32, %arg1: i32) -> (i32, i32, i32) {
    %c0_i32 = arith.constant 0 : i32
    %c0_i32_0 = arith.constant 0 : i32
    %c0_i32_1 = arith.constant 0 : i32
    return %arg1, %c0_i32, %c0_i32_0 : i32, i32, i32
  }
  func.func @transform_15(%arg0: i32, %arg1: i32) -> (i32, i32, i32) {
    %c0_i32 = arith.constant 0 : i32
    %c0_i32_0 = arith.constant 0 : i32
    %c0_i32_1 = arith.constant 0 : i32
    return %arg1, %c0_i32, %c0_i32_0 : i32, i32, i32
  }
  func.func @transform_16(%arg0: i32, %arg1: i32) -> (i32, i32) {
    %c0_i32 = arith.constant 0 : i32
    %c0_i32_0 = arith.constant 0 : i32
    %c0_i32_1 = arith.constant 0 : i32
    return %c0_i32, %c0_i32_0 : i32, i32
  }
  func.func @transform_17(%arg0: i32, %arg1: i32) -> (i32, i32) {
    %c0_i32 = arith.constant 0 : i32
    %c0_i32_0 = arith.constant 0 : i32
    %c0_i32_1 = arith.constant 0 : i32
    return %c0_i32, %c0_i32_0 : i32, i32
  }
  func.func @transform_18(%arg0: i32, %arg1: i32) -> (i32, i32, i32) {
    %c0_i32 = arith.constant 0 : i32
    %c0_i32_0 = arith.constant 0 : i32
    %c0_i32_1 = arith.constant 0 : i32
    return %arg0, %c0_i32, %c0_i32_0 : i32, i32, i32
  }
}

</mosaic_0001>

<bundles_post_ra>
// kernel: temporal_transformer_block.1
= control target key start
LH: loop header
LB: loop body
LE: loop exit
PB: predicated region body
PF: predicated region fallthrough
CT: control target
= control target key end

     0   :  { %s4561_s0 = inlined_call_operand.vmem [shape: f32[2,8,128], index: 0, kind: input, shape index: {}]   ;;  %s4562_s1 = inlined_call_operand.vmem [shape: f32[8,128], index: 1, kind: input, shape index: {}]   ;;  %s4563_s2 = inlined_call_operand.vmem [shape: f32[2,1,128], index: 2, kind: input, shape index: {}]   ;;  %s4564_s3 = inlined_call_operand.vmem [shape: f32[2,1,128], index: 3, kind: input, shape index: {}]   ;;  %s4565_s4 = inlined_call_operand.vmem [shape: bf16[2,128,384], index: 4, kind: input, shape index: {}]   ;;  %s4566_s5 = inlined_call_operand.vmem [shape: f32[2,4,4], index: 5, kind: input, shape index: {}]   ;;  %s4567_s6 = inlined_call_operand.vmem [shape: f32[2,4], index: 6, kind: input, shape index: {}]   ;;  %s4568_s7 = inlined_call_operand.vmem [shape: f32[2,4], index: 7, kind: input, shape index: {}]   ;;  %s4569_s8 = inlined_call_operand.vmem [shape: bf16[2,128,128], index: 8, kind: input, shape index: {}]   ;;  %s4570_s9 = inlined_call_operand.vmem [shape: f32[2,1,128], index: 9, kind: input, shape index: {}]   ;;  %s4571_s10 = inlined_call_operand.vmem [shape: f32[2,1,128], index: 10, kind: input, shape index: {}]   ;;  %s4572_s11 = inlined_call_operand.vmem [shape: f32[2,1,128], index: 11, kind: input, shape index: {}]   ;;  %s4573_s12 = inlined_call_operand.vmem [shape: bf16[2,128,512], index: 12, kind: input, shape index: {}]   ;;  %s4574_s13 = inlined_call_operand.vmem [shape: f32[2,1,512], index: 13, kind: input, shape index: {}]   ;;  %s4575_s14 = inlined_call_operand.vmem [shape: bf16[2,512,128], index: 14, kind: input, shape index: {}]   ;;  %s4576_s15 = inlined_call_operand.vmem [shape: f32[2,1,128], index: 15, kind: input, shape index: {}]   ;;  %s4577_s16 = inlined_call_operand.vmem [shape: f32[1,128], index: 16, kind: input, shape index: {}]   ;;  %s4578_s17 = inlined_call_operand.vmem [shape: f32[1,128], index: 17, kind: input, shape index: {}]   ;;  %s4579_s18 = inlined_call_operand.hbm [shape: f32[2,8,128], index: 18, kind: output, shape index: {}]  }
   0x1   :  { %4604 = sst [smem:[#allocation20_spill]] %s4561_s0 }
   0x2   :  { %4605 = sst [smem:[#allocation21_spill]] %s4562_s1 }
   0x3   :  { %4606 = sst [smem:[#allocation22_spill]] %s4563_s2 }
   0x4   :  { %4607 = sst [smem:[#allocation23_spill]] %s4564_s3 }
   0x5   :  { %4608 = sst [smem:[#allocation24_spill]] %s4565_s4 }
   0x6   :  { %4609 = sst [smem:[#allocation25_spill]] %s4566_s5 }
   0x7   :  { %4610 = sst [smem:[#allocation26_spill]] %s4567_s6 }
   0x8   :  { %4611 = sst [smem:[#allocation27_spill]] %s4568_s7 }
   0x9   :  { %4612 = sst [smem:[#allocation28_spill]] %s4569_s8 }
   0xa   :  { %4613 = sst [smem:[#allocation29_spill]] %s4571_s10 }
   0xb   :  { %4614 = sst [smem:[#allocation30_spill]] %s4572_s11 }
   0xc   :  { %4615 = sst [smem:[#allocation31_spill]] %s4573_s12 }
   0xd   :  { %4616 = sst [smem:[#allocation32_spill]] %s4574_s13 }
   0xe   :  { %4617 = sst [smem:[#allocation33_spill]] %s4575_s14 }
   0xf   :  { %4618 = sst [smem:[#allocation34_spill]] %s4576_s15 }
  0x10   :  { %4619 = sst [smem:[#allocation35_spill]] %s4577_s16 }
  0x11   :  { %4620 = sst [smem:[#allocation36_spill]] %s4578_s17 }
  0x12   :  { %4621 = sst [smem:[#allocation37_spill]] %s4579_s18 }
  0x13   :  { %23 = vsyncpa [#allocation6], 0 }
  0x14   :  { %24 = vsyncpa [#allocation8], 0 }
  0x15   :  { %25 = vsyncpa [#allocation5], 0  ;;  %s3812_s27 = smov 0   ;;  %s3814_s28 = smov 0  }
  0x16   :  { %s3816_s29 = smov 0  }
  0x17 LB: > { %4622 = sst [smem:[#allocation14_spill]] %s3695_s27  ;;  %s4581_s1 = sadd.s32 4294967295, %s3703_s29   ;;  %s3703_s29 = sphi %s3816_s29, %s31_s29   ;;  %s3699_s28 = sphi %s3814_s28, %s4680_s28   ;;  %s3695_s27 = sphi %s3812_s27, %s4679_s27  }
  0x18   : > { %4623 = sst [smem:[#allocation15_spill]] %s3699_s28  ;;  %p2909_p0 = scmp.ge.s32.totalorder %s3703_s29, 1 }
  0x19   : > { %4624 = sst [smem:[#allocation16_spill]] %s3703_s29  ;;  %p512_p1 = scmp.lt.s32.totalorder %s3703_s29, 3 }
  0x1a   : > { %s4625_s6 = sld [smem:[#allocation26_spill]]  ;;  %p3835_p2 = scmp.eq.s32.totalorder %s4581_s1, 0 }
  0x1b   : > { %p3839_p3 = pnand %p2909_p0, %p512_p1  ;;  %s40_s22 = sadd.s32 1, %s3699_s28 }
  0x1c   : > { %s4628_s5 = sld [smem:[#allocation25_spill]]  ;;  %p41_p6 = scmp.ge.s32.totalorder %s40_s22, 2 }
  0x1d   : > { %p3466_p4 = pneg %p3839_p3  ;;  %s3705_s25 = smov [#allocation7]  }
  0x1e   : > { %s4682_s22 = smov (%p41_p6, %s40_s22), 0  ;;  %s4630_s7 = sld [smem:[#allocation27_spill]] }
  0x1f   : > { %p3467_p5 = pnand %p3835_p2, %p3466_p4  ;;  %4629 = sst [smem:[#allocation17_spill]] %s4682_s22 }
  0x20   : > { %s548_s19 = sshll.u32 %s4625_s6, 4  ;;  %s3706_s1 = smov [#allocation4]   ;;  %s549_s19 = int_to_ptr.vmem [resolvable:$true] %s548_s19 }
  0x21   : > { %3472 = dma.vmem_to_smem (!%p3467_p5), %s549_s19, 32, %s3705_s25, [#allocation8]  }
  0x22   : > { %s535_s24 = sshll.u32 %s4628_s5, 4  ;;  %s3707_s6 = smov 64   ;;  %s536_s24 = int_to_ptr.vmem [resolvable:$true] %s535_s24 }
  0x23   : > { %s3708_s18 = smov 4   ;;  %s3709_s28 = smov [#allocation9]  }
  0x24   : > { %s558_s0 = sshll.u32 %s4630_s7, 4  ;;  %652 = sbr.rel (%p3839_p3) target bundleno = 2797 (0xaed), region = 92  ;;  %s559_s0 = int_to_ptr.vmem [resolvable:$true] %s558_s0 }
  0x25   : > { %3469 = dma.vmem_to_smem (!%p3467_p5), %s536_s24, 128, %s3706_s1, [#allocation6], %s3707_s6, %s3707_s6, %s3708_s18  }
  0x26   : > { %3475 = dma.vmem_to_smem (!%p3467_p5), %s559_s0, 32, %s3709_s28, [#allocation8]  }
  0x29   : > { %3682 = dma.done.wait (%p3835_p2), [#allocation6], 128  }
  0x2a   : > { %3684 = vsyncadd (%p3835_p2), [#allocation6], 4294967168 }
  0x2b   : > { %3686 = dma.done.wait (%p3835_p2), [#allocation8], 64  }
  0x2c   : > { %3688 = vsyncadd (%p3835_p2), [#allocation8], 4294967232 }
  0x2d   : > { %669 = sfence }
  0x2e   : > { %p761_p7 = scmp.lt.s32.totalorder %s3695_s27, 1  ;;  %s4633_s8 = sld [smem:[#allocation28_spill]] }
  0x2f   : > { %s4634_s4 = sld [smem:[#allocation24_spill]]  ;;  %p2927_p8 = scmp.ne.s32.totalorder %s3695_s27, 0 }
  0x30   : > { %s3868_s6 = scalar_select %p761_p7, %s3695_s27, 1 }
  0x31   : > { %s4637_s12 = sld [smem:[#allocation31_spill]] }
  0x32   : > { %s3449_s23 = smul.u32 192, %s3868_s6  ;;  %s3340_s24 = sshll.u32 %s3868_s6, 6 }
  0x33   : > { %s3341_s25 = sshll.u32 %s3868_s6, 8  ;;  %s2924_s0 = sshll.u32 %s3868_s6, 2 }
  0x34   : > { %s3883_s30 = scalar_lea.vmem %s4633_s8, %s3340_s24  ;;  %s4638_s13 = sld [smem:[#allocation32_spill]] }
  0x35   : > { %s3892_s22 = scalar_lea.vmem %s4634_s4, %s3449_s23  ;;  %s4640_s14 = sld [smem:[#allocation33_spill]] }
  0x36   : > { %s4643_s29 = sld [smem:[#allocation21_spill]] (!%p2927_p8) }
  0x37   : > { %s3906_s8 = scalar_lea.vmem %s4637_s12, %s3341_s25 }
  0x38   : > { %808 = sbr.rel (%p2927_p8) target bundleno = 69 (0x45), region = 108 }
  0x3a   : > { %s3912_s5 = scalar_lea.vmem %s4638_s13, %s2924_s0  ;;  %s4644_s0 = sld [smem:[#allocation20_spill]] (!%p2927_p8) }
  0x3b   : > { %4639 = sst [smem:[#allocation18_spill]] %s3912_s5  ;;  %s3917_s1 = scalar_lea.vmem %s4640_s14, %s3341_s25 }
  0x3c   : > { %4641 = sst [smem:[#allocation19_spill]] %s3917_s1 }
  0x3d   : > { %v809_v0 = vld [vmem:[%s4643_s29] sm:$0xff] }
  0x40   : > { %v810_v1 = vld [vmem:[%s4644_s0] sm:$0xff]  ;;  %v2928_v2 = vld [vmem:[%s4644_s0 + $0x8] sm:$0xff] }
  0x41   : > { %v811_v3 = vadd.f32 %v810_v1, %v809_v0  ;;  %v815_v4 = vadd.f32 %v2928_v2, %v809_v0 }
  0x43   : > { %812 = vst [vmem:[#allocation2] sm:$0xff] %v811_v3 }
  0x44   : > { %816 = vst [vmem:[#allocation2 + $0x8] sm:$0xff] %v815_v4 }
  0x45 PF: > { %v3710_v7 = vmov 128.0   ;;  %v3015_v22 = vld [vmem:[%s3892_s22 + $0xa8] sm:$0xf]  ;;  %v3365_v23 = vld [vmem:[%s3892_s22 + $0xb0] sm:$0xf0]  ;;  %s4647_s3 = sld [smem:[#allocation23_spill]] }
  0x46   : > { %3526 = vrcp.f32 %v3710_v7  ;;  %v3364_v24 = vld [vmem:[%s3892_s22 + $0xac] sm:$0xf]  ;;  %v3016_v25 = vor.u32 %v3365_v23, %v3015_v22  ;;  %v3017_v26 = vld [vmem:[%s3892_s22 + $0xb4] sm:$0xf0]  ;;  %v3023_v27 = vld [vmem:[%s3892_s22 + $0xb0] sm:$0xf] }
  0x47   : > { %v3366_v28 = vld [vmem:[%s3892_s22 + $0xb8] sm:$0xf0]  ;;  %v3020_v29 = vor.u32 %v3364_v24, %v3017_v26  ;;  %v3003_v31 = vld [vmem:[%s3892_s22 + $0x90] sm:$0xf]  ;;  %v3361_v33 = vld [vmem:[%s3892_s22 + $0x94] sm:$0xf] }
  0x48   : > { %v3024_v30 = vor.u32 %v3366_v28, %v3023_v27  ;;  %1039 = vmatpush.bf16.msra.mxu0 %v3016_v25  ;;  %v3362_v32 = vld [vmem:[%s3892_s22 + $0x98] sm:$0xf0]  ;;  %v3005_v35 = vld [vmem:[%s3892_s22 + $0x9c] sm:$0xf0]  ;;  %v3011_v36 = vld [vmem:[%s3892_s22 + $0x98] sm:$0xf] }
  0x49   : > { %1053 = vmatpush.bf16.msra.mxu1 %v3020_v29  ;;  %v3004_v34 = vor.u32 %v3362_v32, %v3003_v31  ;;  %v3363_v37 = vld [vmem:[%s3892_s22 + $0xa0] sm:$0xf0]  ;;  %v3008_v38 = vor.u32 %v3361_v33, %v3005_v35  ;;  %v2991_v40 = vld [vmem:[%s3892_s22 + $0x78] sm:$0xf]  ;;  %v3358_v42 = vld [vmem:[%s3892_s22 + $0x7c] sm:$0xf] }
  0x4a   : > { %v817_v5 = vld [vmem:[#allocation2] sm:$0xff]  ;;  %1067 = vmatpush.bf16.msra.mxu2 %v3024_v30  ;;  %v3012_v39 = vor.u32 %v3363_v37, %v3011_v36  ;;  %v2993_v44 = vld [vmem:[%s3892_s22 + $0x84] sm:$0xf0]  ;;  %v3360_v46 = vld [vmem:[%s3892_s22 + $0x88] sm:$0xf0]  ;;  %vm1083_vm7 = vcmask 261120  }
  0x4b   : > { %821 = vadd.xlane.f32.xlu0 %v817_v5  ;;  %v818_v6 = vld [vmem:[#allocation2 + $0x8] sm:$0xff]  ;;  %v3359_v41 = vld [vmem:[%s3892_s22 + $0x80] sm:$0xf0]  ;;  %v2999_v45 = vld [vmem:[%s3892_s22 + $0x80] sm:$0xf]  ;;  %v2996_v47 = vor.u32 %v3358_v42, %v2993_v44  ;;  %s4648_s23 = scalar_lea.vmem %s4647_s3, %s3868_s6  ;;  %s4586_s19 = smov 64  }
  0x4c   : > { %v3527_v8 = vpop.eup %3526  ;;  %1040 = vmatpush.bf16.msra.mxu0 %v3004_v34  ;;  %v2992_v43 = vor.u32 %v3359_v41, %v2991_v40  ;;  %v3000_v48 = vor.u32 %v3360_v46, %v2999_v45  ;;  %v2979_v49 = vld [vmem:[%s3892_s22 + $0x60] sm:$0xf]  ;;  %v3356_v50 = vld [vmem:[%s3892_s22 + $0x68] sm:$0xf0]  ;;  %v3355_v51 = vld [vmem:[%s3892_s22 + $0x64] sm:$0xf] }
  0x4d   : > { %v826_v9 = vmul.f32 128.0, %v3527_v8  ;;  %vm830_vm0 = vweird.f32 %v3527_v8  ;;  %1054 = vmatpush.bf16.msra.mxu1 %v3008_v38  ;;  %v2980_v52 = vor.u32 %v3356_v50, %v2979_v49  ;;  %v2981_v53 = vld [vmem:[%s3892_s22 + $0x6c] sm:$0xf0]  ;;  %v2987_v54 = vld [vmem:[%s3892_s22 + $0x68] sm:$0xf]  ;;  %s4584_s2 = smov 96  }
  0x4e   : > { %1068 = vmatpush.bf16.msra.mxu2 %v3012_v39  ;;  %v3357_v55 = vld [vmem:[%s3892_s22 + $0x70] sm:$0xf0]  ;;  %v2984_v56 = vor.u32 %v3355_v51, %v2981_v53  ;;  %v2967_v58 = vld [vmem:[%s3892_s22 + $0x48] sm:$0xf]  ;;  %v3352_v60 = vld [vmem:[%s3892_s22 + $0x4c] sm:$0xf] }
  0x4f   : > { %v827_v10 = vsub.f32 1.0, %v826_v9  ;;  %v2988_v57 = vor.u32 %v3357_v55, %v2987_v54  ;;  %v3353_v59 = vld [vmem:[%s3892_s22 + $0x50] sm:$0xf0]  ;;  %v2969_v62 = vld [vmem:[%s3892_s22 + $0x54] sm:$0xf0]  ;;  %vm1349_vm8 = vcmask 1043456  }
  0x50   : > { %1041 = vmatpush.bf16.msra.mxu0 %v2992_v43  ;;  %v2968_v61 = vor.u32 %v3353_v59, %v2967_v58  ;;  %v2975_v63 = vld [vmem:[%s3892_s22 + $0x50] sm:$0xf]  ;;  %v3354_v0 = vld [vmem:[%s3892_s22 + $0x58] sm:$0xf0]  ;;  %v2972_v1 = vor.u32 %v3352_v60, %v2969_v62  ;;  %v2957_v7 = vld [vmem:[%s3892_s22 + $0x3c] sm:$0xf0] }
  0x51   : > { %v828_v11 = vmul.f32 %v3527_v8, %v827_v10  ;;  %1055 = vmatpush.bf16.msra.mxu1 %v2996_v47  ;;  %v2976_v2 = vor.u32 %v3354_v0, %v2975_v63  ;;  %v2955_v3 = vld [vmem:[%s3892_s22 + $0x30] sm:$0xf]  ;;  %v3350_v4 = vld [vmem:[%s3892_s22 + $0x38] sm:$0xf0]  ;;  %v3351_v9 = vld [vmem:[%s3892_s22 + $0x40] sm:$0xf0] }
  0x52   : > { %1069 = vmatpush.bf16.msra.mxu2 %v3000_v48  ;;  %v2931_v24 = vld [vmem:[%s3892_s22] sm:$0xf]  ;;  %v3344_v25 = vld [vmem:[%s3892_s22 + $0x8] sm:$0xf0]  ;;  %v3343_v26 = vld [vmem:[%s3892_s22 + $0x4] sm:$0xf] }
  0x53   : > { %823 = vadd.xlane.f32.xlu0 %v818_v6  ;;  %v829_v12 = vadd.f32 %v3527_v8, %v828_v11  ;;  %v2932_v28 = vor.u32 %v3344_v25, %v2931_v24  ;;  %v2933_v29 = vld [vmem:[%s3892_s22 + $0xc] sm:$0xf0]  ;;  %v2939_v30 = vld [vmem:[%s3892_s22 + $0x8] sm:$0xf]  ;;  %v3345_v31 = vld [vmem:[%s3892_s22 + $0x10] sm:$0xf0] }
  0x54   : > { %1042 = vmatpush.bf16.msra.mxu0 %v2980_v52  ;;  %v2936_v33 = vor.u32 %v3343_v26, %v2933_v29  ;;  %v2940_v34 = vor.u32 %v3345_v31, %v2939_v30  ;;  %s4588_s24 = smov 32   ;;  %vm1104_vm9 = vcmask 64512   ;;  %s4080_s26 = sshll.u32 %s3695_s27, 9  ;;  %vm1402_vm13 = vcmask 523520  }
  0x55   : > { %v3933_v13 = vsel %vm830_vm0, %v3527_v8, %v829_v12  ;;  %1056 = vmatpush.bf16.msra.mxu1 %v2984_v56  ;;  %v2963_v8 = vld [vmem:[%s3892_s22 + $0x38] sm:$0xf]  ;;  %s4592_s28 = sadd.s32 1, %s4080_s26  ;;  %s4085_s18 = sld [smem:[#allocation4 + %s4080_s26]]  ;;  %vm1438_vm14 = vcmask 785920  }
  0x56   : > { %1070 = vmatpush.bf16.msra.mxu2 %v2988_v57  ;;  %v2964_v11 = vor.u32 %v3351_v9, %v2963_v8  ;;  %v2943_v12 = vld [vmem:[%s3892_s22 + $0x18] sm:$0xf]  ;;  %v3521_v57 = vld [vmem:[%s4648_s23] ss:$0 sm:$0xff]  ;;  %s4590_s4 = sadd.s32 2, %s4080_s26  ;;  %s4591_s29 = sadd.s32 3, %s4080_s26 }
  0x57   : > { %s4098_s25 = sld [smem:[#allocation4 + %s4590_s4]] }
  0x58   : > { %1043 = vmatpush.bf16.msra.mxu0 %v2968_v61  ;;  %s4102_s7 = sld [smem:[#allocation4 + %s4591_s29]]  ;;  %s4118_s29 = sadd.s32 384, %s4080_s26 }
  0x59   : > { %1057 = vmatpush.bf16.msra.mxu1 %v2972_v1  ;;  %s4130_s12 = sld [smem:[#allocation4 + %s4118_s29]] }
  0x5a   : > { %1071 = vmatpush.bf16.msra.mxu2 %v2976_v2 }
  0x5e   : > { %1072 = vmatpush.bf16.msra.mxu2 %v2964_v11 }
  0xbe   : > { %v822_v14 = vpop.xlane.xlu0 %821 }
  0xbf   : > { %v832_v15 = vmul.f32 %v3933_v13, %v822_v14  ;;  %v3347_v14 = vld [vmem:[%s3892_s22 + $0x20] sm:$0xf0] }
  0xc1   : > { %v3936_v16 = vsub.f32 %v817_v5, %v832_v15  ;;  %v3349_v5 = vld [vmem:[%s3892_s22 + $0x34] sm:$0xf]  ;;  %v3346_v15 = vld [vmem:[%s3892_s22 + $0x1c] sm:$0xf] }
  0xc2   : > { %v2960_v10 = vor.u32 %v3349_v5, %v2957_v7 }
  0xc3   : > { %v836_v17 = vmul.f32 %v3936_v16, %v3936_v16 }
  0xc4   : > { %1058 = vmatpush.bf16.msra.mxu1 %v2960_v10 }
  0xc5   : > { %838 = vadd.xlane.f32.xlu1 %v836_v17  ;;  %v2944_v17 = vor.u32 %v3347_v14, %v2943_v12 }
  0xc6   : > { %v824_v18 = vpop.xlane.xlu0 %823 }
  0xc7   : > { %v833_v19 = vmul.f32 %v3933_v13, %v824_v18  ;;  %v2945_v18 = vld [vmem:[%s3892_s22 + $0x24] sm:$0xf0] }
  0xc8   : > { %v2948_v22 = vor.u32 %v3346_v15, %v2945_v18 }
  0xc9   : > { %v3941_v20 = vsub.f32 %v818_v6, %v833_v19  ;;  %v2956_v6 = vor.u32 %v3350_v4, %v2955_v3  ;;  %v2951_v19 = vld [vmem:[%s3892_s22 + $0x20] sm:$0xf] }
  0xca   : > { %1059 = vmatpush.bf16.msra.mxu1 %v2948_v22 }
  0xcb   : > { %v837_v21 = vmul.f32 %v3941_v20, %v3941_v20  ;;  %1044 = vmatpush.bf16.msra.mxu0 %v2956_v6 }
  0xcd   : > { %840 = vadd.xlane.f32.xlu1 %v837_v21  ;;  %v3348_v21 = vld [vmem:[%s3892_s22 + $0x28] sm:$0xf0]  ;;  %s4645_s22 = sld [smem:[#allocation22_spill]] }
  0xce   : > { %v2952_v23 = vor.u32 %v3348_v21, %v2951_v19  ;;  %1060 = vmatpush.bf16.msra.mxu1 %v2936_v33 }
  0xcf   : > { %1045 = vmatpush.bf16.msra.mxu0 %v2944_v17 }
  0xd0   : > { %1073 = vmatpush.bf16.msra.mxu2 %v2952_v23 }
  0xd3   : > { %1046 = vmatpush.bf16.msra.mxu0 %v2932_v28  ;;  %s4646_s20 = scalar_lea.vmem %s4645_s22, %s3868_s6  ;;  %s4090_s22 = sadd.s32 128, %s4080_s26 }
  0xd4   : > { %1074 = vmatpush.bf16.msra.mxu2 %v2940_v34  ;;  %v3520_v52 = vld [vmem:[%s4646_s20] ss:$0 sm:$0xff]  ;;  %s4094_s20 = sld [smem:[#allocation4 + %s4592_s28]]  ;;  %s4594_s23 = sadd.s32 1, %s4090_s22 }
  0xd5   : > { %s4106_s21 = sld [smem:[#allocation4 + %s4090_s22]] }
  0xd6   : > { %s4115_s4 = sld [smem:[#allocation4 + %s4594_s23]] }
 0x138   : > { %v839_v27 = vpop.xlane.xlu1 %838 }
 0x139   : > { %v842_v32 = vmul.f32 %v839_v27, %v3933_v13 }
 0x13b   : > { %v844_v35 = vadd.f32 1e-05, %v842_v32 }
 0x13d   : > { %3528 = vrsqrt.f32 %v844_v35  ;;  %vm852_vm2 = vweird.f32 %v844_v35 }
 0x140   : > { %v841_v36 = vpop.xlane.xlu1 %840 }
 0x141   : > { %v843_v37 = vmul.f32 %v841_v36, %v3933_v13 }
 0x143   : > { %v3529_v38 = vpop.eup %3528  ;;  %v845_v39 = vadd.f32 1e-05, %v843_v37 }
 0x144   : > { %v847_v40 = vmul.f32 %v3529_v38, %v844_v35  ;;  %vm853_vm1 = vweird.f32 %v3529_v38 }
 0x145   : > { %3530 = vrsqrt.f32 %v845_v39  ;;  %vm854_vm3 = vmor %vm852_vm2, %vm853_vm1  ;;  %vm862_vm5 = vweird.f32 %v845_v39  ;;  %vm1474_vm2 = vcmask 1048320  }
 0x146   : > { %v848_v41 = vmul.f32 %v3529_v38, %v847_v40 }
 0x148   : > { %v849_v42 = vmul.f32 0.5, %v848_v41 }
 0x14a   : > { %v850_v43 = vsub.f32 1.5, %v849_v42 }
 0x14b   : > { %v3531_v44 = vpop.eup %3530 }
 0x14c   : > { %v851_v45 = vmul.f32 %v3529_v38, %v850_v43  ;;  %v857_v46 = vmul.f32 %v3531_v44, %v845_v39  ;;  %vm863_vm4 = vweird.f32 %v3531_v44 }
 0x14d   : > { %vm864_vm6 = vmor %vm862_vm5, %vm863_vm4 }
 0x14e   : > { %v858_v47 = vmul.f32 %v3531_v44, %v857_v46  ;;  %v855_v48 = vsel %vm854_vm3, %v3529_v38, %v851_v45 }
 0x14f   : > { %v866_v51 = vmul.f32 %v855_v48, %v3936_v16 }
 0x150   : > { %v859_v49 = vmul.f32 0.5, %v858_v47 }
 0x151   : > { %v871_v56 = vmul.f32 %v3520_v52, %v866_v51 }
 0x152   : > { %v860_v50 = vsub.f32 1.5, %v859_v49 }
 0x153   : > { %v876_v59 = vadd.f32 %v3521_v57, %v871_v56 }
 0x154   : > { %v861_v53 = vmul.f32 %v3531_v44, %v860_v50 }
 0x156   : > { %v865_v54 = vsel %vm864_vm6, %v3531_v44, %v861_v53 }
 0x157   : > { %v867_v55 = vmul.f32 %v865_v54, %v3941_v20 }
 0x159   : > { %v872_v58 = vmul.f32 %v3520_v52, %v867_v55 }
 0x15b   : > { %v877_v16 = vadd.f32 %v3521_v57, %v872_v58 }
 0x15d   : > { %v878_v60 = vpack.c.bf16 %v877_v16, %v876_v59 }
 0x15f   : > { %1047 = vmatmul.bf16.vlgmr.msra.gmra.mxu0 %v878_v60  ;;  %1061 = vmatmul.bf16.vlgmr.msra.gmra.mxu1 %v878_v60 }
 0x160   : > { %1075 = vmatmul.bf16.vlgmr.msra.gmra.mxu2 %v878_v60 }
 0x1dc   : > { %v1048_v61 = vpop.f32.mrf.mxu0  ;;  %v1062_v62 = vpop.f32.mrf.mxu1 }
 0x1dd   : > { %v1081_v63 = vpack.c.bf16 %v1048_v61, %v1048_v61  ;;  %v1082_v0 = vpack.c.bf16 %v1062_v62, %v1062_v62 }
 0x1df   : > { %1156 = vrot.lane.b32.xlu0 %v1082_v0, %s4586_s19  ;;  %1121 = vrot.lane.b32.xlu2 %v1082_v0, %s4584_s2  ;;  %v1088_v20 = vsel %vm1083_vm7, %v1082_v0, 0 }
 0x1e0   : > { %1154 = vrot.lane.b32.xlu1 %v1081_v63, %s4586_s19  ;;  %1097 = vmatpush.bf16.xpose.msra.mxu3 %v1088_v20 }
 0x1e3   : > { %v1076_v1 = vpop.f32.mrf.mxu2 }
 0x1e4   : > { %v4011_v2 = vpack.c.bf16 %v1076_v1, %v1076_v1  ;;  %v1064_v3 = vpop.f32.mrf.mxu1  ;;  %v1050_v7 = vpop.f32.mrf.mxu0 }
 0x1e5   : > { %v4013_v4 = vpack.c.bf16 %v1064_v3, %v1064_v3  ;;  %v4023_v10 = vpack.c.bf16 %v1050_v7, %v1050_v7 }
 0x1e6   : > { %v1351_v5 = vsel %vm1349_vm8, %v4011_v2, 0 }
 0x1e7   : > { %1360 = vmatpush.bf16.msrb.mxu2 %v1351_v5  ;;  %1118 = vrot.lane.b32.xlu2 %v1081_v63, %s4584_s2  ;;  %v1482_v6 = vsel %vm1083_vm7, %v4013_v4, 0 }
 0x1e8   : > { %3025 = vmatmul.msk.bf16.vlgmr.msra.gmra.mxu3 %vm1083_vm7, %v1081_v63  ;;  %1491 = vmatpush.bf16.xpose.msrb.mxu1 %v1482_v6 }
 0x1eb   : > { %v1078_v8 = vpop.f32.mrf.mxu2 }
 0x1ec   : > { %v4021_v9 = vpack.c.bf16 %v1078_v8, %v1078_v8  ;;  %v1227_v8 = vstv %s4085_s18 }
 0x1ee   : > { %v1722_v11 = vsel %vm1349_vm8, %v4021_v9, 0 }
 0x1ef   : > { %1191 = vrot.lane.b32.xlu2 %v1082_v0, %s4588_s24  ;;  %3039 = vmatmul.msk.bf16.vlgmr.msrb.gmra.mxu1 %vm1083_vm7, %v4023_v10 }
 0x1f0   : > { %1731 = vmatpush.bf16.msra.mxu1 %v1722_v11  ;;  %v1250_v11 = vstv %s4094_s20 }
 0x1f7   : > { %1189 = vrot.lane.b32.xlu2 %v1081_v63, %s4588_s24 }
 0x239   : > { %v1122_v12 = vpop.permute.xlu2 %1121 }
 0x23a   : > { %v1127_v14 = vsel %vm1083_vm7, %v1122_v12, 0  ;;  %v1255_v12 = vstv %s4115_s4 }
 0x23b   : > { %1136 = vmatpush.bf16.xpose.msrb.mxu3 %v1127_v14 }
 0x241   : > { %v1119_v15 = vpop.permute.xlu2 %1118 }
 0x242   : > { %3026 = vmatmul.msk.bf16.vlgmr.msrb.gmra.mxu3 %vm1083_vm7, %v1119_v15 }
 0x249   : > { %v1192_v17 = vpop.permute.xlu2 %1191 }
 0x24a   : > { %v1197_v18 = vsel %vm1083_vm7, %v1192_v17, 0  ;;  %v1270_v17 = vstv %s4098_s25 }
 0x24b   : > { %1206 = vmatpush.bf16.xpose.msrb.mxu0 %v1197_v18  ;;  %v1290_v18 = vstv %s4102_s7  ;;  %s4649_s7 = smov 32  }
 0x251   : > { %v1157_v19 = vpop.permute.xlu0 %1156  ;;  %v1190_v21 = vpop.permute.xlu2 %1189 }
 0x252   : > { %v1162_v22 = vsel %vm1083_vm7, %v1157_v19, 0  ;;  %3028 = vmatmul.msk.bf16.vlgmr.msrb.gmra.mxu0 %vm1083_vm7, %v1190_v21  ;;  %v1155_v23 = vpop.permute.xlu1 %1154 }
 0x253   : > { %1171 = vmatpush.bf16.xpose.msra.mxu3 %v1162_v22 }
 0x25a   : > { %3027 = vmatmul.msk.bf16.vlgmr.msra.gmra.mxu3 %vm1083_vm7, %v1155_v23 }
 0x26b   : > { %v1099_v24 = vpop.f32.mrf.mxu3 }
 0x26c   : > { %v1103_v25 = vmul.f32 0.17677669, %v1099_v24  ;;  %v1493_v26 = vpop.f32.mrf.mxu1 }
 0x26d   : > { %v4075_v61 = vmul.f32 0.17677669, %v1493_v26 }
 0x26e   : > { %v1105_v27 = vsel %vm1104_vm9, %v1103_v25, -inf }
 0x26f   : > { %1106 = vmax.xlane.f32.xlu2 %v1105_v27  ;;  %v1498_v62 = vsel %vm1104_vm9, %v4075_v61, -inf }
 0x273   : > { %v1101_v28 = vpop.f32.mrf.mxu3 }
 0x274   : > { %v1495_v29 = vpop.f32.mrf.mxu1 }
 0x2c5   : > { %v1138_v30 = vpop.f32.mrf.mxu3 }
 0x2c6   : > { %v1142_v31 = vmul.f32 0.17677669, %v1138_v30 }
 0x2c8   : > { %v1143_v32 = vsel %vm1104_vm9, %v1142_v31, -inf }
 0x2c9   : > { %1144 = vmax.xlane.f32.xlu0 %v1143_v32 }
 0x2cd   : > { %v1140_v33 = vpop.f32.mrf.mxu3 }
 0x2cf   : > { %v1208_v34 = vpop.f32.mrf.mxu0 }
 0x2d0   : > { %v1212_v35 = vmul.f32 0.17677669, %v1208_v34 }
 0x2d2   : > { %v1213_v36 = vsel %vm1104_vm9, %v1212_v35, -inf }
 0x2d3   : > { %1214 = vmax.xlane.f32.xlu2 %v1213_v36 }
 0x2d7   : > { %v1210_v37 = vpop.f32.mrf.mxu0 }
 0x2dd   : > { %v1173_v38 = vpop.f32.mrf.mxu3 }
 0x2de   : > { %v1177_v39 = vmul.f32 0.17677669, %v1173_v38  ;;  %v1245_v38 = vstv %s4130_s12  ;;  %s4189_s12 = sshll.u32 %s3695_s27, 7 }
 0x2df   : > { %s4204_s4 = sadd.s32 1, %s4189_s12 }
 0x2e0   : > { %v1178_v40 = vsel %vm1104_vm9, %v1177_v39, -inf  ;;  %s1369_s20 = sld [smem:[#allocation7 + %s4204_s4]] }
 0x2e1   : > { %1179 = vmax.xlane.f32.xlu1 %v1178_v40  ;;  %s1372_s25 = sld [smem:[#allocation9 + %s4204_s4]] }
 0x2e2   : > { %v1107_v41 = vpop.xlane.xlu2 %1106 }
 0x2e3   : > { %v1108_v42 = vsub.f32 %v1103_v25, %v1107_v41 }
 0x2e5   : > { %v1109_v43 = vmul.f32 1.442695, %v1108_v42  ;;  %v1175_v44 = vpop.f32.mrf.mxu3 }
 0x2e7   : > { %3532 = vpow2.f32 %v1109_v43 }
 0x2ed   : > { %v4041_v45 = vpop.eup %3532 }
 0x2ee   : > { %v1111_v46 = vsel %vm1104_vm9, %v4041_v45, 0.0 }
 0x2ef   : > { %1112 = vadd.xlane.f32.xlu0 %v1111_v46 }
 0x33c   : > { %v1145_v47 = vpop.xlane.xlu0 %1144 }
 0x33d   : > { %v1146_v48 = vsub.f32 %v1142_v31, %v1145_v47 }
 0x33f   : > { %v1147_v49 = vmul.f32 1.442695, %v1146_v48 }
 0x341   : > { %3534 = vpow2.f32 %v1147_v49 }
 0x346   : > { %v1215_v50 = vpop.xlane.xlu2 %1214 }
 0x347   : > { %v4045_v51 = vpop.eup %3534  ;;  %v1216_v52 = vsub.f32 %v1212_v35, %v1215_v50 }
 0x348   : > { %v1149_v53 = vsel %vm1104_vm9, %v4045_v51, 0.0 }
 0x349   : > { %v1217_v54 = vmul.f32 1.442695, %v1216_v52  ;;  %1150 = vadd.xlane.f32.xlu2 %v1149_v53 }
 0x34b   : > { %3536 = vpow2.f32 %v1217_v54 }
 0x351   : > { %v4049_v55 = vpop.eup %3536 }
 0x352   : > { %v1219_v56 = vsel %vm1104_vm9, %v4049_v55, 0.0 }
 0x353   : > { %1220 = vadd.xlane.f32.xlu0 %v1219_v56 }
 0x354   : > { %v1180_v57 = vpop.xlane.xlu1 %1179 }
 0x355   : > { %v1181_v58 = vsub.f32 %v1177_v39, %v1180_v57 }
 0x357   : > { %v1182_v59 = vmul.f32 1.442695, %v1181_v58 }
 0x359   : > { %3538 = vpow2.f32 %v1182_v59 }
 0x35f   : > { %v4053_v16 = vpop.eup %3538 }
 0x360   : > { %v1184_v60 = vsel %vm1104_vm9, %v4053_v16, 0.0 }
 0x361   : > { %1185 = vadd.xlane.f32.xlu1 %v1184_v60  ;;  %1377 = vrot.lane.b32.xlu2 %v4011_v2, %s4584_s2 }
 0x362   : > { %v1113_v1 = vpop.xlane.xlu0 %1112 }
 0x363   : > { %3540 = vrcp.f32 %v1113_v1 }
 0x367   : > { %1449 = vrot.lane.b32.xlu0 %v4011_v2, %s4588_s24 }
 0x369   : > { %1514 = vrot.lane.b32.xlu2 %v4013_v4, %s4584_s2  ;;  %v3541_v3 = vpop.eup %3540 }
 0x36a   : > { %v1115_v6 = vmul.f32 %v3541_v3, %v4041_v45 }
 0x36c   : > { %v1228_v19 = vmul.f32 %v1227_v8, %v1115_v6  ;;  %v1251_v23 = vmul.f32 %v1250_v11, %v1115_v6  ;;  %v1271_v32 = vmul.f32 %v1270_v17, %v1115_v6  ;;  %v1291_v44 = vmul.f32 %v1290_v18, %v1115_v6 }
 0x36f   : > { %1549 = vrot.lane.b32.xlu0 %v4013_v4, %s4586_s19 }
 0x371   : > { %1547 = vrot.lane.b32.xlu2 %v4023_v10, %s4586_s19 }
 0x377   : > { %1584 = vrot.lane.b32.xlu0 %v4013_v4, %s4588_s24 }
 0x37a   : > { %1413 = vrot.lane.b32.xlu1 %v4011_v2, %s4586_s19  ;;  %s4596_s19 = sadd.s32 3, %s4090_s22 }
 0x37b   : > { %s4126_s0 = sld [smem:[#allocation4 + %s4596_s19]] }
 0x381   : > { %v1295_v24 = vstv %s4126_s0  ;;  %s1342_s0 = sld [smem:[#allocation9 + %s4189_s12]] }
 0x382   : > { %1511 = vrot.lane.b32.xlu1 %v4023_v10, %s4584_s2  ;;  %s4595_s2 = sadd.s32 2, %s4090_s22 }
 0x383   : > { %s4122_s28 = sld [smem:[#allocation4 + %s4595_s2]]  ;;  %s1263_s2 = sadd.s32 1, %s4118_s29 }
 0x384   : > { %s4154_s15 = sld [smem:[#allocation4 + %s1263_s2]] }
 0x389   : > { %v1275_v14 = vstv %s4122_s28 }
 0x38a   : > { %1582 = vrot.lane.b32.xlu1 %v4023_v10, %s4588_s24  ;;  %s4111_s24 = sadd.s32 256, %s4080_s26  ;;  %v1233_v10 = vstv %s4106_s21  ;;  %v1265_v39 = vstv %s4154_s15  ;;  %s1339_s15 = sld [smem:[#allocation7 + %s4189_s12]] }
 0x38b   : > { %s4597_s3 = sadd.s32 1, %s4111_s24  ;;  %s4598_s13 = sadd.s32 2, %s4111_s24 }
 0x38c   : > { %s4134_s23 = sld [smem:[#allocation4 + %s4111_s24]]  ;;  %s4599_s14 = sadd.s32 3, %s4111_s24 }
 0x38d   : > { %s4140_s19 = sld [smem:[#allocation4 + %s4597_s3]]  ;;  %s4601_s3 = sadd.s32 2, %s4118_s29 }
 0x38e   : > { %s4144_s17 = sld [smem:[#allocation4 + %s4598_s13]]  ;;  %s4600_s13 = sadd.s32 3, %s4118_s29 }
 0x38f   : > { %s4148_s16 = sld [smem:[#allocation4 + %s4599_s14]]  ;;  %s4659_s1 = sadd.s32 2, %s4111_s24 }
 0x390   : > { %s4165_s14 = sld [smem:[#allocation4 + %s4601_s3]] }
 0x391   : > { %s4172_s21 = sld [smem:[#allocation4 + %s4600_s13]] }
 0x392   : > { %v1239_v29 = vstv %s4134_s23  ;;  %s4650_s23 = smov 64   ;;  %s4258_s13 = sld [smem:[#allocation4 + %s1263_s2]] }
 0x393   : > { %v1260_v30 = vstv %s4140_s19  ;;  %s4657_s2 = sadd.s32 2, %s4090_s22 }
 0x394   : > { %v1280_v31 = vstv %s4144_s17  ;;  %s4277_s5 = sld [smem:[#allocation4 + %s4657_s2]]  ;;  %s4660_s2 = sadd.s32 3, %s4111_s24 }
 0x395   : > { %v1300_v34 = vstv %s4148_s16  ;;  %s4196_s16 = sadd.s32 3, %s4189_s12  ;;  %s4291_s10 = sld [smem:[#allocation4 + %s4660_s2]] }
 0x396   : > { %v1285_v47 = vstv %s4165_s14  ;;  %s4192_s14 = sadd.s32 2, %s4189_s12  ;;  %s1442_s19 = sld [smem:[#allocation7 + %s4196_s16]] }
 0x397   : > { %s1406_s17 = sld [smem:[#allocation7 + %s4192_s14]] }
 0x398   : > { %s1409_s28 = sld [smem:[#allocation9 + %s4192_s14]] }
 0x399   : > { %s1445_s18 = sld [smem:[#allocation9 + %s4196_s16]] }
 0x39a   : > { %1499 = vmax.xlane.f32.xlu2 %v1498_v62 }
 0x3bc   : > { %v1151_v63 = vpop.xlane.xlu2 %1150 }
 0x3bd   : > { %3542 = vrcp.f32 %v1151_v63 }
 0x3c3   : > { %v3543_v4 = vpop.eup %3542 }
 0x3c4   : > { %v1378_v0 = vpop.permute.xlu2 %1377  ;;  %v1153_v7 = vmul.f32 %v3543_v4, %v4045_v51 }
 0x3c5   : > { %v1383_v20 = vsel %vm1349_vm8, %v1378_v0, 0 }
 0x3c6   : > { %1392 = vmatpush.bf16.msra.mxu2 %v1383_v20  ;;  %v1221_v2 = vpop.xlane.xlu0 %1220  ;;  %v1234_v21 = vmul.f32 %v1233_v10, %v1153_v7  ;;  %v1256_v25 = vmul.f32 %v1255_v12, %v1153_v7  ;;  %v1276_v28 = vmul.f32 %v1275_v14, %v1153_v7  ;;  %v1296_v37 = vmul.f32 %v1295_v24, %v1153_v7 }
 0x3c7   : > { %3544 = vrcp.f32 %v1221_v2 }
 0x3c8   : > { %v1235_v36 = vadd.f32 %v1234_v21, %v1228_v19  ;;  %v1257_v40 = vadd.f32 %v1256_v25, %v1251_v23  ;;  %v1277_v45 = vadd.f32 %v1276_v28, %v1271_v32  ;;  %v1297_v51 = vadd.f32 %v1296_v37, %v1291_v44 }
 0x3c9   : > { %v1407_v32 = vstv %s1406_s17  ;;  %v1343_v37 = vstv %s1342_s0  ;;  %s4652_s17 = sadd.s32 1, %s4080_s26 }
 0x3ca   : > { %s4243_s0 = sld [smem:[#allocation4 + %s4652_s17]] }
 0x3cb   : > { %s4262_s17 = sld [smem:[#allocation4 + %s4111_s24]] }
 0x3cd   : > { %v3545_v15 = vpop.eup %3544 }
 0x3ce   : > { %v1223_v33 = vmul.f32 %v3545_v15, %v4049_v55  ;;  %v1305_v55 = vstv %s4172_s21  ;;  %s4651_s21 = smov 96  }
 0x3d0   : > { %v1266_v48 = vmul.f32 %v1265_v39, %v1223_v33  ;;  %v1246_v52 = vmul.f32 %v1245_v38, %v1223_v33  ;;  %v1286_v57 = vmul.f32 %v1285_v47, %v1223_v33  ;;  %v1410_v38 = vstv %s1409_s28 }
 0x3d1   : > { %v1446_v39 = vstv %s1445_s18  ;;  %s4654_s18 = sadd.s32 3, %s4080_s26 }
 0x3d4   : > { %v1186_v5 = vpop.xlane.xlu1 %1185 }
 0x3d5   : > { %3546 = vrcp.f32 %v1186_v5 }
 0x3d9   : > { %v1450_v22 = vpop.permute.xlu0 %1449 }
 0x3da   : > { %v1455_v26 = vsel %vm1349_vm8, %v1450_v22, 0 }
 0x3db   : > { %v3547_v27 = vpop.eup %3546  ;;  %1464 = vmatpush.bf16.msra.mxu0 %v1455_v26 }
 0x3dc   : > { %v1188_v35 = vmul.f32 %v3547_v27, %v4053_v16  ;;  %v1306_v16 = vmul.f32 %v1305_v55, %v1223_v33  ;;  %v1443_v33 = vstv %s1442_s19  ;;  %v1373_v55 = vstv %s1372_s25  ;;  %s4653_s19 = sadd.s32 2, %s4080_s26  ;;  %s4254_s25 = sld [smem:[#allocation4 + %s4118_s29]] }
 0x3dd   : > { %s4247_s28 = sld [smem:[#allocation4 + %s4653_s19]]  ;;  %s4655_s19 = sadd.s32 1, %s4111_s24 }
 0x3de   : > { %v1240_v41 = vmul.f32 %v1239_v29, %v1188_v35  ;;  %v1261_v42 = vmul.f32 %v1260_v30, %v1188_v35  ;;  %v1281_v43 = vmul.f32 %v1280_v31, %v1188_v35  ;;  %v1301_v46 = vmul.f32 %v1300_v34, %v1188_v35  ;;  %s4266_s3 = sld [smem:[#allocation4 + %s4655_s19]]  ;;  %s4658_s19 = sadd.s32 3, %s4090_s22 }
 0x3df   : > { %v1340_v31 = vstv %s1339_s15  ;;  %s4239_s15 = sld [smem:[#allocation4 + %s4080_s26]]  ;;  %s4662_s24 = sadd.s32 3, %s4118_s29 }
 0x3e0   : > { %v1241_v49 = vadd.f32 %v1240_v41, %v1235_v36  ;;  %v1262_v50 = vadd.f32 %v1261_v42, %v1257_v40  ;;  %v1282_v53 = vadd.f32 %v1281_v43, %v1277_v45  ;;  %v1302_v58 = vadd.f32 %v1301_v46, %v1297_v51  ;;  %v1515_v46 = vpop.permute.xlu2 %1514  ;;  %s4269_s26 = sld [smem:[#allocation4 + %s4090_s22]] }
 0x3e1   : > { %v1550_v54 = vpop.permute.xlu0 %1549  ;;  %s4282_s11 = sld [smem:[#allocation4 + %s4658_s19]] }
 0x3e2   : > { %v1267_v56 = vadd.f32 %v1266_v48, %v1262_v50  ;;  %v1247_v59 = vadd.f32 %v1246_v52, %v1241_v49  ;;  %v1287_v60 = vadd.f32 %v1286_v57, %v1282_v53  ;;  %v1307_v63 = vadd.f32 %v1306_v16, %v1302_v58 }
 0x3e3   : > { %v1555_v10 = vsel %vm1083_vm7, %v1550_v54, 0  ;;  %v1520_v50 = vsel %vm1083_vm7, %v1515_v46, 0  ;;  %v1370_v52 = vstv %s1369_s20  ;;  %s4251_s20 = sld [smem:[#allocation4 + %s4654_s18]]  ;;  %s4656_s18 = sadd.s32 1, %s4090_s22 }
 0x3e4   : > { %v1309_v62 = vadd.f32 %v1267_v56, %v1247_v59  ;;  %s4273_s27 = sld [smem:[#allocation4 + %s4656_s18]] }
 0x3e5   : > { %s4286_s18 = sld [smem:[#allocation4 + %s4659_s1]]  ;;  %s4661_s1 = sadd.s32 2, %s4118_s29 }
 0x3e6   : > { %v1310_v0 = vadd.f32 %v1309_v62, %v1287_v60  ;;  %s4298_s22 = sld [smem:[#allocation4 + %s4661_s1]] }
 0x3e7   : > { %s1777_s29 = sld [smem:[#allocation9 + %s4192_s14]] }
 0x3e8   : > { %v1311_v1 = vadd.f32 %v1310_v0, %v1307_v63  ;;  %v1548_v58 = vpop.permute.xlu2 %1547  ;;  %s4672_s1 = sld [smem:[#allocation14_spill]] }
 0x3e9   : > { %v1585_v20 = vpop.permute.xlu0 %1584 }
 0x3ea   : > { %v1590_v2 = vsel %vm1083_vm7, %v1585_v20, 0  ;;  %v1312_v3 = vmul.f32 0.25, %v1311_v1 }
 0x3eb   : > { %1599 = vmatpush.bf16.xpose.msrb.mxu0 %v1590_v2 }
 0x3ec   : > { %v1414_v4 = vpop.permute.xlu1 %1413  ;;  %v1313_v6 = vsub.f32 %v1247_v59, %v1312_v3  ;;  %v1316_v7 = vsub.f32 %v1267_v56, %v1312_v3  ;;  %v1319_v8 = vsub.f32 %v1287_v60, %v1312_v3  ;;  %v1322_v14 = vsub.f32 %v1307_v63, %v1312_v3 }
 0x3ed   : > { %v1419_v5 = vsel %vm1349_vm8, %v1414_v4, 0 }
 0x3ee   : > { %1428 = vmatpush.bf16.msrb.mxu3 %v1419_v5  ;;  %v1314_v11 = vmul.f32 %v1313_v6, %v1313_v6  ;;  %v1317_v12 = vmul.f32 %v1316_v7, %v1316_v7  ;;  %v1320_v17 = vmul.f32 %v1319_v8, %v1319_v8  ;;  %v1323_v19 = vmul.f32 %v1322_v14, %v1322_v14  ;;  %p3335_p9 = scmp.ne.s32.totalorder %s4672_s1, 1 }
 0x3f0   : > { %v1318_v15 = vadd.f32 %v1317_v12, %v1314_v11 }
 0x3f2   : > { %1564 = vmatpush.bf16.xpose.msra.mxu3 %v1555_v10  ;;  %v1321_v18 = vadd.f32 %v1320_v17, %v1318_v15 }
 0x3f4   : > { %v1324_v21 = vadd.f32 %v1323_v19, %v1321_v18  ;;  %v1512_v53 = vpop.permute.xlu1 %1511 }
 0x3f6   : > { %v1325_v22 = vmul.f32 0.25, %v1324_v21 }
 0x3f8   : > { %v1326_v23 = vadd.f32 1e-05, %v1325_v22 }
 0x3fa   : > { %3548 = vrsqrt.f32 %v1326_v23  ;;  %vm1333_vm11 = vweird.f32 %v1326_v23 }
 0x3fc   : > { %v1583_v59 = vpop.permute.xlu1 %1582 }
 0x400   : > { %v3549_v24 = vpop.eup %3548 }
 0x401   : > { %v1328_v25 = vmul.f32 %v3549_v24, %v1326_v23  ;;  %vm1334_vm10 = vweird.f32 %v3549_v24 }
 0x402   : > { %vm1335_vm12 = vmor %vm1333_vm11, %vm1334_vm10 }
 0x403   : > { %v1329_v26 = vmul.f32 %v3549_v24, %v1328_v25 }
 0x405   : > { %v1330_v27 = vmul.f32 0.5, %v1329_v26 }
 0x407   : > { %v1331_v28 = vsub.f32 1.5, %v1330_v27 }
 0x409   : > { %v1332_v29 = vmul.f32 %v3549_v24, %v1331_v28 }
 0x40b   : > { %v1336_v30 = vsel %vm1335_vm12, %v3549_v24, %v1332_v29 }
 0x40c   : > { %v1337_v34 = vmul.f32 %v1336_v30, %v1313_v6  ;;  %v1404_v35 = vmul.f32 %v1336_v30, %v1319_v8  ;;  %v1440_v36 = vmul.f32 %v1336_v30, %v1322_v14  ;;  %v1367_v51 = vmul.f32 %v1336_v30, %v1316_v7 }
 0x40d   : > { %v1500_v10 = vpop.xlane.xlu2 %1499 }
 0x40e   : > { %v1341_v40 = vmul.f32 %v1340_v31, %v1337_v34  ;;  %v1408_v41 = vmul.f32 %v1407_v32, %v1404_v35  ;;  %v1444_v42 = vmul.f32 %v1443_v33, %v1440_v36  ;;  %v1371_v54 = vmul.f32 %v1370_v52, %v1367_v51 }
 0x40f   : > { %v1501_v14 = vsub.f32 %v4075_v61, %v1500_v10  ;;  %v1666_v51 = vstv %s4251_s20  ;;  %s4667_s20 = sld [smem:[#allocation30_spill]] }
 0x410   : > { %v1344_v43 = vadd.f32 %v1343_v37, %v1341_v40  ;;  %v1411_v44 = vadd.f32 %v1410_v38, %v1408_v41  ;;  %v1447_v45 = vadd.f32 %v1446_v39, %v1444_v42  ;;  %v1374_v56 = vadd.f32 %v1373_v55, %v1371_v54 }
 0x411   : > { %v1502_v15 = vmul.f32 1.442695, %v1501_v14  ;;  %v1630_v54 = vstv %s4254_s25  ;;  %v1646_v55 = vstv %s4258_s13  ;;  %s1742_s13 = sld [smem:[#allocation9 + %s4204_s4]] }
 0x412   : > { %v1345_v47 = vpack.c.bf16 %v1344_v43, %v1344_v43  ;;  %v1412_v48 = vpack.c.bf16 %v1411_v44, %v1411_v44  ;;  %v1448_v49 = vpack.c.bf16 %v1447_v45, %v1447_v45  ;;  %v1375_v57 = vpack.c.bf16 %v1374_v56, %v1374_v56 }
 0x413   : > { %3550 = vpow2.f32 %v1502_v15  ;;  %v1622_v56 = vstv %s4269_s26 }
 0x414   : > { %3035 = vmatmul.msk.bf16.vlgmr.msrb.gmra.mxu2 %vm1104_vm9, %v1345_v47  ;;  %3037 = vmatmul.msk.bf16.vlgmr.msrb.gmra.mxu3 %vm1104_vm9, %v1412_v48  ;;  %v1618_v47 = vstv %s4239_s15  ;;  %s4305_s15 = sld [smem:[#allocation4 + %s4662_s24]] }
 0x415   : > { %3038 = vmatmul.msk.bf16.vlgmr.msra.gmra.mxu0 %vm1104_vm9, %v1448_v49  ;;  %1529 = vmatpush.bf16.xpose.msrb.mxu2 %v1520_v50  ;;  %v1634_v49 = vstv %s4243_s0  ;;  %v1650_v50 = vstv %s4247_s28  ;;  %s1811_s0 = sld [smem:[#allocation9 + %s4196_s16]]  ;;  %s4668_s25 = scalar_lea.vmem %s4667_s20, %s3868_s6 }
 0x416   : > { %s4673_s24 = sld [smem:[#allocation35_spill]] (!%p3335_p9) }
 0x419   : > { %v3551_v21 = vpop.eup %3550 }
 0x41a   : > { %v1504_v23 = vsel %vm1104_vm9, %v3551_v21, 0.0 }
 0x424   : > { %3036 = vmatmul.msk.bf16.vlgmr.msra.gmra.mxu2 %vm1104_vm9, %v1375_v57  ;;  %3041 = vmatmul.msk.bf16.vlgmr.msra.gmra.mxu3 %vm1083_vm7, %v1548_v58 }
 0x425   : > { %3042 = vmatmul.msk.bf16.vlgmr.msrb.gmra.mxu0 %vm1083_vm7, %v1583_v59  ;;  %v1638_v59 = vstv %s4273_s27  ;;  %s1774_s27 = sld [smem:[#allocation7 + %s4192_s14]] }
 0x434   : > { %3040 = vmatmul.msk.bf16.vlgmr.msrb.gmra.mxu2 %vm1083_vm7, %v1512_v53 }
 0x492   : > { %v4216_v16 = vpop.f32.mrf.mxu0 }
 0x497   : > { %v1362_v60 = vpop.f32.mrf.mxu2  ;;  %v1430_v62 = vpop.f32.mrf.mxu3 }
 0x498   : > { %1366 = vst.msk [vmem:[#allocation3] sm:$0xff] %vm1083_vm7, %v1362_v60  ;;  %v1654_v60 = vstv %s4277_s5  ;;  %s1808_s5 = sld [smem:[#allocation7 + %s4196_s16]] }
 0x49a   : > { %v1468_v63 = vpop.f32.mrf.mxu0 }
 0x49b   : > { %v1626_v63 = vstv %s4262_s17  ;;  %s4669_s17 = sld [smem:[#allocation18_spill]] }
 0x49f   : > { %v1364_v0 = vpop.f32.mrf.mxu2  ;;  %v1432_v20 = vpop.f32.mrf.mxu3 }
 0x4a0   : > { %v1642_v0 = vstv %s4266_s3  ;;  %v1658_v20 = vstv %s4286_s18  ;;  %s4321_s3 = sld [smem:[#allocation7 + %s4189_s12]] }
 0x4a1   : > { %s4670_s18 = sld [smem:[#allocation34_spill]] }
 0x4a2   : > { %v1601_v1 = vpop.f32.mrf.mxu0 }
 0x4a3   : > { %v1605_v2 = vmul.f32 0.17677669, %v1601_v1 }
 0x4a5   : > { %v1606_v3 = vsel %vm1104_vm9, %v1605_v2, -inf }
 0x4a6   : > { %1607 = vmax.xlane.f32.xlu2 %v1606_v3 }
 0x4a7   : > { %v1394_v4 = vpop.f32.mrf.mxu2  ;;  %v1566_v5 = vpop.f32.mrf.mxu3  ;;  %s4671_s2 = scalar_lea.vmem %s4670_s18, %s3868_s6 }
 0x4a8   : > { %v1570_v6 = vmul.f32 0.17677669, %v1566_v5 }
 0x4aa   : > { %v1603_v7 = vpop.f32.mrf.mxu0  ;;  %v1571_v8 = vsel %vm1104_vm9, %v1570_v6, -inf }
 0x4ab   : > { %1572 = vmax.xlane.f32.xlu1 %v1571_v8 }
 0x4af   : > { %v1396_v11 = vpop.f32.mrf.mxu2  ;;  %v1568_v12 = vpop.f32.mrf.mxu3 }
 0x4b0   : > { %v1674_v11 = vstv %s4291_s10  ;;  %s1739_s10 = sld [smem:[#allocation7 + %s4204_s4]] }
 0x4b1   : > { %s4664_s4 = sld [smem:[#allocation29_spill]] }
 0x4b7   : > { %v1531_v17 = vpop.f32.mrf.mxu2 }
 0x4b8   : > { %v1535_v18 = vmul.f32 0.17677669, %v1531_v17 }
 0x4ba   : > { %v1536_v19 = vsel %vm1104_vm9, %v1535_v18, -inf }
 0x4bb   : > { %1537 = vmax.xlane.f32.xlu0 %v1536_v19 }
 0x4bf   : > { %v1533_v22 = vpop.f32.mrf.mxu2 }
 0x4c0   : > { %v1662_v22 = vstv %s4298_s22 }
 0x4c3   : > { %1505 = vadd.xlane.f32.xlu0 %v1504_v23 }
 0x519   : > { %v1608_v24 = vpop.xlane.xlu2 %1607 }
 0x51a   : > { %v1609_v25 = vsub.f32 %v1605_v2, %v1608_v24 }
 0x51c   : > { %v1610_v26 = vmul.f32 1.442695, %v1609_v25 }
 0x51e   : > { %3552 = vpow2.f32 %v1610_v26  ;;  %v1573_v27 = vpop.xlane.xlu1 %1572 }
 0x51f   : > { %v1574_v28 = vsub.f32 %v1570_v6, %v1573_v27 }
 0x521   : > { %v1575_v29 = vmul.f32 1.442695, %v1574_v28 }
 0x523   : > { %3554 = vpow2.f32 %v1575_v29  ;;  %v1678_v29 = vstv %s4305_s15 }
 0x524   : > { %v4224_v61 = vpop.eup %3552 }
 0x525   : > { %v1612_v30 = vsel %vm1104_vm9, %v4224_v61, 0.0 }
 0x526   : > { %1613 = vadd.xlane.f32.xlu0 %v1612_v30 }
 0x529   : > { %v3555_v31 = vpop.eup %3554 }
 0x52a   : > { %v1577_v32 = vsel %vm1104_vm9, %v3555_v31, 0.0 }
 0x52b   : > { %1578 = vadd.xlane.f32.xlu2 %v1577_v32 }
 0x52e   : > { %v1538_v33 = vpop.xlane.xlu0 %1537 }
 0x52f   : > { %v1539_v34 = vsub.f32 %v1535_v18, %v1538_v33 }
 0x531   : > { %v1540_v35 = vmul.f32 1.442695, %v1539_v34 }
 0x533   : > { %3556 = vpow2.f32 %v1540_v35 }
 0x536   : > { %v1506_v38 = vpop.xlane.xlu0 %1505 }
 0x537   : > { %3558 = vrcp.f32 %v1506_v38 }
 0x539   : > { %v3557_v36 = vpop.eup %3556 }
 0x53a   : > { %1815 = vrot.lane.b32.xlu0 %v4021_v9, %s4649_s7  ;;  %v1542_v37 = vsel %vm1104_vm9, %v3557_v36, 0.0 }
 0x53b   : > { %1543 = vadd.xlane.f32.xlu1 %v1542_v37 }
 0x53d   : > { %v3559_v43 = vpop.eup %3558 }
 0x53e   : > { %v1508_v46 = vmul.f32 %v3559_v43, %v3551_v21 }
 0x540   : > { %v1619_v53 = vmul.f32 %v1618_v47, %v1508_v46  ;;  %v1635_v2 = vmul.f32 %v1634_v49, %v1508_v46  ;;  %v1651_v3 = vmul.f32 %v1650_v50, %v1508_v46 }
 0x543   : > { %1781 = vrot.lane.b32.xlu2 %v4021_v9, %s4650_s23 }
 0x54b   : > { %1435 = vrot.lane.b32.xlu2 %v1430_v62, %s4650_s23  ;;  %v1670_v62 = vstv %s4282_s11  ;;  %s4325_s11 = sld [smem:[#allocation9 + %s4189_s12]] }
 0x554   : > { %1747 = vrot.lane.b32.xlu1 %v4021_v9, %s4651_s21 }
 0x55c   : > { %1399 = vrot.lane.b32.xlu1 %v1394_v4, %s4649_s7  ;;  %v1667_v4 = vmul.f32 %v1666_v51, %v1508_v46 }
 0x599   : > { %v1614_v40 = vpop.xlane.xlu0 %1613 }
 0x59e   : > { %v1579_v39 = vpop.xlane.xlu2 %1578 }
 0x59f   : > { %3560 = vrcp.f32 %v1579_v39 }
 0x5a0   : > { %3562 = vrcp.f32 %v1614_v40 }
 0x5a5   : > { %v3561_v48 = vpop.eup %3560 }
 0x5a6   : > { %v1782_v9 = vpop.permute.xlu2 %1781  ;;  %v3563_v52 = vpop.eup %3562  ;;  %v1581_v58 = vmul.f32 %v3561_v48, %v3555_v31 }
 0x5a7   : > { %v1787_v41 = vsel %vm1349_vm8, %v1782_v9, 0  ;;  %v1616_v5 = vmul.f32 %v3563_v52, %v4224_v61 }
 0x5a8   : > { %1796 = vmatpush.bf16.msrb.mxu3 %v1787_v41  ;;  %v1627_v12 = vmul.f32 %v1626_v63, %v1581_v58  ;;  %v1643_v14 = vmul.f32 %v1642_v0, %v1581_v58  ;;  %v1659_v15 = vmul.f32 %v1658_v20, %v1581_v58  ;;  %v1675_v25 = vmul.f32 %v1674_v11, %v1581_v58 }
 0x5a9   : > { %v1631_v23 = vmul.f32 %v1630_v54, %v1616_v5  ;;  %v1647_v24 = vmul.f32 %v1646_v55, %v1616_v5  ;;  %v1663_v61 = vmul.f32 %v1662_v22, %v1616_v5  ;;  %v1679_v33 = vmul.f32 %v1678_v29, %v1616_v5 }
 0x5aa   : > { %v1712_v63 = vstv %s4321_s3  ;;  %v1740_v20 = vstv %s1739_s10  ;;  %v1812_v11 = vstv %s1811_s0  ;;  %s4674_s10 = sld [smem:[#allocation36_spill]] (!%p3335_p9) }
 0x5ac   : > { %v1816_v42 = vpop.permute.xlu0 %1815 }
 0x5ad   : > { %v1821_v44 = vsel %vm1349_vm8, %v1816_v42, 0 }
 0x5ae   : > { %1830 = vmatpush.bf16.msra.mxu0 %v1821_v44  ;;  %v1544_v45 = vpop.xlane.xlu1 %1543  ;;  %v1436_v52 = vpop.permute.xlu2 %1435 }
 0x5af   : > { %3564 = vrcp.f32 %v1544_v45 }
 0x5b5   : > { %v3565_v57 = vpop.eup %3564 }
 0x5b6   : > { %v1546_v1 = vmul.f32 %v3565_v57, %v3557_v36 }
 0x5b8   : > { %v1623_v6 = vmul.f32 %v1622_v56, %v1546_v1  ;;  %v1639_v7 = vmul.f32 %v1638_v59, %v1546_v1  ;;  %v1655_v8 = vmul.f32 %v1654_v60, %v1546_v1  ;;  %v1671_v10 = vmul.f32 %v1670_v62, %v1546_v1 }
 0x5b9   : > { %v1775_v1 = vstv %s1774_s27 }
 0x5ba   : > { %v1624_v17 = vadd.f32 %v1623_v6, %v1619_v53  ;;  %v1640_v18 = vadd.f32 %v1639_v7, %v1635_v2  ;;  %v1656_v19 = vadd.f32 %v1655_v8, %v1651_v3  ;;  %v1672_v21 = vadd.f32 %v1671_v10, %v1667_v4 }
 0x5bb   : > { %v1809_v2 = vstv %s1808_s5  ;;  %v1715_v7 = vstv %s4325_s11  ;;  %v1743_v8 = vstv %s1742_s13  ;;  %v1778_v10 = vstv %s1777_s29 }
 0x5bc   : > { %v1628_v26 = vadd.f32 %v1627_v12, %v1624_v17  ;;  %v1644_v27 = vadd.f32 %v1643_v14, %v1640_v18  ;;  %v1660_v28 = vadd.f32 %v1659_v15, %v1656_v19  ;;  %v1676_v31 = vadd.f32 %v1675_v25, %v1672_v21 }
 0x5be   : > { %v1648_v30 = vadd.f32 %v1647_v24, %v1644_v27  ;;  %v1632_v32 = vadd.f32 %v1631_v23, %v1628_v26  ;;  %v1664_v34 = vadd.f32 %v1663_v61, %v1660_v28  ;;  %v1680_v36 = vadd.f32 %v1679_v33, %v1676_v31 }
 0x5c0   : > { %v1682_v35 = vadd.f32 %v1648_v30, %v1632_v32 }
 0x5c2   : > { %v1683_v37 = vadd.f32 %v1682_v35, %v1664_v34  ;;  %v3380_v35 = vld [vmem:[%s3883_s30 + $0x30] sm:$0xff] }
 0x5c4   : > { %v1684_v38 = vadd.f32 %v1683_v37, %v1680_v36  ;;  %v3378_v37 = vld [vmem:[%s3883_s30 + $0x20] sm:$0xff] }
 0x5c6   : > { %v1748_v39 = vpop.permute.xlu1 %1747  ;;  %v1685_v40 = vmul.f32 0.25, %v1684_v38  ;;  %v3377_v38 = vld [vmem:[%s3883_s30 + $0x18] sm:$0xff] }
 0x5c7   : > { %v1753_v9 = vsel %vm1349_vm8, %v1748_v39, 0  ;;  %v3376_v39 = vld [vmem:[%s3883_s30 + $0x10] sm:$0xff] }
 0x5c8   : > { %1762 = vmatpush.bf16.msra.mxu2 %v1753_v9  ;;  %v1686_v41 = vsub.f32 %v1632_v32, %v1685_v40  ;;  %v1689_v42 = vsub.f32 %v1648_v30, %v1685_v40  ;;  %v1692_v43 = vsub.f32 %v1664_v34, %v1685_v40  ;;  %v1695_v46 = vsub.f32 %v1680_v36, %v1685_v40  ;;  %v3381_v34 = vld [vmem:[%s3883_s30 + $0x38] sm:$0xff]  ;;  %v3379_v36 = vld [vmem:[%s3883_s30 + $0x28] sm:$0xff]  ;;  %v3374_v9 = vld [vmem:[%s3883_s30] sm:$0xff] }
 0x5c9   : > { %1912 = vmatpush.bf16.msrb.mxu1 %v3381_v34  ;;  %v3375_v40 = vld [vmem:[%s3883_s30 + $0x8] sm:$0xff]  ;;  %s4663_s30 = scalar_lea.vmem %s4570_s9, %s3868_s6 }
 0x5ca   : > { %v1687_v44 = vmul.f32 %v1686_v41, %v1686_v41  ;;  %v1690_v45 = vmul.f32 %v1689_v42, %v1689_v42  ;;  %v1693_v48 = vmul.f32 %v1692_v43, %v1692_v43  ;;  %v1696_v51 = vmul.f32 %v1695_v46, %v1695_v46 }
 0x5cc   : > { %v1691_v47 = vadd.f32 %v1690_v45, %v1687_v44 }
 0x5cd   : > { %1913 = vmatpush.bf16.msrb.mxu1 %v3380_v35 }
 0x5ce   : > { %v1400_v49 = vpop.permute.xlu1 %1399  ;;  %v1694_v50 = vadd.f32 %v1693_v48, %v1691_v47  ;;  %v3522_v47 = vld [vmem:[%s4663_s30] ss:$0 sm:$0xff] }
 0x5cf   : > { %1403 = vst.msk [vmem:[#allocation3] sm:$0xff] %vm1402_vm13, %v1400_v49 }
 0x5d0   : > { %v1697_v53 = vadd.f32 %v1696_v51, %v1694_v50  ;;  %1439 = vst.msk [vmem:[#allocation3] sm:$0xff] %vm1438_vm14, %v1436_v52  ;;  %v3588_v50 = vld [vmem:[#allocation2] sm:$0xff] }
 0x5d1   : > { %1914 = vmatpush.bf16.msrb.mxu1 %v3379_v36  ;;  %v3403_v36 = vld [vmem:[%s3906_s8 + $0xac] sm:$0xf] }
 0x5d2   : > { %v1698_v54 = vmul.f32 0.25, %v1697_v53 }
 0x5d4   : > { %v1699_v55 = vadd.f32 1e-05, %v1698_v54  ;;  %v3589_v54 = vld [vmem:[#allocation2 + $0x8] sm:$0xff] }
 0x5d5   : > { %1915 = vmatpush.bf16.msrb.mxu1 %v3378_v37  ;;  %v3171_v37 = vld [vmem:[%s3906_s8 + $0xb8] sm:$0xf0] }
 0x5d6   : > { %3566 = vrsqrt.f32 %v1699_v55  ;;  %vm1706_vm0 = vweird.f32 %v1699_v55 }
 0x5d9   : > { %1916 = vmatpush.bf16.msrb.mxu1 %v3377_v38  ;;  %v3174_v38 = vor.u32 %v3403_v36, %v3171_v37  ;;  %v3089_v36 = vld [vmem:[%s3906_s8 + $0x8] sm:$0xf]  ;;  %v3385_v37 = vld [vmem:[%s3906_s8 + $0x14] sm:$0xf0] }
 0x5dc   : > { %v3567_v56 = vpop.eup %3566 }
 0x5dd   : > { %v1701_v57 = vmul.f32 %v3567_v56, %v1699_v55  ;;  %vm1707_vm15 = vweird.f32 %v3567_v56  ;;  %1917 = vmatpush.bf16.msrb.mxu1 %v3376_v39  ;;  %v3145_v39 = vld [vmem:[%s3906_s8 + $0x80] sm:$0xf] }
 0x5de   : > { %vm1708_vm1 = vmor %vm1706_vm0, %vm1707_vm15 }
 0x5df   : > { %v1702_v58 = vmul.f32 %v3567_v56, %v1701_v57 }
 0x5e1   : > { %v1703_v59 = vmul.f32 0.5, %v1702_v58  ;;  %1918 = vmatpush.bf16.msrb.mxu1 %v3375_v40  ;;  %v3400_v40 = vld [vmem:[%s3906_s8 + $0x8c] sm:$0xf0] }
 0x5e3   : > { %v1704_v60 = vsub.f32 1.5, %v1703_v59 }
 0x5e5   : > { %v1705_v62 = vmul.f32 %v3567_v56, %v1704_v60  ;;  %1919 = vmatpush.bf16.msrb.mxu1 %v3374_v9  ;;  %v3398_v9 = vld [vmem:[%s3906_s8 + $0x84] sm:$0xf] }
 0x5e7   : > { %v1709_v0 = vsel %vm1708_vm1, %v3567_v56, %v1705_v62 }
 0x5e8   : > { %v1710_v3 = vmul.f32 %v1709_v0, %v1686_v41  ;;  %v1738_v4 = vmul.f32 %v1709_v0, %v1689_v42  ;;  %v1773_v5 = vmul.f32 %v1709_v0, %v1692_v43  ;;  %v1807_v6 = vmul.f32 %v1709_v0, %v1695_v46 }
 0x5ea   : > { %v1713_v12 = vmul.f32 %v1712_v63, %v1710_v3  ;;  %v1741_v14 = vmul.f32 %v1740_v20, %v1738_v4  ;;  %v1776_v15 = vmul.f32 %v1775_v1, %v1773_v5  ;;  %v1810_v17 = vmul.f32 %v1809_v2, %v1807_v6  ;;  %v3193_v20 = vld [vmem:[%s3906_s8 + $0xe0] sm:$0xf]  ;;  %v3412_v1 = vld [vmem:[%s3906_s8 + $0xec] sm:$0xf0]  ;;  %v3410_v2 = vld [vmem:[%s3906_s8 + $0xe4] sm:$0xf] }
 0x5eb   : > { %v3194_v3 = vor.u32 %v3412_v1, %v3193_v20  ;;  %v3195_v4 = vld [vmem:[%s3906_s8 + $0xf0] sm:$0xf0]  ;;  %v3201_v5 = vld [vmem:[%s3906_s8 + $0xe8] sm:$0xf]  ;;  %v3413_v6 = vld [vmem:[%s3906_s8 + $0xf4] sm:$0xf0] }
 0x5ec   : > { %v1716_v18 = vadd.f32 %v1715_v7, %v1713_v12  ;;  %v1744_v19 = vadd.f32 %v1743_v8, %v1741_v14  ;;  %v1779_v21 = vadd.f32 %v1778_v10, %v1776_v15  ;;  %v1813_v22 = vadd.f32 %v1812_v11, %v1810_v17  ;;  %v3411_v10 = vld [vmem:[%s3906_s8 + $0xec] sm:$0xf]  ;;  %v3203_v11 = vld [vmem:[%s3906_s8 + $0xf8] sm:$0xf0]  ;;  %v3177_v14 = vld [vmem:[%s3906_s8 + $0xc0] sm:$0xf] }
 0x5ed   : > { %v3198_v7 = vor.u32 %v3410_v2, %v3195_v4  ;;  %v3202_v8 = vor.u32 %v3413_v6, %v3201_v5  ;;  %2183 = vmatpush.bf16.msrb.mxu2 %v3194_v3  ;;  %v3206_v12 = vor.u32 %v3411_v10, %v3203_v11  ;;  %v3408_v15 = vld [vmem:[%s3906_s8 + $0xcc] sm:$0xf0]  ;;  %v3406_v17 = vld [vmem:[%s3906_s8 + $0xc4] sm:$0xf]  ;;  %v3113_v1 = vld [vmem:[%s3906_s8 + $0x40] sm:$0xf] }
 0x5ee   : > { %v1717_v23 = vpack.c.bf16 %v1716_v18, %v1716_v18  ;;  %v1745_v24 = vpack.c.bf16 %v1744_v19, %v1744_v19  ;;  %v1780_v25 = vpack.c.bf16 %v1779_v21, %v1779_v21  ;;  %v1814_v26 = vpack.c.bf16 %v1813_v22, %v1813_v22  ;;  %v3179_v19 = vld [vmem:[%s3906_s8 + $0xd0] sm:$0xf0]  ;;  %v3185_v21 = vld [vmem:[%s3906_s8 + $0xc8] sm:$0xf]  ;;  %v3409_v22 = vld [vmem:[%s3906_s8 + $0xd4] sm:$0xf0] }
 0x5ef   : > { %2197 = vmatpush.bf16.msra.mxu3 %v3198_v7  ;;  %2211 = vmatpush.bf16.msrb.mxu0 %v3202_v8  ;;  %v3178_v18 = vor.u32 %v3408_v15, %v3177_v14  ;;  %v3392_v2 = vld [vmem:[%s3906_s8 + $0x4c] sm:$0xf0]  ;;  %v3390_v3 = vld [vmem:[%s3906_s8 + $0x44] sm:$0xf]  ;;  %v3115_v5 = vld [vmem:[%s3906_s8 + $0x50] sm:$0xf0] }
 0x5f0   : > { %3043 = vmatmul.msk.bf16.vlgmr.msra.gmra.mxu1 %vm1104_vm9, %v1717_v23  ;;  %3044 = vmatmul.msk.bf16.vlgmr.msra.gmra.mxu2 %vm1104_vm9, %v1745_v24  ;;  %v3182_v23 = vor.u32 %v3406_v17, %v3179_v19  ;;  %v3186_v24 = vor.u32 %v3409_v22, %v3185_v21  ;;  %v3114_v4 = vor.u32 %v3392_v2, %v3113_v1  ;;  %v3121_v6 = vld [vmem:[%s3906_s8 + $0x48] sm:$0xf]  ;;  %v3393_v7 = vld [vmem:[%s3906_s8 + $0x54] sm:$0xf0]  ;;  %v3391_v11 = vld [vmem:[%s3906_s8 + $0x4c] sm:$0xf] }
 0x5f1   : > { %3045 = vmatmul.msk.bf16.vlgmr.msrb.gmra.mxu3 %vm1104_vm9, %v1780_v25  ;;  %3046 = vmatmul.msk.bf16.vlgmr.msra.gmra.mxu0 %vm1104_vm9, %v1814_v26  ;;  %v3407_v25 = vld [vmem:[%s3906_s8 + $0xcc] sm:$0xf]  ;;  %v3187_v26 = vld [vmem:[%s3906_s8 + $0xd8] sm:$0xf0]  ;;  %v3118_v8 = vor.u32 %v3390_v3, %v3115_v5  ;;  %v3122_v10 = vor.u32 %v3393_v7, %v3121_v6  ;;  %v3097_v15 = vld [vmem:[%s3906_s8 + $0x20] sm:$0xf] }
 0x5f2   : > { %2225 = vmatpush.bf16.msra.mxu1 %v3206_v12  ;;  %2184 = vmatpush.bf16.msrb.mxu2 %v3178_v18  ;;  %v3123_v12 = vld [vmem:[%s3906_s8 + $0x58] sm:$0xf0]  ;;  %v3388_v17 = vld [vmem:[%s3906_s8 + $0x2c] sm:$0xf0]  ;;  %v3386_v18 = vld [vmem:[%s3906_s8 + $0x24] sm:$0xf] }
 0x5f3   : > { %2198 = vmatpush.bf16.msra.mxu3 %v3182_v23  ;;  %2212 = vmatpush.bf16.msrb.mxu0 %v3186_v24  ;;  %v3126_v14 = vor.u32 %v3391_v11, %v3123_v12  ;;  %v3098_v19 = vor.u32 %v3388_v17, %v3097_v15  ;;  %v3099_v21 = vld [vmem:[%s3906_s8 + $0x30] sm:$0xf0]  ;;  %v3105_v22 = vld [vmem:[%s3906_s8 + $0x28] sm:$0xf]  ;;  %v3389_v23 = vld [vmem:[%s3906_s8 + $0x34] sm:$0xf0] }
 0x66d   : > { %v1733_v27 = vpop.f32.mrf.mxu1 }
 0x66e   : > { %1737 = vst.msk [vmem:[#allocation3 + $0x8] sm:$0xff] %vm1083_vm7, %v1733_v27  ;;  %v1832_v28 = vpop.f32.mrf.mxu0  ;;  %v3190_v27 = vor.u32 %v3407_v25, %v3187_v26  ;;  %v3102_v25 = vor.u32 %v3386_v18, %v3099_v21  ;;  %v3106_v26 = vor.u32 %v3389_v23, %v3105_v22 }
 0x66f   : > { %1837 = vrot.lane.b32.xlu2 %v1832_v28, %s4651_s21  ;;  %v3161_v28 = vld [vmem:[%s3906_s8 + $0xa0] sm:$0xf] }
 0x670   : > { %2226 = vmatpush.bf16.msra.mxu1 %v3190_v27  ;;  %v3387_v27 = vld [vmem:[%s3906_s8 + $0x2c] sm:$0xf] }
 0x673   : > { %v1764_v29 = vpop.f32.mrf.mxu2 }
 0x674   : > { %v1798_v61 = vpop.f32.mrf.mxu3  ;;  %1769 = vrot.lane.b32.xlu0 %v1764_v29, %s4649_s7  ;;  %v3404_v29 = vld [vmem:[%s3906_s8 + $0xac] sm:$0xf0]  ;;  %2227 = vmatpush.bf16.msra.mxu1 %v3174_v38  ;;  %v3383_v38 = vld [vmem:[%s3906_s8 + $0xc] sm:$0xf]  ;;  %s4665_s7 = scalar_lea.vmem %s4664_s4, %s3868_s6 }
 0x675   : > { %1803 = vrot.lane.b32.xlu1 %v1798_v61, %s4650_s23  ;;  %v1735_v30 = vpop.f32.mrf.mxu1  ;;  %v3402_v61 = vld [vmem:[%s3906_s8 + $0xa4] sm:$0xf]  ;;  %s4666_s23 = sld [smem:[#allocation19_spill]] }
 0x676   : > { %v1834_v31 = vpop.f32.mrf.mxu0  ;;  %v3162_v30 = vor.u32 %v3404_v29, %v3161_v28  ;;  %v3107_v28 = vld [vmem:[%s3906_s8 + $0x38] sm:$0xf0]  ;;  %v3081_v29 = vld [vmem:[%s3906_s8] sm:$0xf] }
 0x677   : > { %v3163_v31 = vld [vmem:[%s3906_s8 + $0xb0] sm:$0xf0] }
 0x678   : > { %v3166_v34 = vor.u32 %v3402_v61, %v3163_v31  ;;  %2185 = vmatpush.bf16.msrb.mxu2 %v3162_v30  ;;  %v3110_v30 = vor.u32 %v3387_v27, %v3107_v28  ;;  %v3384_v31 = vld [vmem:[%s3906_s8 + $0xc] sm:$0xf0] }
 0x67a   : > { %2199 = vmatpush.bf16.msra.mxu3 %v3166_v34  ;;  %v3082_v34 = vor.u32 %v3384_v31, %v3081_v29  ;;  %v4476_v29 = vld [vmem:[%s4669_s17] sm:$0xf] }
 0x67b   : > { %v1766_v32 = vpop.f32.mrf.mxu2  ;;  %v3445_v6 = vld [vmem:[%s4666_s23 + $0xf8] sm:$0xff]  ;;  %v3436_v7 = vld [vmem:[%s4666_s23 + $0xb0] sm:$0xff]  ;;  %v3435_v12 = vld [vmem:[%s4666_s23 + $0xa8] sm:$0xff] }
 0x67c   : > { %v1800_v33 = vpop.f32.mrf.mxu3  ;;  %1471 = vrot.lane.b32.xlu0 %v4216_v16, %s4651_s21  ;;  %v3169_v32 = vld [vmem:[%s3906_s8 + $0xa8] sm:$0xf]  ;;  %v3429_v11 = vld [vmem:[%s4666_s23 + $0x78] sm:$0xff]  ;;  %v3420_v15 = vld [vmem:[%s4666_s23 + $0x30] sm:$0xff] }
 0x67d   : > { %v3405_v33 = vld [vmem:[%s3906_s8 + $0xb4] sm:$0xf0]  ;;  %v3428_v17 = vld [vmem:[%s4666_s23 + $0x70] sm:$0xff]  ;;  %v3434_v18 = vld [vmem:[%s4666_s23 + $0xa0] sm:$0xff] }
 0x67e   : > { %v3170_v35 = vor.u32 %v3405_v33, %v3169_v32  ;;  %v3382_v32 = vld [vmem:[%s3906_s8 + $0x4] sm:$0xf]  ;;  %v3083_v33 = vld [vmem:[%s3906_s8 + $0x10] sm:$0xf0]  ;;  %v3419_v21 = vld [vmem:[%s4666_s23 + $0x28] sm:$0xff] }
 0x67f   : > { %v3427_v22 = vld [vmem:[%s4666_s23 + $0x68] sm:$0xff]  ;;  %v3433_v23 = vld [vmem:[%s4666_s23 + $0x98] sm:$0xff]  ;;  %v3432_v27 = vld [vmem:[%s4666_s23 + $0x90] sm:$0xff] }
 0x680   : > { %2213 = vmatpush.bf16.msrb.mxu0 %v3170_v35  ;;  %v3086_v35 = vor.u32 %v3382_v32, %v3083_v33  ;;  %v3440_v28 = vld [vmem:[%s4666_s23 + $0xd0] sm:$0xff]  ;;  %v3431_v31 = vld [vmem:[%s4666_s23 + $0x88] sm:$0xff]  ;;  %v2017_v33 = vperm.slane %v4476_v29, 2 }
 0x681   : > { %v3439_v32 = vld [vmem:[%s4666_s23 + $0xc8] sm:$0xff] }
 0x6c9   : > { %v1838_v42 = vpop.permute.xlu2 %1837 }
 0x6e6   : > { %v1770_v41 = vpop.permute.xlu0 %1769 }
 0x6e7   : > { %1772 = vst.msk [vmem:[#allocation3 + $0x8] sm:$0xff] %vm1402_vm13, %v1770_v41  ;;  %v1804_v16 = vpop.permute.xlu1 %1803  ;;  %v3146_v41 = vor.u32 %v3400_v40, %v3145_v39  ;;  %v3090_v40 = vor.u32 %v3385_v37, %v3089_v36  ;;  %v3424_v36 = vld [vmem:[%s4666_s23 + $0x50] sm:$0xff] }
 0x6e8   : > { %1806 = vst.msk [vmem:[#allocation3 + $0x8] sm:$0xff] %vm1438_vm14, %v1804_v16  ;;  %v3147_v16 = vld [vmem:[%s3906_s8 + $0x90] sm:$0xf0] }
 0x6e9   : > { %1840 = vst.msk [vmem:[#allocation3 + $0x8] sm:$0xff] %vm1474_vm2, %v1838_v42  ;;  %v3153_v42 = vld [vmem:[%s3906_s8 + $0x88] sm:$0xf]  ;;  %2186 = vmatpush.bf16.msrb.mxu2 %v3146_v41 }
 0x6ee   : > { %v1472_v43 = vpop.permute.xlu0 %1471 }
 0x6ef   : > { %1475 = vst.msk [vmem:[#allocation3] sm:$0xff] %vm1474_vm2, %v1472_v43  ;;  %v3401_v43 = vld [vmem:[%s3906_s8 + $0x94] sm:$0xf0] }
 0x6f0   : > { %v1842_v45 = vld [vmem:[#allocation3 + $0x8] sm:$0xff] }
 0x6f6   : > { %v1841_v44 = vld [vmem:[#allocation3] sm:$0xff] }
 0x6f7   : > { %v1843_v46 = vpack.c.bf16 %v1842_v45, %v1841_v44  ;;  %v3150_v44 = vor.u32 %v3398_v9, %v3147_v16  ;;  %v3154_v45 = vor.u32 %v3401_v43, %v3153_v42  ;;  %v3091_v9 = vld [vmem:[%s3906_s8 + $0x18] sm:$0xf0] }
 0x6f8   : > { %v3094_v41 = vor.u32 %v3383_v38, %v3091_v9 }
 0x6f9   : > { %1920 = vmatmul.bf16.vlgmr.msrb.gmra.mxu1 %v1843_v46  ;;  %v3399_v46 = vld [vmem:[%s3906_s8 + $0x8c] sm:$0xf]  ;;  %2200 = vmatpush.bf16.msra.mxu3 %v3150_v44 }
 0x6fa   : > { %2214 = vmatpush.bf16.msrb.mxu0 %v3154_v45 }
 0x776   : > { %v1921_v48 = vpop.f32.mrf.mxu1 }
 0x777   : > { %v1922_v49 = vadd.f32 %v3522_v47, %v1921_v48 }
 0x779   : > { %v4359_v51 = vadd.f32 %v3588_v50, %v1922_v49  ;;  %v3129_v49 = vld [vmem:[%s3906_s8 + $0x60] sm:$0xf]  ;;  %v3396_v50 = vld [vmem:[%s3906_s8 + $0x6c] sm:$0xf0] }
 0x77b   : > { %1930 = vadd.xlane.f32.xlu1 %v4359_v51 }
 0x77e   : > { %v1923_v52 = vpop.f32.mrf.mxu1 }
 0x77f   : > { %v1924_v53 = vadd.f32 %v3522_v47, %v1923_v52  ;;  %v3155_v47 = vld [vmem:[%s3906_s8 + $0x98] sm:$0xf0]  ;;  %v3394_v52 = vld [vmem:[%s3906_s8 + $0x64] sm:$0xf] }
 0x780   : > { %v3158_v48 = vor.u32 %v3399_v46, %v3155_v47 }
 0x781   : > { %v4362_v55 = vadd.f32 %v3589_v54, %v1924_v53  ;;  %v3130_v53 = vor.u32 %v3396_v50, %v3129_v49  ;;  %v3131_v54 = vld [vmem:[%s3906_s8 + $0x70] sm:$0xf0] }
 0x782   : > { %2228 = vmatpush.bf16.msra.mxu1 %v3158_v48 }
 0x783   : > { %1932 = vadd.xlane.f32.xlu0 %v4362_v55  ;;  %2187 = vmatpush.bf16.msrb.mxu2 %v3130_v53 }
 0x787   : > { %2188 = vmatpush.bf16.msrb.mxu2 %v3114_v4 }
 0x78b   : > { %2189 = vmatpush.bf16.msrb.mxu2 %v3098_v19  ;;  %v3442_v19 = vld [vmem:[%s4666_s23 + $0xe0] sm:$0xff] }
 0x78f   : > { %2190 = vmatpush.bf16.msrb.mxu2 %v3082_v34  ;;  %v2018_v34 = vperm.slane %v4476_v29, 3 }
 0x7ee   : > { %v1931_v56 = vpop.xlane.xlu1 %1930 }
 0x7ef   : > { %v1934_v57 = vmul.f32 %v1931_v56, %v3933_v13  ;;  %v3137_v56 = vld [vmem:[%s3906_s8 + $0x68] sm:$0xf] }
 0x7f1   : > { %v4367_v58 = vsub.f32 %v4359_v51, %v1934_v57  ;;  %v3397_v57 = vld [vmem:[%s3906_s8 + $0x74] sm:$0xf0] }
 0x7f3   : > { %v1938_v59 = vmul.f32 %v4367_v58, %v4367_v58 }
 0x7f5   : > { %1940 = vadd.xlane.f32.xlu2 %v1938_v59  ;;  %v3134_v59 = vor.u32 %v3394_v52, %v3131_v54 }
 0x7f6   : > { %v1933_v60 = vpop.xlane.xlu0 %1932 }
 0x7f7   : > { %v1935_v62 = vmul.f32 %v1933_v60, %v3933_v13  ;;  %v3138_v60 = vor.u32 %v3397_v57, %v3137_v56  ;;  %2201 = vmatpush.bf16.msra.mxu3 %v3134_v59 }
 0x7f9   : > { %v4373_v63 = vsub.f32 %v4362_v55, %v1935_v62  ;;  %v3395_v62 = vld [vmem:[%s3906_s8 + $0x6c] sm:$0xf]  ;;  %2215 = vmatpush.bf16.msrb.mxu0 %v3138_v60  ;;  %v3523_v60 = vld [vmem:[%s4665_s7] ss:$0 sm:$0xff] }
 0x7fb   : > { %v1939_v0 = vmul.f32 %v4373_v63, %v4373_v63  ;;  %2202 = vmatpush.bf16.msra.mxu3 %v3118_v8  ;;  %v3444_v8 = vld [vmem:[%s4666_s23 + $0xf0] sm:$0xff] }
 0x7fd   : > { %1942 = vadd.xlane.f32.xlu1 %v1939_v0  ;;  %v3139_v0 = vld [vmem:[%s3906_s8 + $0x78] sm:$0xf0]  ;;  %2216 = vmatpush.bf16.msrb.mxu0 %v3122_v10 }
 0x7fe   : > { %v3142_v20 = vor.u32 %v3395_v62, %v3139_v0  ;;  %v3421_v10 = vld [vmem:[%s4666_s23 + $0x38] sm:$0xff] }
 0x7ff   : > { %2203 = vmatpush.bf16.msra.mxu3 %v3102_v25  ;;  %2571 = vmatpush.bf16.msra.mxu2 %v3421_v10  ;;  %v3418_v25 = vld [vmem:[%s4666_s23 + $0x20] sm:$0xff] }
 0x800   : > { %2229 = vmatpush.bf16.msra.mxu1 %v3142_v20 }
 0x801   : > { %2217 = vmatpush.bf16.msrb.mxu0 %v3106_v26  ;;  %v3426_v26 = vld [vmem:[%s4666_s23 + $0x60] sm:$0xff] }
 0x803   : > { %2204 = vmatpush.bf16.msra.mxu3 %v3086_v35  ;;  %2572 = vmatpush.bf16.msra.mxu2 %v3420_v15  ;;  %v3416_v35 = vld [vmem:[%s4666_s23 + $0x10] sm:$0xff] }
 0x804   : > { %2230 = vmatpush.bf16.msra.mxu1 %v3126_v14  ;;  %v3443_v14 = vld [vmem:[%s4666_s23 + $0xe8] sm:$0xff] }
 0x805   : > { %2218 = vmatpush.bf16.msrb.mxu0 %v3090_v40  ;;  %v3438_v40 = vld [vmem:[%s4666_s23 + $0xc0] sm:$0xff] }
 0x807   : > { %2585 = vmatpush.bf16.msrb.mxu3 %v3429_v11  ;;  %2573 = vmatpush.bf16.msra.mxu2 %v3419_v21 }
 0x808   : > { %2231 = vmatpush.bf16.msra.mxu1 %v3110_v30  ;;  %v3425_v30 = vld [vmem:[%s4666_s23 + $0x58] sm:$0xff] }
 0x80b   : > { %2586 = vmatpush.bf16.msrb.mxu3 %v3428_v17  ;;  %2574 = vmatpush.bf16.msra.mxu2 %v3418_v25 }
 0x80c   : > { %2232 = vmatpush.bf16.msra.mxu1 %v3094_v41 }
 0x80f   : > { %2587 = vmatpush.bf16.msrb.mxu3 %v3427_v22 }
 0x810   : > { %2613 = vmatpush.bf16.msrb.mxu1 %v3445_v6 }
 0x813   : > { %2588 = vmatpush.bf16.msrb.mxu3 %v3426_v26 }
 0x814   : > { %2614 = vmatpush.bf16.msrb.mxu1 %v3444_v8 }
 0x817   : > { %2589 = vmatpush.bf16.msrb.mxu3 %v3425_v30 }
 0x818   : > { %2615 = vmatpush.bf16.msrb.mxu1 %v3443_v14 }
 0x81b   : > { %2590 = vmatpush.bf16.msrb.mxu3 %v3424_v36 }
 0x81c   : > { %2616 = vmatpush.bf16.msrb.mxu1 %v3442_v19 }
 0x868   : > { %v1941_v24 = vpop.xlane.xlu2 %1940 }
 0x869   : > { %v1944_v61 = vmul.f32 %v1941_v24, %v3933_v13  ;;  %v3441_v24 = vld [vmem:[%s4666_s23 + $0xd8] sm:$0xff] }
 0x86a   : > { %2617 = vmatpush.bf16.msrb.mxu1 %v3441_v24 }
 0x86b   : > { %v1946_v39 = vadd.f32 1e-05, %v1944_v61  ;;  %v3417_v61 = vld [vmem:[%s4666_s23 + $0x18] sm:$0xff] }
 0x86c   : > { %2575 = vmatpush.bf16.msra.mxu2 %v3417_v61 }
 0x86d   : > { %3568 = vrsqrt.f32 %v1946_v39  ;;  %vm1954_vm4 = vweird.f32 %v1946_v39 }
 0x86e   : > { %2618 = vmatpush.bf16.msrb.mxu1 %v3440_v28 }
 0x870   : > { %v1943_v16 = vpop.xlane.xlu1 %1942  ;;  %2576 = vmatpush.bf16.msra.mxu2 %v3416_v35 }
 0x871   : > { %v1945_v42 = vmul.f32 %v1943_v16, %v3933_v13  ;;  %v2015_v16 = vperm.slane %v4476_v29, 0 }
 0x872   : > { %2619 = vmatpush.bf16.msrb.mxu1 %v3439_v32 }
 0x873   : > { %v3569_v43 = vpop.eup %3568  ;;  %v1947_v44 = vadd.f32 1e-05, %v1945_v42  ;;  %v2016_v42 = vperm.slane %v4476_v29, 1 }
 0x874   : > { %v1949_v45 = vmul.f32 %v3569_v43, %v1946_v39  ;;  %vm1955_vm3 = vweird.f32 %v3569_v43  ;;  %v3430_v39 = vld [vmem:[%s4666_s23 + $0x80] sm:$0xff] }
 0x875   : > { %3570 = vrsqrt.f32 %v1947_v44  ;;  %vm1956_vm5 = vmor %vm1954_vm4, %vm1955_vm3  ;;  %vm1964_vm7 = vweird.f32 %v1947_v44 }
 0x876   : > { %v1950_v46 = vmul.f32 %v3569_v43, %v1949_v45  ;;  %2620 = vmatpush.bf16.msrb.mxu1 %v3438_v40 }
 0x878   : > { %v1951_v47 = vmul.f32 0.5, %v1950_v46 }
 0x87a   : > { %v1952_v48 = vsub.f32 1.5, %v1951_v47 }
 0x87b   : > { %v3571_v49 = vpop.eup %3570 }
 0x87c   : > { %v1953_v50 = vmul.f32 %v3569_v43, %v1952_v48  ;;  %v1959_v52 = vmul.f32 %v3571_v49, %v1947_v44  ;;  %vm1965_vm6 = vweird.f32 %v3571_v49  ;;  %v3423_v44 = vld [vmem:[%s4666_s23 + $0x48] sm:$0xff] }
 0x87d   : > { %vm1966_vm8 = vmor %vm1964_vm7, %vm1965_vm6  ;;  %2591 = vmatpush.bf16.msrb.mxu3 %v3423_v44 }
 0x87e   : > { %v1960_v53 = vmul.f32 %v3571_v49, %v1959_v52  ;;  %v1957_v54 = vsel %vm1956_vm5, %v3569_v43, %v1953_v50  ;;  %v3415_v43 = vld [vmem:[%s4666_s23 + $0x8] sm:$0xff] }
 0x87f   : > { %v1968_v59 = vmul.f32 %v1957_v54, %v4367_v58  ;;  %v3524_v58 = vld [vmem:[%s4668_s25] ss:$0 sm:$0xff]  ;;  %2577 = vmatpush.bf16.msra.mxu2 %v3415_v43 }
 0x880   : > { %v1961_v56 = vmul.f32 0.5, %v1960_v53  ;;  %v3414_v54 = vld [vmem:[%s4666_s23] sm:$0xff] }
 0x881   : > { %v1973_v1 = vmul.f32 %v3523_v60, %v1968_v59 }
 0x882   : > { %v1962_v57 = vsub.f32 1.5, %v1961_v56  ;;  %v3422_v56 = vld [vmem:[%s4666_s23 + $0x40] sm:$0xff] }
 0x883   : > { %v1978_v3 = vadd.f32 %v3524_v58, %v1973_v1  ;;  %2578 = vmatpush.bf16.msra.mxu2 %v3414_v54  ;;  %2592 = vmatpush.bf16.msrb.mxu3 %v3422_v56 }
 0x884   : > { %v1963_v62 = vmul.f32 %v3571_v49, %v1962_v57 }
 0x886   : > { %v1967_v0 = vsel %vm1966_vm8, %v3571_v49, %v1963_v62 }
 0x887   : > { %v1969_v20 = vmul.f32 %v1967_v0, %v4373_v63  ;;  %v3437_v63 = vld [vmem:[%s4666_s23 + $0xb8] sm:$0xff] }
 0x888   : > { %2599 = vmatpush.bf16.msra.mxu0 %v3437_v63 }
 0x889   : > { %v1974_v2 = vmul.f32 %v3523_v60, %v1969_v20 }
 0x88b   : > { %v1979_v4 = vadd.f32 %v3524_v58, %v1974_v2 }
 0x88c   : > { %2600 = vmatpush.bf16.msra.mxu0 %v3436_v7 }
 0x88d   : > { %v1980_v5 = vpack.c.bf16 %v1979_v4, %v1978_v3 }
 0x88f   : > { %2191 = vmatmul.bf16.vlgmr.msrb.gmra.mxu2 %v1980_v5  ;;  %2205 = vmatmul.bf16.vlgmr.msra.gmra.mxu3 %v1980_v5 }
 0x890   : > { %2219 = vmatmul.bf16.vlgmr.msrb.gmra.mxu0 %v1980_v5  ;;  %2233 = vmatmul.bf16.vlgmr.msra.gmra.mxu1 %v1980_v5 }
 0x891   : > { %2601 = vmatpush.bf16.msra.mxu0 %v3435_v12 }
 0x895   : > { %2602 = vmatpush.bf16.msra.mxu0 %v3434_v18 }
 0x899   : > { %2603 = vmatpush.bf16.msra.mxu0 %v3433_v23 }
 0x89d   : > { %2604 = vmatpush.bf16.msra.mxu0 %v3432_v27 }
 0x8a1   : > { %2605 = vmatpush.bf16.msra.mxu0 %v3431_v31 }
 0x8a5   : > { %2606 = vmatpush.bf16.msra.mxu0 %v3430_v39 }
 0x90d   : > { %v2220_v37 = vpop.f32.mrf.mxu0  ;;  %v2234_v38 = vpop.f32.mrf.mxu1 }
 0x90e   : > { %v4488_v9 = vadd.f32 %v2220_v37, %v2017_v33  ;;  %v4490_v41 = vadd.f32 %v2234_v38, %v2018_v34 }
 0x910   : > { %v2241_v45 = vmul.f32 %v4488_v9, %v4488_v9  ;;  %v2242_v46 = vmul.f32 %v4490_v41, %v4490_v41 }
 0x912   : > { %v2249_v47 = vmul.f32 %v2241_v45, %v4488_v9  ;;  %v2250_v48 = vmul.f32 %v2242_v46, %v4490_v41  ;;  %v2192_v49 = vpop.f32.mrf.mxu2  ;;  %v2206_v50 = vpop.f32.mrf.mxu3 }
 0x913   : > { %v4502_v52 = vadd.f32 %v2192_v49, %v2015_v16  ;;  %v4504_v53 = vadd.f32 %v2206_v50, %v2016_v42 }
 0x914   : > { %v2257_v57 = vmul.f32 0.044715, %v2249_v47  ;;  %v2258_v59 = vmul.f32 0.044715, %v2250_v48 }
 0x915   : > { %v2239_v60 = vmul.f32 %v4502_v52, %v4502_v52  ;;  %v2240_v62 = vmul.f32 %v4504_v53, %v4504_v53  ;;  %v2222_v0 = vpop.f32.mrf.mxu0  ;;  %v2236_v20 = vpop.f32.mrf.mxu1 }
 0x916   : > { %v2265_v1 = vadd.f32 %v2257_v57, %v4488_v9  ;;  %v2266_v58 = vadd.f32 %v2258_v59, %v4490_v41  ;;  %v2223_v2 = vadd.f32 %v2222_v0, %v2017_v33  ;;  %v4514_v3 = vadd.f32 %v2236_v20, %v2018_v34 }
 0x917   : > { %v2247_v4 = vmul.f32 %v2239_v60, %v4502_v52  ;;  %v2248_v5 = vmul.f32 %v2240_v62, %v4504_v53 }
 0x918   : > { %v2273_v63 = vmul.f32 0.7978846, %v2265_v1  ;;  %v2245_v6 = vmul.f32 %v2223_v2, %v2223_v2  ;;  %v2246_v7 = vmul.f32 %v4514_v3, %v4514_v3  ;;  %v2274_v8 = vmul.f32 0.7978846, %v2266_v58 }
 0x919   : > { %v2255_v10 = vmul.f32 0.044715, %v2247_v4  ;;  %v2256_v11 = vmul.f32 0.044715, %v2248_v5 }
 0x91a   : > { %v2253_v12 = vmul.f32 %v2245_v6, %v2223_v2  ;;  %v2254_v14 = vmul.f32 %v2246_v7, %v4514_v3  ;;  %v2194_v15 = vpop.f32.mrf.mxu2  ;;  %v2208_v17 = vpop.f32.mrf.mxu3  ;;  %3572 = vtanh.f32 %v2273_v63 }
 0x91b   : > { %v2263_v18 = vadd.f32 %v2255_v10, %v4502_v52  ;;  %v2264_v19 = vadd.f32 %v2256_v11, %v4504_v53  ;;  %v2195_v21 = vadd.f32 %v2194_v15, %v2015_v16  ;;  %v2209_v24 = vadd.f32 %v2208_v17, %v2016_v42 }
 0x91c   : > { %v2261_v22 = vmul.f32 0.044715, %v2253_v12  ;;  %v2262_v23 = vmul.f32 0.044715, %v2254_v14  ;;  %3574 = vtanh.f32 %v2274_v8 }
 0x91d   : > { %v2271_v25 = vmul.f32 0.7978846, %v2263_v18  ;;  %v2272_v26 = vmul.f32 0.7978846, %v2264_v19  ;;  %v2243_v27 = vmul.f32 %v2195_v21, %v2195_v21  ;;  %v2244_v61 = vmul.f32 %v2209_v24, %v2209_v24 }
 0x91e   : > { %v2269_v28 = vadd.f32 %v2261_v22, %v2223_v2  ;;  %v2270_v29 = vadd.f32 %v2262_v23, %v4514_v3 }
 0x91f   : > { %v2251_v30 = vmul.f32 %v2243_v27, %v2195_v21  ;;  %3576 = vtanh.f32 %v2271_v25  ;;  %v2252_v33 = vmul.f32 %v2244_v61, %v2209_v24 }
 0x920   : > { %v2277_v31 = vmul.f32 0.7978846, %v2269_v28  ;;  %v2278_v32 = vmul.f32 0.7978846, %v2270_v29  ;;  %3578 = vtanh.f32 %v2272_v26  ;;  %v3573_v35 = vpop.eup %3572 }
 0x921   : > { %v2259_v34 = vmul.f32 0.044715, %v2251_v30  ;;  %v2260_v36 = vmul.f32 0.044715, %v2252_v33  ;;  %v2289_v40 = vadd.f32 1.0, %v3573_v35 }
 0x922   : > { %3580 = vtanh.f32 %v2277_v31  ;;  %v3575_v37 = vpop.eup %3574 }
 0x923   : > { %3582 = vtanh.f32 %v2278_v32  ;;  %v2267_v38 = vadd.f32 %v2259_v34, %v2195_v21  ;;  %v2268_v39 = vadd.f32 %v2260_v36, %v2209_v24  ;;  %v2290_v43 = vadd.f32 1.0, %v3575_v37 }
 0x924   : > { %v2297_v48 = vmul.f32 0.5, %v2289_v40 }
 0x925   : > { %v2275_v16 = vmul.f32 0.7978846, %v2267_v38  ;;  %v3577_v42 = vpop.eup %3576  ;;  %v2276_v44 = vmul.f32 0.7978846, %v2268_v39  ;;  %v2298_v50 = vmul.f32 0.5, %v2290_v43 }
 0x926   : > { %v3579_v45 = vpop.eup %3578  ;;  %v2287_v54 = vadd.f32 1.0, %v3577_v42  ;;  %v2305_v0 = vmul.f32 %v2297_v48, %v4488_v9 }
 0x927   : > { %3584 = vtanh.f32 %v2275_v16  ;;  %v2288_v57 = vadd.f32 1.0, %v3579_v45  ;;  %v2306_v58 = vmul.f32 %v2298_v50, %v4490_v41 }
 0x928   : > { %v3581_v46 = vpop.eup %3580  ;;  %3586 = vtanh.f32 %v2276_v44  ;;  %v2295_v4 = vmul.f32 0.5, %v2287_v54 }
 0x929   : > { %v3583_v47 = vpop.eup %3582  ;;  %v2293_v49 = vadd.f32 1.0, %v3581_v46  ;;  %v2296_v6 = vmul.f32 0.5, %v2288_v57 }
 0x92a   : > { %v2294_v56 = vadd.f32 1.0, %v3583_v47  ;;  %v2303_v14 = vmul.f32 %v2295_v4, %v4502_v52  ;;  %v3525_v52 = vld [vmem:[%s4671_s2] ss:$0 sm:$0xff] }
 0x92b   : > { %v2301_v59 = vmul.f32 0.5, %v2293_v49  ;;  %v2304_v9 = vmul.f32 %v2296_v6, %v4504_v53 }
 0x92c   : > { %v2302_v60 = vmul.f32 0.5, %v2294_v56 }
 0x92d   : > { %v3585_v62 = vpop.eup %3584  ;;  %v2309_v20 = vmul.f32 %v2301_v59, %v2223_v2 }
 0x92e   : > { %v3587_v1 = vpop.eup %3586  ;;  %v2310_v5 = vmul.f32 %v2302_v60, %v4514_v3  ;;  %v2291_v63 = vadd.f32 1.0, %v3585_v62 }
 0x92f   : > { %v2292_v7 = vadd.f32 1.0, %v3587_v1  ;;  %v2313_v8 = vpack.c.bf16 %v2309_v20, %v2305_v0 }
 0x930   : > { %v2299_v10 = vmul.f32 0.5, %v2291_v63  ;;  %v2314_v11 = vpack.c.bf16 %v2310_v5, %v2306_v58 }
 0x931   : > { %v2300_v12 = vmul.f32 0.5, %v2292_v7  ;;  %2607 = vmatmul.bf16.vlgmr.msra.gmra.mxu0 %v2313_v8 }
 0x932   : > { %v2307_v15 = vmul.f32 %v2299_v10, %v2195_v21  ;;  %2621 = vmatmul.bf16.vlgmr.msrb.gmra.mxu1 %v2314_v11 }
 0x933   : > { %v2308_v2 = vmul.f32 %v2300_v12, %v2209_v24 }
 0x934   : > { %v2311_v41 = vpack.c.bf16 %v2307_v15, %v2303_v14 }
 0x935   : > { %v2312_v17 = vpack.c.bf16 %v2308_v2, %v2304_v9 }
 0x936   : > { %2579 = vmatmul.bf16.vlgmr.msra.gmra.mxu2 %v2311_v41 }
 0x937   : > { %2593 = vmatmul.bf16.vlgmr.msrb.gmra.mxu3 %v2312_v17 }
 0x9ae   : > { %v2608_v18 = vpop.f32.mrf.mxu0 }
 0x9af   : > { %v2622_v23 = vpop.f32.mrf.mxu1 }
 0x9b6   : > { %v2610_v29 = vpop.f32.mrf.mxu0 }
 0x9b7   : > { %v2624_v30 = vpop.f32.mrf.mxu1 }
 0x9b9   : > { %v2580_v3 = vpop.f32.mrf.mxu2 }
 0x9ba   : > { %v2594_v19 = vpop.f32.mrf.mxu3 }
 0x9bb   : > { %v2595_v22 = vadd.f32 %v2594_v19, %v2580_v3 }
 0x9bd   : > { %v2609_v25 = vadd.f32 %v2608_v18, %v2595_v22 }
 0x9bf   : > { %v2623_v26 = vadd.f32 %v2622_v23, %v2609_v25 }
 0x9c1   : > { %v2627_v21 = vadd.f32 %v2623_v26, %v4359_v51  ;;  %v2582_v53 = vpop.f32.mrf.mxu2 }
 0x9c2   : > { %v2596_v24 = vpop.f32.mrf.mxu3 }
 0x9c3   : > { %v2633_v27 = vadd.f32 %v3525_v52, %v2627_v21  ;;  %v2597_v28 = vadd.f32 %v2596_v24, %v2582_v53 }
 0x9c5   : > { %2635 = vst [vmem:[#allocation2] sm:$0xff] %v2633_v27  ;;  %v2611_v61 = vadd.f32 %v2610_v29, %v2597_v28 }
 0x9c7   : > { %v2625_v31 = vadd.f32 %v2624_v30, %v2611_v61 }
 0x9c9   : > { %v2628_v32 = vadd.f32 %v2625_v31, %v4362_v55  ;;  %2640 = sbr.rel (%p3335_p9) target bundleno = 2785 (0xae1), region = 112 }
 0x9cb   : > { %v2634_v33 = vadd.f32 %v3525_v52, %v2628_v32 }
 0x9cd   : > { %2636 = vst [vmem:[#allocation2 + $0x8] sm:$0xff] %v2634_v33 }
 0x9ce   : > { %2643 = vadd.xlane.f32.xlu0 %v2633_v27  ;;  %v3590_v59 = vld [vmem:[%s4673_s24] ss:$0 sm:$0xff] }
 0x9cf   : > { %v3591_v0 = vld [vmem:[%s4674_s10] ss:$0 sm:$0xff] }
 0x9d6   : > { %2645 = vadd.xlane.f32.xlu0 %v2634_v33 }
 0xa41   : > { %v2644_v34 = vpop.xlane.xlu0 %2643 }
 0xa42   : > { %v2647_v51 = vmul.f32 %v2644_v34, %v3933_v13 }
 0xa44   : > { %v2649_v35 = vsub.f32 %v2633_v27, %v2647_v51 }
 0xa46   : > { %v2651_v36 = vmul.f32 %v2649_v35, %v2649_v35 }
 0xa48   : > { %2653 = vadd.xlane.f32.xlu1 %v2651_v36 }
 0xa49   : > { %v2646_v37 = vpop.xlane.xlu0 %2645 }
 0xa4a   : > { %v2648_v38 = vmul.f32 %v2646_v37, %v3933_v13 }
 0xa4c   : > { %v2650_v39 = vsub.f32 %v2634_v33, %v2648_v38 }
 0xa4e   : > { %v2652_v40 = vmul.f32 %v2650_v39, %v2650_v39 }
 0xa50   : > { %2655 = vadd.xlane.f32.xlu1 %v2652_v40 }
 0xabb   : > { %v2654_v55 = vpop.xlane.xlu1 %2653 }
 0xabc   : > { %v2657_v16 = vmul.f32 %v2654_v55, %v3933_v13 }
 0xabe   : > { %v2659_v42 = vadd.f32 1e-05, %v2657_v16 }
 0xac0   : > { %3592 = vrsqrt.f32 %v2659_v42  ;;  %vm2667_vm10 = vweird.f32 %v2659_v42 }
 0xac3   : > { %v2656_v43 = vpop.xlane.xlu1 %2655 }
 0xac4   : > { %v2658_v44 = vmul.f32 %v2656_v43, %v3933_v13 }
 0xac6   : > { %v3593_v45 = vpop.eup %3592  ;;  %v2660_v46 = vadd.f32 1e-05, %v2658_v44 }
 0xac7   : > { %v2662_v47 = vmul.f32 %v3593_v45, %v2659_v42  ;;  %vm2668_vm9 = vweird.f32 %v3593_v45 }
 0xac8   : > { %3594 = vrsqrt.f32 %v2660_v46  ;;  %vm2669_vm11 = vmor %vm2667_vm10, %vm2668_vm9  ;;  %vm2677_vm13 = vweird.f32 %v2660_v46 }
 0xac9   : > { %v2663_v48 = vmul.f32 %v3593_v45, %v2662_v47 }
 0xacb   : > { %v2664_v49 = vmul.f32 0.5, %v2663_v48 }
 0xacd   : > { %v2665_v50 = vsub.f32 1.5, %v2664_v49 }
 0xace   : > { %v3595_v54 = vpop.eup %3594 }
 0xacf   : > { %v2666_v56 = vmul.f32 %v3593_v45, %v2665_v50  ;;  %v2672_v57 = vmul.f32 %v3595_v54, %v2660_v46  ;;  %vm2678_vm12 = vweird.f32 %v3595_v54 }
 0xad0   : > { %vm2679_vm14 = vmor %vm2677_vm13, %vm2678_vm12 }
 0xad1   : > { %v2670_v60 = vsel %vm2669_vm11, %v3593_v45, %v2666_v56  ;;  %v2673_v62 = vmul.f32 %v3595_v54, %v2672_v57 }
 0xad2   : > { %v2681_v13 = vmul.f32 %v2670_v60, %v2649_v35 }
 0xad3   : > { %v2674_v20 = vmul.f32 0.5, %v2673_v62 }
 0xad4   : > { %v2686_v1 = vmul.f32 %v3590_v59, %v2681_v13 }
 0xad5   : > { %v2675_v58 = vsub.f32 1.5, %v2674_v20 }
 0xad6   : > { %v2691_v4 = vadd.f32 %v3591_v0, %v2686_v1 }
 0xad7   : > { %v2676_v5 = vmul.f32 %v3595_v54, %v2675_v58 }
 0xad8   : > { %2693 = vst [vmem:[#allocation10] sm:$0xff] %v2691_v4 }
 0xad9   : > { %v2680_v63 = vsel %vm2679_vm14, %v3595_v54, %v2676_v5 }
 0xada   : > { %v2682_v6 = vmul.f32 %v2680_v63, %v2650_v39 }
 0xadc   : > { %v2687_v7 = vmul.f32 %v3590_v59, %v2682_v6 }
 0xade   : > { %v2692_v8 = vadd.f32 %v3591_v0, %v2687_v7 }
 0xae0   : > { %2695 = vst [vmem:[#allocation10 + $0x8] sm:$0xff] %v2692_v8 }
 0xae1 PF: > { %s4675_s11 = sld [smem:[#allocation16_spill]]  ;;  %s3714_s12 = smov [#allocation10]  }
 0xae2   : > { %s4677_s29 = sld [smem:[#allocation37_spill]]  ;;  %s2704_s14 = sshll.u32 %s3714_s12, 4  ;;  %s2705_s14 = int_to_ptr.vmem [resolvable:$true] %s2704_s14 }
 0xae3   : > { %s3715_s30 = smov 128   ;;  %s3716_s8 = smov 8  }
 0xae7   : > { %s4676_s13 = sadd.s32 4294967295, %s4675_s11  }
 0xae8   : > { %p3482_p10 = scmp.eq.s32.totalorder %s4676_s13, 1  ;;  %s2706_s0 = sshll.u32 %s4677_s29, 4  ;;  %s2707_s0 = int_to_ptr.hbm [resolvable:$true] %s2706_s0 }
 0xaea   : > { %3463 = dma.vmem_to_hbm [thread:$0]  (%p3482_p10), %s2705_s14, 256, %s2707_s0, [#allocation5], %s3715_s30, %s3715_s30, %s3716_s8  }
 0xaeb   : > { %3690 = dma.done.wait (%p3482_p10), [#allocation5], 256  }
 0xaec   : > { %3692 = vsyncadd (%p3482_p10), [#allocation5], 4294967040 }
 0xaed PF: > { %s4678_s16 = sld [smem:[#allocation16_spill]] }
 0xaee   : > { %s4679_s27 = sld [smem:[#allocation15_spill]] }
 0xaef   : > { %s4680_s28 = sld [smem:[#allocation17_spill]] }
 0xaf3   : > { %s31_s29 = sadd.s32 1, %s4678_s16  }
 0xaf4   : > { %p28_p11 = scmp.ge.s32.totalorder %s31_s29, 4  }
 0xaf6   :  { %30 = sbr.rel (!%p28_p11) target bundleno = 23 (0x17), region = 176 }
 0xafb   :  { %2723 = vsyncpa [#allocation5], 1 }
 0xafc   :  { %2725 = vsyncpa [#allocation5 + $0x1], 1 }
 0xafd   :  { %2726 = vsyncpa [#allocation6], 1 }
 0xafe   :  { %2728 = vsyncpa [#allocation6 + $0x1], 1 }
 0xaff   :  { %2729 = vsyncpa [#allocation8], 1 }

</bundles_post_ra>
